<compile_context>
chip_gen: v7x
topology: tpu7x:2x2x1
jax: 0.10.0
libtpu: 0.0.40
codegen_flags: <defaults>
</compile_context>

<pallas_src>
import math
from functools import partial

import jax
import jax.numpy as jnp
from jax.experimental import pallas as pl
from jax.experimental.pallas import tpu as pltpu

VMEM = pltpu.MemorySpace.VMEM

# ----------------------------- configuration --------------------------------
N_PER_BATCH = 32          # points per cloud
NUM_BATCHES = 2
N_POINTS = N_PER_BATCH * NUM_BATCHES
C_IN = 16                 # per-point feature dim of x
RATIO = 0.5
K_NN = 8
OVERLAP_RATIO = 0.2
TRANSFORMER_DIM = 128
NUM_HEADS = 4
LOCAL_HIDDEN = 64         # local_nn = MLP([C_IN + 3, 64, 256])
CONV_OUT = 256            # feature_reduction = Linear(256, 128)

# TODO(synk): the torch_geometric MLP used as PointNetConv's local_nn may apply
# BatchNorm between layers; we implement Linear-ReLU-Linear (no BN), matching
# MLPWithoutBatchNorm semantics.

# --------------------- packed-parameter slab layout --------------------------
# bf16 slab, 128 lanes wide
_W1Q_R, _W1Q_ROWS = 0, 8          # (8, 64)   pos part of conv_w1 (rows 0:3 real)
_W1_R, _W1_ROWS = 8, 24           # (24, 64)  conv_w1, table-aligned (rows 19:24 zero)
_FRW_R = 32                        # (256, 128)
_WO_R = 288                        # (128, 128)
_WM2_R = 416                       # (256, 128)
_W128_ROWS = 672

# bf16 slab, 384 lanes wide
_W2_R = 0                          # (64, 256)
_WM1_R = 64                        # (128, 256)
_WQKV_R = 192                      # (128, 384)
_W384_ROWS = 320

# f32 bias / LN slab, 384 lanes wide, one logical vector per row
(_B1_ROW, _B2_ROW, _FRB_ROW, _BQKV_ROW, _BO_ROW, _LN1G_ROW, _LN1B_ROW,
 _BM1_ROW, _BM2_ROW, _LN2G_ROW, _LN2B_ROW) = range(11)
_BIAS_ROWS = 16

_TABLE_W = _W1_ROWS               # point table width (x | pos | zero pad) = 24


def _round_up(v, m):
    return ((v + m - 1) // m) * m


def _layernorm(z, g, b, eps=1e-5):
    mu = jnp.mean(z, axis=-1, keepdims=True)
    zc = z - mu
    var = jnp.mean(zc * zc, axis=-1, keepdims=True)
    return zc * jax.lax.rsqrt(var + eps) * g + b


# ----------------------------- the fused kernel ------------------------------
def _fused_sa_kernel(posq_ref, posaT_ref, bq_ref, ba_ref, table_ref,
                     w128_ref, w384_ref, bias_ref, out_ref, att_scr,
                     *, num_heads, k_nn, m_valid):
    """kNN + gather + PointNetConv + feature_reduction + TransformerBlock.

    posq_ref : (MP, 8)        query (sampled) positions, coords padded 3->8, f32
    posaT_ref: (8, NP)        all positions, transposed, padded, f32
    bq_ref   : (MP, 1)        query batch ids (-1 for padded rows), int32
    ba_ref   : (1, NP)        key batch ids   (-2 for padded cols), int32
    table_ref: (NP, 24)       per-point [x(16) | pos(3) | 0] table, bf16
    w128_ref : (672, 128)     packed bf16 weights (width 128)
    w384_ref : (320, 384)     packed bf16 weights (width 384)
    bias_ref : (16, 384)      packed f32 biases / layernorm vectors
    out_ref  : (MP, 128)      f32
    att_scr  : (MP, 128)      f32 VMEM scratch for per-head attention outputs
    """
    bf16 = jnp.bfloat16
    MP = out_ref.shape[0]
    D = out_ref.shape[1]
    NP = posaT_ref.shape[1]
    hd = D // num_heads

    # ---- static views into the packed parameter slabs (no load yet) ---------
    w1q_v = w128_ref.at[_W1Q_R:_W1Q_R + _W1Q_ROWS, 0:LOCAL_HIDDEN]     # (8, 64)
    w1_v = w128_ref.at[_W1_R:_W1_R + _W1_ROWS, 0:LOCAL_HIDDEN]         # (24, 64)
    frw_v = w128_ref.at[_FRW_R:_FRW_R + CONV_OUT, :]                   # (256, 128)
    wo_v = w128_ref.at[_WO_R:_WO_R + D, :]                             # (128, 128)
    wm2_v = w128_ref.at[_WM2_R:_WM2_R + 2 * D, :]                      # (256, 128)

    w2_v = w384_ref.at[_W2_R:_W2_R + LOCAL_HIDDEN, 0:CONV_OUT]         # (64, 256)
    wm1_v = w384_ref.at[_WM1_R:_WM1_R + D, 0:2 * D]                    # (128, 256)
    wqkv_v = w384_ref.at[_WQKV_R:_WQKV_R + D, :]                       # (128, 384)

    b1 = bias_ref[_B1_ROW:_B1_ROW + 1, 0:LOCAL_HIDDEN]
    b2 = bias_ref[_B2_ROW:_B2_ROW + 1, 0:CONV_OUT]
    frb = bias_ref[_FRB_ROW:_FRB_ROW + 1, 0:D]
    bqkv = bias_ref[_BQKV_ROW:_BQKV_ROW + 1, 0:3 * D]
    bo = bias_ref[_BO_ROW:_BO_ROW + 1, 0:D]
    g1 = bias_ref[_LN1G_ROW:_LN1G_ROW + 1, 0:D]
    be1 = bias_ref[_LN1B_ROW:_LN1B_ROW + 1, 0:D]
    bm1 = bias_ref[_BM1_ROW:_BM1_ROW + 1, 0:2 * D]
    bm2 = bias_ref[_BM2_ROW:_BM2_ROW + 1, 0:D]
    g2 = bias_ref[_LN2G_ROW:_LN2G_ROW + 1, 0:D]
    be2 = bias_ref[_LN2B_ROW:_LN2B_ROW + 1, 0:D]

    # ---- masked pairwise squared distances (bf16 MXU cross term) ------------
    pq = posq_ref[...]                                                  # (MP, 8) f32
    paT = posaT_ref[...]                                                # (8, NP) f32
    cross = jnp.dot(pq.astype(bf16), paT.astype(bf16),
                    preferred_element_type=jnp.float32)                 # (MP, NP)
    q2 = jnp.sum(pq * pq, axis=-1, keepdims=True)                       # (MP, 1)
    p2 = jnp.sum(paT * paT, axis=0, keepdims=True)                      # (1, NP)
    d = q2 - 2.0 * cross + p2
    d = jnp.where(bq_ref[...] == ba_ref[...], d, 1e30)                  # same-cloud only

    col_np = jax.lax.broadcasted_iota(jnp.int32, (MP, NP), 1)

    # ---- per-query correction for the gather-fused first Linear -------------
    #   feat_j @ W1 = x_j @ W1_x + (pos_j - pos_i) @ W1_pos
    #              = onehot_j @ (table @ W1)      - pos_i @ W1_pos
    poscorr = -jnp.dot(pq.astype(bf16), w1q_v[...],
                       preferred_element_type=jnp.float32)              # (MP, 64)
    base = b1 + poscorr

    tw1 = jnp.dot(table_ref[...], w1_v[...],
                  preferred_element_type=jnp.float32).astype(bf16)      # (NP, 64)
    w2 = w2_v[...]                                                      # (64, 256) bf16

    # ---- top-k + gather + edge MLP + 'max' aggregation, chunked per neighbour
    agg = None
    for _ in range(k_nn):                               # static unroll, k = 8
        m = jnp.min(d, axis=-1, keepdims=True)
        cand = jnp.where(d == m, col_np, NP)            # first-occurrence argmin
        first = jnp.min(cand, axis=-1, keepdims=True)
        onehot = (col_np == first)
        d = jnp.where(onehot, 1e30, d)                  # exclude for next round
        h1 = jnp.maximum(
            jnp.dot(onehot.astype(bf16), tw1,
                    preferred_element_type=jnp.float32) + base, 0.0)    # (MP, 64)
        h2 = jnp.dot(h1.astype(bf16), w2,
                     preferred_element_type=jnp.float32)                # (MP, 256)
        agg = h2 if agg is None else jnp.maximum(agg, h2)
    agg = agg + b2                       # per-column bias commutes with the max

    # ---- feature_reduction: Linear(256, 128) ---------------------------------
    x = jnp.dot(agg.astype(bf16), frw_v[...],
                preferred_element_type=jnp.float32) + frb               # (MP, 128)

    # ---- TransformerBlock -----------------------------------------------------
    xb = x.astype(bf16)
    qkv = jnp.dot(xb, wqkv_v[...],
                  preferred_element_type=jnp.float32) + bqkv            # (MP, 384)
    scale = 1.0 / math.sqrt(hd)

    # reference flattens all sampled points into one sequence, so only padded
    # key columns are masked (no per-cloud attention mask).
    key_bias = jnp.where(
        jax.lax.broadcasted_iota(jnp.int32, (MP, MP), 1) < m_valid, 0.0, -1e30)

    contract_last = (((1,), (1,)), ((), ()))
    for hh in range(num_heads):                                         # 4 static iters
        q_h = (qkv[:, hh * hd:(hh + 1) * hd] * scale).astype(bf16)
        k_h = qkv[:, D + hh * hd:D + (hh + 1) * hd].astype(bf16)
        v_h = qkv[:, 2 * D + hh * hd:2 * D + (hh + 1) * hd].astype(bf16)
        s = jax.lax.dot_general(q_h, k_h, contract_last,
                                preferred_element_type=jnp.float32)     # (MP, MP)
        s = s + key_bias
        s = s - jnp.max(s, axis=-1, keepdims=True)
        p = jnp.exp(s)
        p = p * pl.reciprocal(jnp.sum(p, axis=-1, keepdims=True), approx=True)
        att_scr[:, hh * hd:(hh + 1) * hd] = jnp.dot(
            p.astype(bf16), v_h, preferred_element_type=jnp.float32)    # (MP, hd)

    att = jnp.dot(att_scr[...].astype(bf16), wo_v[...],
                  preferred_element_type=jnp.float32) + bo              # (MP, 128)

    x1 = _layernorm(x + att, g1, be1)
    hm = jnp.maximum(jnp.dot(x1.astype(bf16), wm1_v[...],
                             preferred_element_type=jnp.float32) + bm1, 0.0)
    mlp_out = jnp.dot(hm.astype(bf16), wm2_v[...],
                      preferred_element_type=jnp.float32) + bm2
    out_ref[...] = _layernorm(x1 + mlp_out, g2, be2)


# ----------------------------- parameter packing -----------------------------
def pack_params(params):
    bf, f32 = jnp.bfloat16, jnp.float32
    D = TRANSFORMER_DIM

    w128 = jnp.zeros((_W128_ROWS, 128), bf)
    w1q = jnp.zeros((_W1Q_ROWS, LOCAL_HIDDEN), f32).at[0:3].set(
        params['conv_w1'][C_IN:C_IN + 3])
    w128 = w128.at[_W1Q_R:_W1Q_R + _W1Q_ROWS, 0:LOCAL_HIDDEN].set(w1q.astype(bf))
    w128 = w128.at[_W1_R:_W1_R + C_IN + 3, 0:LOCAL_HIDDEN].set(
        params['conv_w1'].astype(bf))
    w128 = w128.at[_FRW_R:_FRW_R + CONV_OUT, :].set(params['fr_w'].astype(bf))
    w128 = w128.at[_WO_R:_WO_R + D, :].set(params['wo'].astype(bf))
    w128 = w128.at[_WM2_R:_WM2_R + 2 * D, :].set(params['mlp_w2'].astype(bf))

    w384 = jnp.zeros((_W384_ROWS, 384), bf)
    w384 = w384.at[_W2_R:_W2_R + LOCAL_HIDDEN, 0:CONV_OUT].set(
        params['conv_w2'].astype(bf))
    w384 = w384.at[_WM1_R:_WM1_R + D, 0:2 * D].set(params['mlp_w1'].astype(bf))
    wqkv = jnp.concatenate([params['wq'], params['wk'], params['wv']], axis=1)
    w384 = w384.at[_WQKV_R:_WQKV_R + D, :].set(wqkv.astype(bf))

    bias = jnp.zeros((_BIAS_ROWS, 384), f32)

    def setrow(b, r, v):
        v = v.reshape(-1).astype(f32)
        return b.at[r, 0:v.shape[0]].set(v)

    bias = setrow(bias, _B1_ROW, params['conv_b1'])
    bias = setrow(bias, _B2_ROW, params['conv_b2'])
    bias = setrow(bias, _FRB_ROW, params['fr_b'])
    bias = setrow(bias, _BQKV_ROW, jnp.concatenate(
        [params['bq'].reshape(-1), params['bk'].reshape(-1), params['bv'].reshape(-1)]))
    bias = setrow(bias, _BO_ROW, params['bo'])
    bias = setrow(bias, _LN1G_ROW, params['ln1_g'])
    bias = setrow(bias, _LN1B_ROW, params['ln1_b'])
    bias = setrow(bias, _BM1_ROW, params['mlp_b1'])
    bias = setrow(bias, _BM2_ROW, params['mlp_b2'])
    bias = setrow(bias, _LN2G_ROW, params['ln2_g'])
    bias = setrow(bias, _LN2B_ROW, params['ln2_b'])
    return w128, w384, bias


# ----------------------------- sampling (plain JAX) --------------------------
# TODO(synk): farthest point sampling is an inherently sequential argmax chain
# with no clean Pallas equivalent; it stays as a lax.fori_loop (start point is
# the first point of each cloud instead of torch_cluster's random start).
def fps_segment(pos_seg, n_samples):
    n = pos_seg.shape[0]
    sel0 = jnp.zeros((n_samples,), jnp.int32)
    dist0 = jnp.full((n,), jnp.inf, jnp.float32)

    def body(i, carry):
        sel, dists = carry
        last = pos_seg[sel[i - 1]]
        d = jnp.sum((pos_seg - last) ** 2, axis=-1)
        dists = jnp.minimum(dists, d)
        nxt = jnp.argmax(dists).astype(jnp.int32)
        return sel.at[i].set(nxt), dists

    sel, _ = jax.lax.fori_loop(1, n_samples, body, (sel0, dist0))
    return sel


# ----------------------------- full forward ----------------------------------
def enhanced_sa_forward(params, x, pos, batch, segments):
    # --- OverlapSamplingModule (FPS) -----------------------------------------
    base_parts, extra_parts = [], []
    for start, count in segments:
        pos_seg = pos[start:start + count]
        base_parts.append(fps_segment(pos_seg, int(math.ceil(RATIO * count))) + start)
        extra_parts.append(fps_segment(pos_seg, int(math.ceil(OVERLAP_RATIO * count))) + start)
    base_idx = jnp.concatenate(base_parts)
    extra_idx = jnp.concatenate(extra_parts)
    overlap_size = int(base_idx.shape[0] * OVERLAP_RATIO)
    combined_idx = jnp.concatenate([base_idx, extra_idx[:overlap_size]])

    M = int(combined_idx.shape[0])                  # static (38)
    N = pos.shape[0]
    MP = _round_up(M, 16)                           # 48: sublane + bf16-pair aligned
    NP = _round_up(N, 128)                          # lane-dense key axis

    pos_s = pos[combined_idx]                       # (M, 3)
    batch_s = batch[combined_idx]                   # (M,)

    # --- padded kernel operands ------------------------------------------------
    pos_q8 = jnp.zeros((MP, 8), jnp.float32).at[:M, :3].set(pos_s)
    pos_a8T = jnp.zeros((8, NP), jnp.float32).at[:3, :N].set(pos.T)
    bq = jnp.full((MP, 1), -1, jnp.int32).at[:M, 0].set(batch_s)
    ba = jnp.full((1, NP), -2, jnp.int32).at[0, :N].set(batch)

    table = jnp.zeros((NP, _TABLE_W), jnp.float32)
    table = table.at[:N, :C_IN].set(x).at[:N, C_IN:C_IN + 3].set(pos)
    table = table.astype(jnp.bfloat16)

    w128, w384, bias = pack_params(params)

    # --- single fused kernel ----------------------------------------------------
    out_pad = pl.pallas_call(
        partial(_fused_sa_kernel, num_heads=NUM_HEADS, k_nn=K_NN, m_valid=M),
        out_shape=jax.ShapeDtypeStruct((MP, TRANSFORMER_DIM), jnp.float32),
        in_specs=[pl.BlockSpec(memory_space=VMEM)] * 8,
        out_specs=pl.BlockSpec(memory_space=VMEM),
        scratch_shapes=[pltpu.VMEM((MP, TRANSFORMER_DIM), jnp.float32)],
    )(pos_q8, pos_a8T, bq, ba, table, w128, w384, bias)

    return out_pad[:M], pos_s, batch_s


# ----------------------------- parameters ------------------------------------
def init_params(key):
    ks = jax.random.split(key, 12)

    def w(k, shape, scale=0.05):
        return jax.random.normal(k, shape, jnp.float32) * scale

    D = TRANSFORMER_DIM
    return {
        # local_nn: MLP([C_IN + 3, 64, 256])
        'conv_w1': w(ks[0], (C_IN + 3, LOCAL_HIDDEN)),
        'conv_b1': jnp.zeros((1, LOCAL_HIDDEN), jnp.float32),
        'conv_w2': w(ks[1], (LOCAL_HIDDEN, CONV_OUT)),
        'conv_b2': jnp.zeros((1, CONV_OUT), jnp.float32),
        # feature_reduction: Linear(256, 128)
        'fr_w': w(ks[2], (CONV_OUT, D)),
        'fr_b': jnp.zeros((1, D), jnp.float32),
        # MultiheadAttention(128, 4)
        'wq': w(ks[3], (D, D)), 'bq': jnp.zeros((1, D), jnp.float32),
        'wk': w(ks[4], (D, D)), 'bk': jnp.zeros((1, D), jnp.float32),
        'wv': w(ks[5], (D, D)), 'bv': jnp.zeros((1, D), jnp.float32),
        'wo': w(ks[6], (D, D)), 'bo': jnp.zeros((1, D), jnp.float32),
        # LayerNorms
        'ln1_g': jnp.ones((1, D), jnp.float32), 'ln1_b': jnp.zeros((1, D), jnp.float32),
        'ln2_g': jnp.ones((1, D), jnp.float32), 'ln2_b': jnp.zeros((1, D), jnp.float32),
        # MLPWithoutBatchNorm([128, 256, 128])
        'mlp_w1': w(ks[7], (D, 2 * D)), 'mlp_b1': jnp.zeros((1, 2 * D), jnp.float32),
        'mlp_w2': w(ks[8], (2 * D, D)), 'mlp_b2': jnp.zeros((1, D), jnp.float32),
    }


# ----------------------------- main -------------------------------------------
if __name__ == "__main__":
    key = jax.random.PRNGKey(0)
    k_pos, k_x, k_p = jax.random.split(key, 3)

    pos = jax.random.normal(k_pos, (N_POINTS, 3), jnp.float32)
    x = jax.random.normal(k_x, (N_POINTS, C_IN), jnp.float32)
    batch = jnp.repeat(jnp.arange(NUM_BATCHES, dtype=jnp.int32), N_PER_BATCH)
    segments = tuple((b * N_PER_BATCH, N_PER_BATCH) for b in range(NUM_BATCHES))

    params = init_params(k_p)

    fwd = jax.jit(enhanced_sa_forward, static_argnums=(4,))
    out, pos_out, batch_out = fwd(params, x, pos, batch, segments)
    jax.block_until_ready((out, pos_out, batch_out))

    expected_m = (int(math.ceil(RATIO * N_PER_BATCH)) * NUM_BATCHES
                  + int(int(math.ceil(RATIO * N_PER_BATCH)) * NUM_BATCHES * OVERLAP_RATIO))
    assert out.shape == (expected_m, TRANSFORMER_DIM), out.shape
    assert pos_out.shape == (expected_m, 3)
    assert batch_out.shape == (expected_m,)
    assert bool(jnp.all(jnp.isfinite(out)))
    print("KERNEL_OK")
</pallas_src>

<mosaic_0001>
module attributes {stable_mosaic.version = 11 : i64} {
  func.func @_fused_sa_kernel(%arg0: memref<48x8xf32, #tpu.memory_space<vmem>>, %arg1: memref<8x128xf32, #tpu.memory_space<vmem>>, %arg2: memref<48x1xi32, #tpu.memory_space<vmem>>, %arg3: memref<1x128xi32, #tpu.memory_space<vmem>>, %arg4: memref<128x24xbf16, #tpu.memory_space<vmem>>, %arg5: memref<672x128xbf16, #tpu.memory_space<vmem>>, %arg6: memref<320x384xbf16, #tpu.memory_space<vmem>>, %arg7: memref<16x384xf32, #tpu.memory_space<vmem>>, %arg8: memref<48x128xf32, #tpu.memory_space<vmem>>, %arg9: memref<48x128xf32, #tpu.memory_space<vmem>>) attributes {dimension_semantics = [], scalar_prefetch = 0 : i64, scratch_operands = 1 : i64, tpu.core_type = #tpu.core_type<tc>} {
    %c0 = arith.constant 0 : index
    %c0_0 = arith.constant 0 : index
    %0 = vector.load %arg7[%c0, %c0_0] : memref<16x384xf32, #tpu.memory_space<vmem>>, vector<1x64xf32>
    %c1 = arith.constant 1 : index
    %c0_1 = arith.constant 0 : index
    %1 = vector.load %arg7[%c1, %c0_1] : memref<16x384xf32, #tpu.memory_space<vmem>>, vector<1x256xf32>
    %c2 = arith.constant 2 : index
    %c0_2 = arith.constant 0 : index
    %2 = vector.load %arg7[%c2, %c0_2] : memref<16x384xf32, #tpu.memory_space<vmem>>, vector<1x128xf32>
    %c3 = arith.constant 3 : index
    %c0_3 = arith.constant 0 : index
    %3 = vector.load %arg7[%c3, %c0_3] : memref<16x384xf32, #tpu.memory_space<vmem>>, vector<1x384xf32>
    %c4 = arith.constant 4 : index
    %c0_4 = arith.constant 0 : index
    %4 = vector.load %arg7[%c4, %c0_4] : memref<16x384xf32, #tpu.memory_space<vmem>>, vector<1x128xf32>
    %c5 = arith.constant 5 : index
    %c0_5 = arith.constant 0 : index
    %5 = vector.load %arg7[%c5, %c0_5] : memref<16x384xf32, #tpu.memory_space<vmem>>, vector<1x128xf32>
    %c6 = arith.constant 6 : index
    %c0_6 = arith.constant 0 : index
    %6 = vector.load %arg7[%c6, %c0_6] : memref<16x384xf32, #tpu.memory_space<vmem>>, vector<1x128xf32>
    %c7 = arith.constant 7 : index
    %c0_7 = arith.constant 0 : index
    %7 = vector.load %arg7[%c7, %c0_7] : memref<16x384xf32, #tpu.memory_space<vmem>>, vector<1x256xf32>
    %c8 = arith.constant 8 : index
    %c0_8 = arith.constant 0 : index
    %8 = vector.load %arg7[%c8, %c0_8] : memref<16x384xf32, #tpu.memory_space<vmem>>, vector<1x128xf32>
    %c9 = arith.constant 9 : index
    %c0_9 = arith.constant 0 : index
    %9 = vector.load %arg7[%c9, %c0_9] : memref<16x384xf32, #tpu.memory_space<vmem>>, vector<1x128xf32>
    %c10 = arith.constant 10 : index
    %c0_10 = arith.constant 0 : index
    %10 = vector.load %arg7[%c10, %c0_10] : memref<16x384xf32, #tpu.memory_space<vmem>>, vector<1x128xf32>
    %c0_11 = arith.constant 0 : index
    %c0_12 = arith.constant 0 : index
    %11 = vector.load %arg0[%c0_11, %c0_12] : memref<48x8xf32, #tpu.memory_space<vmem>>, vector<48x8xf32>
    %c0_13 = arith.constant 0 : index
    %c0_14 = arith.constant 0 : index
    %12 = vector.load %arg1[%c0_13, %c0_14] : memref<8x128xf32, #tpu.memory_space<vmem>>, vector<8x128xf32>
    %13 = arith.truncf %11 : vector<48x8xf32> to vector<48x8xbf16>
    %14 = arith.truncf %12 : vector<8x128xf32> to vector<8x128xbf16>
    %cst = arith.constant dense<0.000000e+00> : vector<48x128xf32>
    %15 = tpu.matmul %13, %14, %cst {dimension_numbers = #tpu.dot_dimension_numbers<[1], [0], [0], [1], [0, 0, 1, 1], [], []>} : vector<48x8xbf16>, vector<8x128xbf16>, vector<48x128xf32> -> vector<48x128xf32>
    %16 = arith.mulf %11, %11 : vector<48x8xf32>
    %cst_15 = arith.constant dense<0.000000e+00> : vector<48xf32>
    %17 = vector.multi_reduction <add>, %16, %cst_15 [1] : vector<48x8xf32> to vector<48xf32>
    %18 = vector.shape_cast %17 : vector<48xf32> to vector<48x1xf32>
    %19 = arith.mulf %12, %12 : vector<8x128xf32>
    %cst_16 = arith.constant dense<0.000000e+00> : vector<128xf32>
    %20 = vector.multi_reduction <add>, %19, %cst_16 [0] : vector<8x128xf32> to vector<128xf32>
    %21 = vector.shape_cast %20 : vector<128xf32> to vector<1x128xf32>
    %cst_17 = arith.constant 2.000000e+00 : f32
    %22 = vector.broadcast %cst_17 : f32 to vector<48x128xf32>
    %23 = arith.mulf %22, %15 : vector<48x128xf32>
    %24 = vector.broadcast %18 : vector<48x1xf32> to vector<48x128xf32>
    %25 = arith.subf %24, %23 : vector<48x128xf32>
    %26 = vector.broadcast %21 : vector<1x128xf32> to vector<48x128xf32>
    %27 = arith.addf %25, %26 : vector<48x128xf32>
    %c0_18 = arith.constant 0 : index
    %c0_19 = arith.constant 0 : index
    %28 = vector.load %arg2[%c0_18, %c0_19] : memref<48x1xi32, #tpu.memory_space<vmem>>, vector<48x1xi32>
    %c0_20 = arith.constant 0 : index
    %c0_21 = arith.constant 0 : index
    %29 = vector.load %arg3[%c0_20, %c0_21] : memref<1x128xi32, #tpu.memory_space<vmem>>, vector<1x128xi32>
    %30 = vector.broadcast %28 : vector<48x1xi32> to vector<48x128xi32>
    %31 = vector.broadcast %29 : vector<1x128xi32> to vector<48x128xi32>
    %32 = arith.cmpi eq, %30, %31 : vector<48x128xi32>
    %cst_22 = arith.constant 1.000000e+30 : f32
    %33 = vector.broadcast %cst_22 : f32 to vector<48x128xf32>
    %34 = arith.select %32, %27, %33 : vector<48x128xi1>, vector<48x128xf32>
    %35 = tpu.iota {dimensions = array<i32: 1>} : vector<48x128xi32>
    %36 = arith.truncf %11 : vector<48x8xf32> to vector<48x8xbf16>
    %c0_23 = arith.constant 0 : index
    %c0_24 = arith.constant 0 : index
    %37 = vector.load %arg5[%c0_23, %c0_24] : memref<672x128xbf16, #tpu.memory_space<vmem>>, vector<8x64xbf16>
    %cst_25 = arith.constant dense<0.000000e+00> : vector<48x64xf32>
    %38 = tpu.matmul %36, %37, %cst_25 {dimension_numbers = #tpu.dot_dimension_numbers<[1], [0], [0], [1], [0, 0, 1, 1], [], []>} : vector<48x8xbf16>, vector<8x64xbf16>, vector<48x64xf32> -> vector<48x64xf32>
    %cst_26 = arith.constant 0.000000e+00 : f32
    %39 = vector.broadcast %cst_26 : f32 to vector<48x64xf32>
    %40 = arith.subf %39, %38 : vector<48x64xf32>
    %41 = vector.broadcast %0 : vector<1x64xf32> to vector<48x64xf32>
    %42 = arith.addf %41, %40 : vector<48x64xf32>
    %c0_27 = arith.constant 0 : index
    %c0_28 = arith.constant 0 : index
    %43 = vector.load %arg4[%c0_27, %c0_28] : memref<128x24xbf16, #tpu.memory_space<vmem>>, vector<128x24xbf16>
    %c8_29 = arith.constant 8 : index
    %c0_30 = arith.constant 0 : index
    %44 = vector.load %arg5[%c8_29, %c0_30] : memref<672x128xbf16, #tpu.memory_space<vmem>>, vector<24x64xbf16>
    %cst_31 = arith.constant dense<0.000000e+00> : vector<128x64xf32>
    %45 = tpu.matmul %43, %44, %cst_31 {dimension_numbers = #tpu.dot_dimension_numbers<[1], [0], [0], [1], [0, 0, 1, 1], [], []>} : vector<128x24xbf16>, vector<24x64xbf16>, vector<128x64xf32> -> vector<128x64xf32>
    %46 = arith.truncf %45 : vector<128x64xf32> to vector<128x64xbf16>
    %c0_32 = arith.constant 0 : index
    %c0_33 = arith.constant 0 : index
    %47 = vector.load %arg6[%c0_32, %c0_33] : memref<320x384xbf16, #tpu.memory_space<vmem>>, vector<64x256xbf16>
    %cst_34 = arith.constant dense<0x7F800000> : vector<48xf32>
    %48 = vector.multi_reduction <minimumf>, %34, %cst_34 [1] : vector<48x128xf32> to vector<48xf32>
    %49 = vector.shape_cast %48 : vector<48xf32> to vector<48x1xf32>
    %50 = vector.broadcast %49 : vector<48x1xf32> to vector<48x128xf32>
    %51 = arith.cmpf oeq, %34, %50 : vector<48x128xf32>
    %c128_i32 = arith.constant 128 : i32
    %52 = vector.broadcast %c128_i32 : i32 to vector<48x128xi32>
    %53 = arith.select %51, %35, %52 : vector<48x128xi1>, vector<48x128xi32>
    %cst_35 = arith.constant dense<2147483647> : vector<48xi32>
    %54 = vector.multi_reduction <minsi>, %53, %cst_35 [1] : vector<48x128xi32> to vector<48xi32>
    %55 = vector.shape_cast %54 : vector<48xi32> to vector<48x1xi32>
    %56 = vector.broadcast %55 : vector<48x1xi32> to vector<48x128xi32>
    %57 = arith.cmpi eq, %35, %56 : vector<48x128xi32>
    %cst_36 = arith.constant 1.000000e+30 : f32
    %58 = vector.broadcast %cst_36 : f32 to vector<48x128xf32>
    %59 = arith.select %57, %58, %34 : vector<48x128xi1>, vector<48x128xf32>
    %60 = arith.extui %57 : vector<48x128xi1> to vector<48x128xi32>
    %61 = arith.sitofp %60 : vector<48x128xi32> to vector<48x128xf32>
    %62 = arith.truncf %61 : vector<48x128xf32> to vector<48x128xbf16>
    %cst_37 = arith.constant dense<0.000000e+00> : vector<48x64xf32>
    %63 = tpu.matmul %62, %46, %cst_37 {dimension_numbers = #tpu.dot_dimension_numbers<[1], [0], [0], [1], [0, 0, 1, 1], [], []>} : vector<48x128xbf16>, vector<128x64xbf16>, vector<48x64xf32> -> vector<48x64xf32>
    %64 = arith.addf %63, %42 : vector<48x64xf32>
    %cst_38 = arith.constant 0.000000e+00 : f32
    %65 = vector.broadcast %cst_38 : f32 to vector<48x64xf32>
    %66 = arith.maximumf %64, %65 : vector<48x64xf32>
    %67 = arith.truncf %66 : vector<48x64xf32> to vector<48x64xbf16>
    %cst_39 = arith.constant dense<0.000000e+00> : vector<48x256xf32>
    %68 = tpu.matmul %67, %47, %cst_39 {dimension_numbers = #tpu.dot_dimension_numbers<[1], [0], [0], [1], [0, 0, 1, 1], [], []>} : vector<48x64xbf16>, vector<64x256xbf16>, vector<48x256xf32> -> vector<48x256xf32>
    %cst_40 = arith.constant dense<0x7F800000> : vector<48xf32>
    %69 = vector.multi_reduction <minimumf>, %59, %cst_40 [1] : vector<48x128xf32> to vector<48xf32>
    %70 = vector.shape_cast %69 : vector<48xf32> to vector<48x1xf32>
    %71 = vector.broadcast %70 : vector<48x1xf32> to vector<48x128xf32>
    %72 = arith.cmpf oeq, %59, %71 : vector<48x128xf32>
    %c128_i32_41 = arith.constant 128 : i32
    %73 = vector.broadcast %c128_i32_41 : i32 to vector<48x128xi32>
    %74 = arith.select %72, %35, %73 : vector<48x128xi1>, vector<48x128xi32>
    %cst_42 = arith.constant dense<2147483647> : vector<48xi32>
    %75 = vector.multi_reduction <minsi>, %74, %cst_42 [1] : vector<48x128xi32> to vector<48xi32>
    %76 = vector.shape_cast %75 : vector<48xi32> to vector<48x1xi32>
    %77 = vector.broadcast %76 : vector<48x1xi32> to vector<48x128xi32>
    %78 = arith.cmpi eq, %35, %77 : vector<48x128xi32>
    %cst_43 = arith.constant 1.000000e+30 : f32
    %79 = vector.broadcast %cst_43 : f32 to vector<48x128xf32>
    %80 = arith.select %78, %79, %59 : vector<48x128xi1>, vector<48x128xf32>
    %81 = arith.extui %78 : vector<48x128xi1> to vector<48x128xi32>
    %82 = arith.sitofp %81 : vector<48x128xi32> to vector<48x128xf32>
    %83 = arith.truncf %82 : vector<48x128xf32> to vector<48x128xbf16>
    %cst_44 = arith.constant dense<0.000000e+00> : vector<48x64xf32>
    %84 = tpu.matmul %83, %46, %cst_44 {dimension_numbers = #tpu.dot_dimension_numbers<[1], [0], [0], [1], [0, 0, 1, 1], [], []>} : vector<48x128xbf16>, vector<128x64xbf16>, vector<48x64xf32> -> vector<48x64xf32>
    %85 = arith.addf %84, %42 : vector<48x64xf32>
    %cst_45 = arith.constant 0.000000e+00 : f32
    %86 = vector.broadcast %cst_45 : f32 to vector<48x64xf32>
    %87 = arith.maximumf %85, %86 : vector<48x64xf32>
    %88 = arith.truncf %87 : vector<48x64xf32> to vector<48x64xbf16>
    %cst_46 = arith.constant dense<0.000000e+00> : vector<48x256xf32>
    %89 = tpu.matmul %88, %47, %cst_46 {dimension_numbers = #tpu.dot_dimension_numbers<[1], [0], [0], [1], [0, 0, 1, 1], [], []>} : vector<48x64xbf16>, vector<64x256xbf16>, vector<48x256xf32> -> vector<48x256xf32>
    %90 = arith.maximumf %68, %89 : vector<48x256xf32>
    %cst_47 = arith.constant dense<0x7F800000> : vector<48xf32>
    %91 = vector.multi_reduction <minimumf>, %80, %cst_47 [1] : vector<48x128xf32> to vector<48xf32>
    %92 = vector.shape_cast %91 : vector<48xf32> to vector<48x1xf32>
    %93 = vector.broadcast %92 : vector<48x1xf32> to vector<48x128xf32>
    %94 = arith.cmpf oeq, %80, %93 : vector<48x128xf32>
    %c128_i32_48 = arith.constant 128 : i32
    %95 = vector.broadcast %c128_i32_48 : i32 to vector<48x128xi32>
    %96 = arith.select %94, %35, %95 : vector<48x128xi1>, vector<48x128xi32>
    %cst_49 = arith.constant dense<2147483647> : vector<48xi32>
    %97 = vector.multi_reduction <minsi>, %96, %cst_49 [1] : vector<48x128xi32> to vector<48xi32>
    %98 = vector.shape_cast %97 : vector<48xi32> to vector<48x1xi32>
    %99 = vector.broadcast %98 : vector<48x1xi32> to vector<48x128xi32>
    %100 = arith.cmpi eq, %35, %99 : vector<48x128xi32>
    %cst_50 = arith.constant 1.000000e+30 : f32
    %101 = vector.broadcast %cst_50 : f32 to vector<48x128xf32>
    %102 = arith.select %100, %101, %80 : vector<48x128xi1>, vector<48x128xf32>
    %103 = arith.extui %100 : vector<48x128xi1> to vector<48x128xi32>
    %104 = arith.sitofp %103 : vector<48x128xi32> to vector<48x128xf32>
    %105 = arith.truncf %104 : vector<48x128xf32> to vector<48x128xbf16>
    %cst_51 = arith.constant dense<0.000000e+00> : vector<48x64xf32>
    %106 = tpu.matmul %105, %46, %cst_51 {dimension_numbers = #tpu.dot_dimension_numbers<[1], [0], [0], [1], [0, 0, 1, 1], [], []>} : vector<48x128xbf16>, vector<128x64xbf16>, vector<48x64xf32> -> vector<48x64xf32>
    %107 = arith.addf %106, %42 : vector<48x64xf32>
    %cst_52 = arith.constant 0.000000e+00 : f32
    %108 = vector.broadcast %cst_52 : f32 to vector<48x64xf32>
    %109 = arith.maximumf %107, %108 : vector<48x64xf32>
    %110 = arith.truncf %109 : vector<48x64xf32> to vector<48x64xbf16>
    %cst_53 = arith.constant dense<0.000000e+00> : vector<48x256xf32>
    %111 = tpu.matmul %110, %47, %cst_53 {dimension_numbers = #tpu.dot_dimension_numbers<[1], [0], [0], [1], [0, 0, 1, 1], [], []>} : vector<48x64xbf16>, vector<64x256xbf16>, vector<48x256xf32> -> vector<48x256xf32>
    %112 = arith.maximumf %90, %111 : vector<48x256xf32>
    %cst_54 = arith.constant dense<0x7F800000> : vector<48xf32>
    %113 = vector.multi_reduction <minimumf>, %102, %cst_54 [1] : vector<48x128xf32> to vector<48xf32>
    %114 = vector.shape_cast %113 : vector<48xf32> to vector<48x1xf32>
    %115 = vector.broadcast %114 : vector<48x1xf32> to vector<48x128xf32>
    %116 = arith.cmpf oeq, %102, %115 : vector<48x128xf32>
    %c128_i32_55 = arith.constant 128 : i32
    %117 = vector.broadcast %c128_i32_55 : i32 to vector<48x128xi32>
    %118 = arith.select %116, %35, %117 : vector<48x128xi1>, vector<48x128xi32>
    %cst_56 = arith.constant dense<2147483647> : vector<48xi32>
    %119 = vector.multi_reduction <minsi>, %118, %cst_56 [1] : vector<48x128xi32> to vector<48xi32>
    %120 = vector.shape_cast %119 : vector<48xi32> to vector<48x1xi32>
    %121 = vector.broadcast %120 : vector<48x1xi32> to vector<48x128xi32>
    %122 = arith.cmpi eq, %35, %121 : vector<48x128xi32>
    %cst_57 = arith.constant 1.000000e+30 : f32
    %123 = vector.broadcast %cst_57 : f32 to vector<48x128xf32>
    %124 = arith.select %122, %123, %102 : vector<48x128xi1>, vector<48x128xf32>
    %125 = arith.extui %122 : vector<48x128xi1> to vector<48x128xi32>
    %126 = arith.sitofp %125 : vector<48x128xi32> to vector<48x128xf32>
    %127 = arith.truncf %126 : vector<48x128xf32> to vector<48x128xbf16>
    %cst_58 = arith.constant dense<0.000000e+00> : vector<48x64xf32>
    %128 = tpu.matmul %127, %46, %cst_58 {dimension_numbers = #tpu.dot_dimension_numbers<[1], [0], [0], [1], [0, 0, 1, 1], [], []>} : vector<48x128xbf16>, vector<128x64xbf16>, vector<48x64xf32> -> vector<48x64xf32>
    %129 = arith.addf %128, %42 : vector<48x64xf32>
    %cst_59 = arith.constant 0.000000e+00 : f32
    %130 = vector.broadcast %cst_59 : f32 to vector<48x64xf32>
    %131 = arith.maximumf %129, %130 : vector<48x64xf32>
    %132 = arith.truncf %131 : vector<48x64xf32> to vector<48x64xbf16>
    %cst_60 = arith.constant dense<0.000000e+00> : vector<48x256xf32>
    %133 = tpu.matmul %132, %47, %cst_60 {dimension_numbers = #tpu.dot_dimension_numbers<[1], [0], [0], [1], [0, 0, 1, 1], [], []>} : vector<48x64xbf16>, vector<64x256xbf16>, vector<48x256xf32> -> vector<48x256xf32>
    %134 = arith.maximumf %112, %133 : vector<48x256xf32>
    %cst_61 = arith.constant dense<0x7F800000> : vector<48xf32>
    %135 = vector.multi_reduction <minimumf>, %124, %cst_61 [1] : vector<48x128xf32> to vector<48xf32>
    %136 = vector.shape_cast %135 : vector<48xf32> to vector<48x1xf32>
    %137 = vector.broadcast %136 : vector<48x1xf32> to vector<48x128xf32>
    %138 = arith.cmpf oeq, %124, %137 : vector<48x128xf32>
    %c128_i32_62 = arith.constant 128 : i32
    %139 = vector.broadcast %c128_i32_62 : i32 to vector<48x128xi32>
    %140 = arith.select %138, %35, %139 : vector<48x128xi1>, vector<48x128xi32>
    %cst_63 = arith.constant dense<2147483647> : vector<48xi32>
    %141 = vector.multi_reduction <minsi>, %140, %cst_63 [1] : vector<48x128xi32> to vector<48xi32>
    %142 = vector.shape_cast %141 : vector<48xi32> to vector<48x1xi32>
    %143 = vector.broadcast %142 : vector<48x1xi32> to vector<48x128xi32>
    %144 = arith.cmpi eq, %35, %143 : vector<48x128xi32>
    %cst_64 = arith.constant 1.000000e+30 : f32
    %145 = vector.broadcast %cst_64 : f32 to vector<48x128xf32>
    %146 = arith.select %144, %145, %124 : vector<48x128xi1>, vector<48x128xf32>
    %147 = arith.extui %144 : vector<48x128xi1> to vector<48x128xi32>
    %148 = arith.sitofp %147 : vector<48x128xi32> to vector<48x128xf32>
    %149 = arith.truncf %148 : vector<48x128xf32> to vector<48x128xbf16>
    %cst_65 = arith.constant dense<0.000000e+00> : vector<48x64xf32>
    %150 = tpu.matmul %149, %46, %cst_65 {dimension_numbers = #tpu.dot_dimension_numbers<[1], [0], [0], [1], [0, 0, 1, 1], [], []>} : vector<48x128xbf16>, vector<128x64xbf16>, vector<48x64xf32> -> vector<48x64xf32>
    %151 = arith.addf %150, %42 : vector<48x64xf32>
    %cst_66 = arith.constant 0.000000e+00 : f32
    %152 = vector.broadcast %cst_66 : f32 to vector<48x64xf32>
    %153 = arith.maximumf %151, %152 : vector<48x64xf32>
    %154 = arith.truncf %153 : vector<48x64xf32> to vector<48x64xbf16>
    %cst_67 = arith.constant dense<0.000000e+00> : vector<48x256xf32>
    %155 = tpu.matmul %154, %47, %cst_67 {dimension_numbers = #tpu.dot_dimension_numbers<[1], [0], [0], [1], [0, 0, 1, 1], [], []>} : vector<48x64xbf16>, vector<64x256xbf16>, vector<48x256xf32> -> vector<48x256xf32>
    %156 = arith.maximumf %134, %155 : vector<48x256xf32>
    %cst_68 = arith.constant dense<0x7F800000> : vector<48xf32>
    %157 = vector.multi_reduction <minimumf>, %146, %cst_68 [1] : vector<48x128xf32> to vector<48xf32>
    %158 = vector.shape_cast %157 : vector<48xf32> to vector<48x1xf32>
    %159 = vector.broadcast %158 : vector<48x1xf32> to vector<48x128xf32>
    %160 = arith.cmpf oeq, %146, %159 : vector<48x128xf32>
    %c128_i32_69 = arith.constant 128 : i32
    %161 = vector.broadcast %c128_i32_69 : i32 to vector<48x128xi32>
    %162 = arith.select %160, %35, %161 : vector<48x128xi1>, vector<48x128xi32>
    %cst_70 = arith.constant dense<2147483647> : vector<48xi32>
    %163 = vector.multi_reduction <minsi>, %162, %cst_70 [1] : vector<48x128xi32> to vector<48xi32>
    %164 = vector.shape_cast %163 : vector<48xi32> to vector<48x1xi32>
    %165 = vector.broadcast %164 : vector<48x1xi32> to vector<48x128xi32>
    %166 = arith.cmpi eq, %35, %165 : vector<48x128xi32>
    %cst_71 = arith.constant 1.000000e+30 : f32
    %167 = vector.broadcast %cst_71 : f32 to vector<48x128xf32>
    %168 = arith.select %166, %167, %146 : vector<48x128xi1>, vector<48x128xf32>
    %169 = arith.extui %166 : vector<48x128xi1> to vector<48x128xi32>
    %170 = arith.sitofp %169 : vector<48x128xi32> to vector<48x128xf32>
    %171 = arith.truncf %170 : vector<48x128xf32> to vector<48x128xbf16>
    %cst_72 = arith.constant dense<0.000000e+00> : vector<48x64xf32>
    %172 = tpu.matmul %171, %46, %cst_72 {dimension_numbers = #tpu.dot_dimension_numbers<[1], [0], [0], [1], [0, 0, 1, 1], [], []>} : vector<48x128xbf16>, vector<128x64xbf16>, vector<48x64xf32> -> vector<48x64xf32>
    %173 = arith.addf %172, %42 : vector<48x64xf32>
    %cst_73 = arith.constant 0.000000e+00 : f32
    %174 = vector.broadcast %cst_73 : f32 to vector<48x64xf32>
    %175 = arith.maximumf %173, %174 : vector<48x64xf32>
    %176 = arith.truncf %175 : vector<48x64xf32> to vector<48x64xbf16>
    %cst_74 = arith.constant dense<0.000000e+00> : vector<48x256xf32>
    %177 = tpu.matmul %176, %47, %cst_74 {dimension_numbers = #tpu.dot_dimension_numbers<[1], [0], [0], [1], [0, 0, 1, 1], [], []>} : vector<48x64xbf16>, vector<64x256xbf16>, vector<48x256xf32> -> vector<48x256xf32>
    %178 = arith.maximumf %156, %177 : vector<48x256xf32>
    %cst_75 = arith.constant dense<0x7F800000> : vector<48xf32>
    %179 = vector.multi_reduction <minimumf>, %168, %cst_75 [1] : vector<48x128xf32> to vector<48xf32>
    %180 = vector.shape_cast %179 : vector<48xf32> to vector<48x1xf32>
    %181 = vector.broadcast %180 : vector<48x1xf32> to vector<48x128xf32>
    %182 = arith.cmpf oeq, %168, %181 : vector<48x128xf32>
    %c128_i32_76 = arith.constant 128 : i32
    %183 = vector.broadcast %c128_i32_76 : i32 to vector<48x128xi32>
    %184 = arith.select %182, %35, %183 : vector<48x128xi1>, vector<48x128xi32>
    %cst_77 = arith.constant dense<2147483647> : vector<48xi32>
    %185 = vector.multi_reduction <minsi>, %184, %cst_77 [1] : vector<48x128xi32> to vector<48xi32>
    %186 = vector.shape_cast %185 : vector<48xi32> to vector<48x1xi32>
    %187 = vector.broadcast %186 : vector<48x1xi32> to vector<48x128xi32>
    %188 = arith.cmpi eq, %35, %187 : vector<48x128xi32>
    %cst_78 = arith.constant 1.000000e+30 : f32
    %189 = vector.broadcast %cst_78 : f32 to vector<48x128xf32>
    %190 = arith.select %188, %189, %168 : vector<48x128xi1>, vector<48x128xf32>
    %191 = arith.extui %188 : vector<48x128xi1> to vector<48x128xi32>
    %192 = arith.sitofp %191 : vector<48x128xi32> to vector<48x128xf32>
    %193 = arith.truncf %192 : vector<48x128xf32> to vector<48x128xbf16>
    %cst_79 = arith.constant dense<0.000000e+00> : vector<48x64xf32>
    %194 = tpu.matmul %193, %46, %cst_79 {dimension_numbers = #tpu.dot_dimension_numbers<[1], [0], [0], [1], [0, 0, 1, 1], [], []>} : vector<48x128xbf16>, vector<128x64xbf16>, vector<48x64xf32> -> vector<48x64xf32>
    %195 = arith.addf %194, %42 : vector<48x64xf32>
    %cst_80 = arith.constant 0.000000e+00 : f32
    %196 = vector.broadcast %cst_80 : f32 to vector<48x64xf32>
    %197 = arith.maximumf %195, %196 : vector<48x64xf32>
    %198 = arith.truncf %197 : vector<48x64xf32> to vector<48x64xbf16>
    %cst_81 = arith.constant dense<0.000000e+00> : vector<48x256xf32>
    %199 = tpu.matmul %198, %47, %cst_81 {dimension_numbers = #tpu.dot_dimension_numbers<[1], [0], [0], [1], [0, 0, 1, 1], [], []>} : vector<48x64xbf16>, vector<64x256xbf16>, vector<48x256xf32> -> vector<48x256xf32>
    %200 = arith.maximumf %178, %199 : vector<48x256xf32>
    %cst_82 = arith.constant dense<0x7F800000> : vector<48xf32>
    %201 = vector.multi_reduction <minimumf>, %190, %cst_82 [1] : vector<48x128xf32> to vector<48xf32>
    %202 = vector.shape_cast %201 : vector<48xf32> to vector<48x1xf32>
    %203 = vector.broadcast %202 : vector<48x1xf32> to vector<48x128xf32>
    %204 = arith.cmpf oeq, %190, %203 : vector<48x128xf32>
    %c128_i32_83 = arith.constant 128 : i32
    %205 = vector.broadcast %c128_i32_83 : i32 to vector<48x128xi32>
    %206 = arith.select %204, %35, %205 : vector<48x128xi1>, vector<48x128xi32>
    %cst_84 = arith.constant dense<2147483647> : vector<48xi32>
    %207 = vector.multi_reduction <minsi>, %206, %cst_84 [1] : vector<48x128xi32> to vector<48xi32>
    %208 = vector.shape_cast %207 : vector<48xi32> to vector<48x1xi32>
    %209 = vector.broadcast %208 : vector<48x1xi32> to vector<48x128xi32>
    %210 = arith.cmpi eq, %35, %209 : vector<48x128xi32>
    %211 = arith.extui %210 : vector<48x128xi1> to vector<48x128xi32>
    %212 = arith.sitofp %211 : vector<48x128xi32> to vector<48x128xf32>
    %213 = arith.truncf %212 : vector<48x128xf32> to vector<48x128xbf16>
    %cst_85 = arith.constant dense<0.000000e+00> : vector<48x64xf32>
    %214 = tpu.matmul %213, %46, %cst_85 {dimension_numbers = #tpu.dot_dimension_numbers<[1], [0], [0], [1], [0, 0, 1, 1], [], []>} : vector<48x128xbf16>, vector<128x64xbf16>, vector<48x64xf32> -> vector<48x64xf32>
    %215 = arith.addf %214, %42 : vector<48x64xf32>
    %cst_86 = arith.constant 0.000000e+00 : f32
    %216 = vector.broadcast %cst_86 : f32 to vector<48x64xf32>
    %217 = arith.maximumf %215, %216 : vector<48x64xf32>
    %218 = arith.truncf %217 : vector<48x64xf32> to vector<48x64xbf16>
    %cst_87 = arith.constant dense<0.000000e+00> : vector<48x256xf32>
    %219 = tpu.matmul %218, %47, %cst_87 {dimension_numbers = #tpu.dot_dimension_numbers<[1], [0], [0], [1], [0, 0, 1, 1], [], []>} : vector<48x64xbf16>, vector<64x256xbf16>, vector<48x256xf32> -> vector<48x256xf32>
    %220 = arith.maximumf %200, %219 : vector<48x256xf32>
    %221 = vector.broadcast %1 : vector<1x256xf32> to vector<48x256xf32>
    %222 = arith.addf %220, %221 : vector<48x256xf32>
    %223 = arith.truncf %222 : vector<48x256xf32> to vector<48x256xbf16>
    %c32 = arith.constant 32 : index
    %c0_88 = arith.constant 0 : index
    %224 = vector.load %arg5[%c32, %c0_88] : memref<672x128xbf16, #tpu.memory_space<vmem>>, vector<256x128xbf16>
    %cst_89 = arith.constant dense<0.000000e+00> : vector<48x128xf32>
    %225 = tpu.matmul %223, %224, %cst_89 {dimension_numbers = #tpu.dot_dimension_numbers<[1], [0], [0], [1], [0, 0, 1, 1], [], []>} : vector<48x256xbf16>, vector<256x128xbf16>, vector<48x128xf32> -> vector<48x128xf32>
    %226 = vector.broadcast %2 : vector<1x128xf32> to vector<48x128xf32>
    %227 = arith.addf %225, %226 : vector<48x128xf32>
    %228 = arith.truncf %227 : vector<48x128xf32> to vector<48x128xbf16>
    %c192 = arith.constant 192 : index
    %c0_90 = arith.constant 0 : index
    %229 = vector.load %arg6[%c192, %c0_90] : memref<320x384xbf16, #tpu.memory_space<vmem>>, vector<128x384xbf16>
    %cst_91 = arith.constant dense<0.000000e+00> : vector<48x384xf32>
    %230 = tpu.matmul %228, %229, %cst_91 {dimension_numbers = #tpu.dot_dimension_numbers<[1], [0], [0], [1], [0, 0, 1, 1], [], []>} : vector<48x128xbf16>, vector<128x384xbf16>, vector<48x384xf32> -> vector<48x384xf32>
    %231 = vector.broadcast %3 : vector<1x384xf32> to vector<48x384xf32>
    %232 = arith.addf %230, %231 : vector<48x384xf32>
    %233 = tpu.iota {dimensions = array<i32: 1>} : vector<48x48xi32>
    %c38_i32 = arith.constant 38 : i32
    %234 = vector.broadcast %c38_i32 : i32 to vector<48x48xi32>
    %235 = arith.cmpi slt, %233, %234 : vector<48x48xi32>
    %cst_92 = arith.constant 0.000000e+00 : f32
    %cst_93 = arith.constant -1.000000e+30 : f32
    %236 = vector.broadcast %cst_92 : f32 to vector<48x48xf32>
    %237 = vector.broadcast %cst_93 : f32 to vector<48x48xf32>
    %238 = arith.select %235, %236, %237 : vector<48x48xi1>, vector<48x48xf32>
    %239 = vector.extract_strided_slice %232 {offsets = [0, 0], sizes = [48, 32], strides = [1, 1]} : vector<48x384xf32> to vector<48x32xf32>
    %cst_94 = arith.constant 0.176776692 : f32
    %240 = vector.broadcast %cst_94 : f32 to vector<48x32xf32>
    %241 = arith.mulf %239, %240 : vector<48x32xf32>
    %242 = arith.truncf %241 : vector<48x32xf32> to vector<48x32xbf16>
    %243 = vector.extract_strided_slice %232 {offsets = [0, 128], sizes = [48, 32], strides = [1, 1]} : vector<48x384xf32> to vector<48x32xf32>
    %244 = arith.truncf %243 : vector<48x32xf32> to vector<48x32xbf16>
    %245 = vector.extract_strided_slice %232 {offsets = [0, 256], sizes = [48, 32], strides = [1, 1]} : vector<48x384xf32> to vector<48x32xf32>
    %246 = arith.truncf %245 : vector<48x32xf32> to vector<48x32xbf16>
    %cst_95 = arith.constant dense<0.000000e+00> : vector<48x48xf32>
    %247 = tpu.matmul %242, %244, %cst_95 {dimension_numbers = #tpu.dot_dimension_numbers<[1], [1], [0], [0], [0, 0, 1, 0], [], []>} : vector<48x32xbf16>, vector<48x32xbf16>, vector<48x48xf32> -> vector<48x48xf32>
    %248 = arith.addf %247, %238 : vector<48x48xf32>
    %cst_96 = arith.constant dense<0xFF800000> : vector<48xf32>
    %249 = vector.multi_reduction <maximumf>, %248, %cst_96 [1] : vector<48x48xf32> to vector<48xf32>
    %250 = vector.shape_cast %249 : vector<48xf32> to vector<48x1xf32>
    %251 = vector.broadcast %250 : vector<48x1xf32> to vector<48x48xf32>
    %252 = arith.subf %248, %251 : vector<48x48xf32>
    %253 = math.exp %252 : vector<48x48xf32>
    %cst_97 = arith.constant dense<0.000000e+00> : vector<48xf32>
    %254 = vector.multi_reduction <add>, %253, %cst_97 [1] : vector<48x48xf32> to vector<48xf32>
    %255 = vector.shape_cast %254 : vector<48xf32> to vector<48x1xf32>
    %256 = tpu.reciprocal %255 {approx = true} : vector<48x1xf32> -> vector<48x1xf32>
    %257 = vector.broadcast %256 : vector<48x1xf32> to vector<48x48xf32>
    %258 = arith.mulf %253, %257 : vector<48x48xf32>
    %259 = arith.truncf %258 : vector<48x48xf32> to vector<48x48xbf16>
    %cst_98 = arith.constant dense<0.000000e+00> : vector<48x32xf32>
    %260 = tpu.matmul %259, %246, %cst_98 {dimension_numbers = #tpu.dot_dimension_numbers<[1], [0], [0], [1], [0, 0, 1, 1], [], []>} : vector<48x48xbf16>, vector<48x32xbf16>, vector<48x32xf32> -> vector<48x32xf32>
    %c0_99 = arith.constant 0 : index
    %c0_100 = arith.constant 0 : index
    %261 = vector.load %arg9[%c0_99, %c0_100] : memref<48x128xf32, #tpu.memory_space<vmem>>, vector<48x32xf32>
    tpu.vector_store %arg9[%c0_99, %c0_100], %260 {strides = array<i32>} : memref<48x128xf32, #tpu.memory_space<vmem>>, vector<48x32xf32>,
    %262 = vector.extract_strided_slice %232 {offsets = [0, 32], sizes = [48, 32], strides = [1, 1]} : vector<48x384xf32> to vector<48x32xf32>
    %cst_101 = arith.constant 0.176776692 : f32
    %263 = vector.broadcast %cst_101 : f32 to vector<48x32xf32>
    %264 = arith.mulf %262, %263 : vector<48x32xf32>
    %265 = arith.truncf %264 : vector<48x32xf32> to vector<48x32xbf16>
    %266 = vector.extract_strided_slice %232 {offsets = [0, 160], sizes = [48, 32], strides = [1, 1]} : vector<48x384xf32> to vector<48x32xf32>
    %267 = arith.truncf %266 : vector<48x32xf32> to vector<48x32xbf16>
    %268 = vector.extract_strided_slice %232 {offsets = [0, 288], sizes = [48, 32], strides = [1, 1]} : vector<48x384xf32> to vector<48x32xf32>
    %269 = arith.truncf %268 : vector<48x32xf32> to vector<48x32xbf16>
    %cst_102 = arith.constant dense<0.000000e+00> : vector<48x48xf32>
    %270 = tpu.matmul %265, %267, %cst_102 {dimension_numbers = #tpu.dot_dimension_numbers<[1], [1], [0], [0], [0, 0, 1, 0], [], []>} : vector<48x32xbf16>, vector<48x32xbf16>, vector<48x48xf32> -> vector<48x48xf32>
    %271 = arith.addf %270, %238 : vector<48x48xf32>
    %cst_103 = arith.constant dense<0xFF800000> : vector<48xf32>
    %272 = vector.multi_reduction <maximumf>, %271, %cst_103 [1] : vector<48x48xf32> to vector<48xf32>
    %273 = vector.shape_cast %272 : vector<48xf32> to vector<48x1xf32>
    %274 = vector.broadcast %273 : vector<48x1xf32> to vector<48x48xf32>
    %275 = arith.subf %271, %274 : vector<48x48xf32>
    %276 = math.exp %275 : vector<48x48xf32>
    %cst_104 = arith.constant dense<0.000000e+00> : vector<48xf32>
    %277 = vector.multi_reduction <add>, %276, %cst_104 [1] : vector<48x48xf32> to vector<48xf32>
    %278 = vector.shape_cast %277 : vector<48xf32> to vector<48x1xf32>
    %279 = tpu.reciprocal %278 {approx = true} : vector<48x1xf32> -> vector<48x1xf32>
    %280 = vector.broadcast %279 : vector<48x1xf32> to vector<48x48xf32>
    %281 = arith.mulf %276, %280 : vector<48x48xf32>
    %282 = arith.truncf %281 : vector<48x48xf32> to vector<48x48xbf16>
    %cst_105 = arith.constant dense<0.000000e+00> : vector<48x32xf32>
    %283 = tpu.matmul %282, %269, %cst_105 {dimension_numbers = #tpu.dot_dimension_numbers<[1], [0], [0], [1], [0, 0, 1, 1], [], []>} : vector<48x48xbf16>, vector<48x32xbf16>, vector<48x32xf32> -> vector<48x32xf32>
    %c0_106 = arith.constant 0 : index
    %c32_107 = arith.constant 32 : index
    %284 = vector.load %arg9[%c0_106, %c32_107] : memref<48x128xf32, #tpu.memory_space<vmem>>, vector<48x32xf32>
    tpu.vector_store %arg9[%c0_106, %c32_107], %283 {strides = array<i32>} : memref<48x128xf32, #tpu.memory_space<vmem>>, vector<48x32xf32>,
    %285 = vector.extract_strided_slice %232 {offsets = [0, 64], sizes = [48, 32], strides = [1, 1]} : vector<48x384xf32> to vector<48x32xf32>
    %cst_108 = arith.constant 0.176776692 : f32
    %286 = vector.broadcast %cst_108 : f32 to vector<48x32xf32>
    %287 = arith.mulf %285, %286 : vector<48x32xf32>
    %288 = arith.truncf %287 : vector<48x32xf32> to vector<48x32xbf16>
    %289 = vector.extract_strided_slice %232 {offsets = [0, 192], sizes = [48, 32], strides = [1, 1]} : vector<48x384xf32> to vector<48x32xf32>
    %290 = arith.truncf %289 : vector<48x32xf32> to vector<48x32xbf16>
    %291 = vector.extract_strided_slice %232 {offsets = [0, 320], sizes = [48, 32], strides = [1, 1]} : vector<48x384xf32> to vector<48x32xf32>
    %292 = arith.truncf %291 : vector<48x32xf32> to vector<48x32xbf16>
    %cst_109 = arith.constant dense<0.000000e+00> : vector<48x48xf32>
    %293 = tpu.matmul %288, %290, %cst_109 {dimension_numbers = #tpu.dot_dimension_numbers<[1], [1], [0], [0], [0, 0, 1, 0], [], []>} : vector<48x32xbf16>, vector<48x32xbf16>, vector<48x48xf32> -> vector<48x48xf32>
    %294 = arith.addf %293, %238 : vector<48x48xf32>
    %cst_110 = arith.constant dense<0xFF800000> : vector<48xf32>
    %295 = vector.multi_reduction <maximumf>, %294, %cst_110 [1] : vector<48x48xf32> to vector<48xf32>
    %296 = vector.shape_cast %295 : vector<48xf32> to vector<48x1xf32>
    %297 = vector.broadcast %296 : vector<48x1xf32> to vector<48x48xf32>
    %298 = arith.subf %294, %297 : vector<48x48xf32>
    %299 = math.exp %298 : vector<48x48xf32>
    %cst_111 = arith.constant dense<0.000000e+00> : vector<48xf32>
    %300 = vector.multi_reduction <add>, %299, %cst_111 [1] : vector<48x48xf32> to vector<48xf32>
    %301 = vector.shape_cast %300 : vector<48xf32> to vector<48x1xf32>
    %302 = tpu.reciprocal %301 {approx = true} : vector<48x1xf32> -> vector<48x1xf32>
    %303 = vector.broadcast %302 : vector<48x1xf32> to vector<48x48xf32>
    %304 = arith.mulf %299, %303 : vector<48x48xf32>
    %305 = arith.truncf %304 : vector<48x48xf32> to vector<48x48xbf16>
    %cst_112 = arith.constant dense<0.000000e+00> : vector<48x32xf32>
    %306 = tpu.matmul %305, %292, %cst_112 {dimension_numbers = #tpu.dot_dimension_numbers<[1], [0], [0], [1], [0, 0, 1, 1], [], []>} : vector<48x48xbf16>, vector<48x32xbf16>, vector<48x32xf32> -> vector<48x32xf32>
    %c0_113 = arith.constant 0 : index
    %c64 = arith.constant 64 : index
    %307 = vector.load %arg9[%c0_113, %c64] : memref<48x128xf32, #tpu.memory_space<vmem>>, vector<48x32xf32>
    tpu.vector_store %arg9[%c0_113, %c64], %306 {strides = array<i32>} : memref<48x128xf32, #tpu.memory_space<vmem>>, vector<48x32xf32>,
    %308 = vector.extract_strided_slice %232 {offsets = [0, 96], sizes = [48, 32], strides = [1, 1]} : vector<48x384xf32> to vector<48x32xf32>
    %cst_114 = arith.constant 0.176776692 : f32
    %309 = vector.broadcast %cst_114 : f32 to vector<48x32xf32>
    %310 = arith.mulf %308, %309 : vector<48x32xf32>
    %311 = arith.truncf %310 : vector<48x32xf32> to vector<48x32xbf16>
    %312 = vector.extract_strided_slice %232 {offsets = [0, 224], sizes = [48, 32], strides = [1, 1]} : vector<48x384xf32> to vector<48x32xf32>
    %313 = arith.truncf %312 : vector<48x32xf32> to vector<48x32xbf16>
    %314 = vector.extract_strided_slice %232 {offsets = [0, 352], sizes = [48, 32], strides = [1, 1]} : vector<48x384xf32> to vector<48x32xf32>
    %315 = arith.truncf %314 : vector<48x32xf32> to vector<48x32xbf16>
    %cst_115 = arith.constant dense<0.000000e+00> : vector<48x48xf32>
    %316 = tpu.matmul %311, %313, %cst_115 {dimension_numbers = #tpu.dot_dimension_numbers<[1], [1], [0], [0], [0, 0, 1, 0], [], []>} : vector<48x32xbf16>, vector<48x32xbf16>, vector<48x48xf32> -> vector<48x48xf32>
    %317 = arith.addf %316, %238 : vector<48x48xf32>
    %cst_116 = arith.constant dense<0xFF800000> : vector<48xf32>
    %318 = vector.multi_reduction <maximumf>, %317, %cst_116 [1] : vector<48x48xf32> to vector<48xf32>
    %319 = vector.shape_cast %318 : vector<48xf32> to vector<48x1xf32>
    %320 = vector.broadcast %319 : vector<48x1xf32> to vector<48x48xf32>
    %321 = arith.subf %317, %320 : vector<48x48xf32>
    %322 = math.exp %321 : vector<48x48xf32>
    %cst_117 = arith.constant dense<0.000000e+00> : vector<48xf32>
    %323 = vector.multi_reduction <add>, %322, %cst_117 [1] : vector<48x48xf32> to vector<48xf32>
    %324 = vector.shape_cast %323 : vector<48xf32> to vector<48x1xf32>
    %325 = tpu.reciprocal %324 {approx = true} : vector<48x1xf32> -> vector<48x1xf32>
    %326 = vector.broadcast %325 : vector<48x1xf32> to vector<48x48xf32>
    %327 = arith.mulf %322, %326 : vector<48x48xf32>
    %328 = arith.truncf %327 : vector<48x48xf32> to vector<48x48xbf16>
    %cst_118 = arith.constant dense<0.000000e+00> : vector<48x32xf32>
    %329 = tpu.matmul %328, %315, %cst_118 {dimension_numbers = #tpu.dot_dimension_numbers<[1], [0], [0], [1], [0, 0, 1, 1], [], []>} : vector<48x48xbf16>, vector<48x32xbf16>, vector<48x32xf32> -> vector<48x32xf32>
    %c0_119 = arith.constant 0 : index
    %c96 = arith.constant 96 : index
    %330 = vector.load %arg9[%c0_119, %c96] : memref<48x128xf32, #tpu.memory_space<vmem>>, vector<48x32xf32>
    tpu.vector_store %arg9[%c0_119, %c96], %329 {strides = array<i32>} : memref<48x128xf32, #tpu.memory_space<vmem>>, vector<48x32xf32>,
    %c0_120 = arith.constant 0 : index
    %c0_121 = arith.constant 0 : index
    %331 = vector.load %arg9[%c0_120, %c0_121] : memref<48x128xf32, #tpu.memory_space<vmem>>, vector<48x128xf32>
    %332 = arith.truncf %331 : vector<48x128xf32> to vector<48x128xbf16>
    %c288 = arith.constant 288 : index
    %c0_122 = arith.constant 0 : index
    %333 = vector.load %arg5[%c288, %c0_122] : memref<672x128xbf16, #tpu.memory_space<vmem>>, vector<128x128xbf16>
    %cst_123 = arith.constant dense<0.000000e+00> : vector<48x128xf32>
    %334 = tpu.matmul %332, %333, %cst_123 {dimension_numbers = #tpu.dot_dimension_numbers<[1], [0], [0], [1], [0, 0, 1, 1], [], []>} : vector<48x128xbf16>, vector<128x128xbf16>, vector<48x128xf32> -> vector<48x128xf32>
    %335 = vector.broadcast %4 : vector<1x128xf32> to vector<48x128xf32>
    %336 = arith.addf %334, %335 : vector<48x128xf32>
    %337 = arith.addf %227, %336 : vector<48x128xf32>
    %cst_124 = arith.constant dense<0.000000e+00> : vector<48xf32>
    %338 = vector.multi_reduction <add>, %337, %cst_124 [1] : vector<48x128xf32> to vector<48xf32>
    %339 = vector.shape_cast %338 : vector<48xf32> to vector<48x1xf32>
    %cst_125 = arith.constant 1.280000e+02 : f32
    %340 = vector.broadcast %cst_125 : f32 to vector<48x1xf32>
    %341 = arith.divf %339, %340 : vector<48x1xf32>
    %342 = vector.broadcast %341 : vector<48x1xf32> to vector<48x128xf32>
    %343 = arith.subf %337, %342 : vector<48x128xf32>
    %344 = arith.mulf %343, %343 : vector<48x128xf32>
    %cst_126 = arith.constant dense<0.000000e+00> : vector<48xf32>
    %345 = vector.multi_reduction <add>, %344, %cst_126 [1] : vector<48x128xf32> to vector<48xf32>
    %346 = vector.shape_cast %345 : vector<48xf32> to vector<48x1xf32>
    %cst_127 = arith.constant 1.280000e+02 : f32
    %347 = vector.broadcast %cst_127 : f32 to vector<48x1xf32>
    %348 = arith.divf %346, %347 : vector<48x1xf32>
    %cst_128 = arith.constant 9.99999974E-6 : f32
    %349 = vector.broadcast %cst_128 : f32 to vector<48x1xf32>
    %350 = arith.addf %348, %349 : vector<48x1xf32>
    %351 = math.rsqrt %350 : vector<48x1xf32>
    %352 = vector.broadcast %351 : vector<48x1xf32> to vector<48x128xf32>
    %353 = arith.mulf %343, %352 : vector<48x128xf32>
    %354 = vector.broadcast %5 : vector<1x128xf32> to vector<48x128xf32>
    %355 = arith.mulf %353, %354 : vector<48x128xf32>
    %356 = vector.broadcast %6 : vector<1x128xf32> to vector<48x128xf32>
    %357 = arith.addf %355, %356 : vector<48x128xf32>
    %358 = arith.truncf %357 : vector<48x128xf32> to vector<48x128xbf16>
    %c64_129 = arith.constant 64 : index
    %c0_130 = arith.constant 0 : index
    %359 = vector.load %arg6[%c64_129, %c0_130] : memref<320x384xbf16, #tpu.memory_space<vmem>>, vector<128x256xbf16>
    %cst_131 = arith.constant dense<0.000000e+00> : vector<48x256xf32>
    %360 = tpu.matmul %358, %359, %cst_131 {dimension_numbers = #tpu.dot_dimension_numbers<[1], [0], [0], [1], [0, 0, 1, 1], [], []>} : vector<48x128xbf16>, vector<128x256xbf16>, vector<48x256xf32> -> vector<48x256xf32>
    %361 = vector.broadcast %7 : vector<1x256xf32> to vector<48x256xf32>
    %362 = arith.addf %360, %361 : vector<48x256xf32>
    %cst_132 = arith.constant 0.000000e+00 : f32
    %363 = vector.broadcast %cst_132 : f32 to vector<48x256xf32>
    %364 = arith.maximumf %362, %363 : vector<48x256xf32>
    %365 = arith.truncf %364 : vector<48x256xf32> to vector<48x256xbf16>
    %c416 = arith.constant 416 : index
    %c0_133 = arith.constant 0 : index
    %366 = vector.load %arg5[%c416, %c0_133] : memref<672x128xbf16, #tpu.memory_space<vmem>>, vector<256x128xbf16>
    %cst_134 = arith.constant dense<0.000000e+00> : vector<48x128xf32>
    %367 = tpu.matmul %365, %366, %cst_134 {dimension_numbers = #tpu.dot_dimension_numbers<[1], [0], [0], [1], [0, 0, 1, 1], [], []>} : vector<48x256xbf16>, vector<256x128xbf16>, vector<48x128xf32> -> vector<48x128xf32>
    %368 = vector.broadcast %8 : vector<1x128xf32> to vector<48x128xf32>
    %369 = arith.addf %367, %368 : vector<48x128xf32>
    %370 = arith.addf %357, %369 : vector<48x128xf32>
    %cst_135 = arith.constant dense<0.000000e+00> : vector<48xf32>
    %371 = vector.multi_reduction <add>, %370, %cst_135 [1] : vector<48x128xf32> to vector<48xf32>
    %372 = vector.shape_cast %371 : vector<48xf32> to vector<48x1xf32>
    %cst_136 = arith.constant 1.280000e+02 : f32
    %373 = vector.broadcast %cst_136 : f32 to vector<48x1xf32>
    %374 = arith.divf %372, %373 : vector<48x1xf32>
    %375 = vector.broadcast %374 : vector<48x1xf32> to vector<48x128xf32>
    %376 = arith.subf %370, %375 : vector<48x128xf32>
    %377 = arith.mulf %376, %376 : vector<48x128xf32>
    %cst_137 = arith.constant dense<0.000000e+00> : vector<48xf32>
    %378 = vector.multi_reduction <add>, %377, %cst_137 [1] : vector<48x128xf32> to vector<48xf32>
    %379 = vector.shape_cast %378 : vector<48xf32> to vector<48x1xf32>
    %cst_138 = arith.constant 1.280000e+02 : f32
    %380 = vector.broadcast %cst_138 : f32 to vector<48x1xf32>
    %381 = arith.divf %379, %380 : vector<48x1xf32>
    %cst_139 = arith.constant 9.99999974E-6 : f32
    %382 = vector.broadcast %cst_139 : f32 to vector<48x1xf32>
    %383 = arith.addf %381, %382 : vector<48x1xf32>
    %384 = math.rsqrt %383 : vector<48x1xf32>
    %385 = vector.broadcast %384 : vector<48x1xf32> to vector<48x128xf32>
    %386 = arith.mulf %376, %385 : vector<48x128xf32>
    %387 = vector.broadcast %9 : vector<1x128xf32> to vector<48x128xf32>
    %388 = arith.mulf %386, %387 : vector<48x128xf32>
    %389 = vector.broadcast %10 : vector<1x128xf32> to vector<48x128xf32>
    %390 = arith.addf %388, %389 : vector<48x128xf32>
    %c0_140 = arith.constant 0 : index
    %c0_141 = arith.constant 0 : index
    %391 = vector.load %arg8[%c0_140, %c0_141] : memref<48x128xf32, #tpu.memory_space<vmem>>, vector<48x128xf32>
    tpu.vector_store %arg8[%c0_140, %c0_141], %390 {strides = array<i32>} : memref<48x128xf32, #tpu.memory_space<vmem>>, vector<48x128xf32>,
    return
  }
}

</mosaic_0001>

<bundles_post_ra>
// kernel: custom-call.1
= control target key start
LH: loop header
LB: loop body
LE: loop exit
PB: predicated region body
PF: predicated region fallthrough
CT: control target
= control target key end

     0   :  { %s6_s0 = inlined_call_operand.vmem [shape: f32[32], index: 0, kind: output, shape index: {}]  }

// kernel: enhanced_sa_forward.1
= control target key start
LH: loop header
LB: loop body
LE: loop exit
PB: predicated region body
PF: predicated region fallthrough
CT: control target
= control target key end

     0   :  { %v8991_v0 = vmov 0   ;;  %v8987_v2 = vmov 0.0   ;;  %vm65_vm0 = vcmask 1043456   ;;  %vm6275_vm1 = vmmov 0   ;;  %s6277_s25 = smov 96   ;;  %s6278_s26 = smov 64   ;;  %s8977_s2 = inlined_call_operand.vmem [shape: s32[48,1], index: 2, kind: input, shape index: {}]   ;;  %s8978_s1 = inlined_call_operand.vmem [shape: f32[8,128], index: 1, kind: input, shape index: {}]   ;;  %s8979_s0 = inlined_call_operand.vmem [shape: f32[48,8], index: 0, kind: input, shape index: {}]   ;;  %s8980_s3 = inlined_call_operand.vmem [shape: s32[1,128], index: 3, kind: input, shape index: {}]   ;;  %s8981_s5 = inlined_call_operand.vmem [shape: bf16[672,128], index: 5, kind: input, shape index: {}]   ;;  %s8982_s4 = inlined_call_operand.vmem [shape: bf16[128,24], index: 4, kind: input, shape index: {}]   ;;  %s8983_s6 = inlined_call_operand.vmem [shape: bf16[320,384], index: 6, kind: input, shape index: {}]   ;;  %s8984_s7 = inlined_call_operand.vmem [shape: f32[16,384], index: 7, kind: input, shape index: {}]   ;;  %s8985_s8 = inlined_call_operand.vmem [shape: f32[48,128], index: 8, kind: output, shape index: {}]  }
   0x1   :  { %6018 = vset.pattern.permute.xlu1 %v8991_v0  ;;  %v175_v1 = vld [vmem:[%s8977_s2] sm:$0xff]  ;;  %5535 = vmatprep.subr.bf16.mxu0 %v8987_v2  ;;  %v45_v6 = vld [vmem:[%s8979_s0 + $0x8] sm:$0xff]  ;;  %vm55_vm2 = vcmask 64512   ;;  %v46_v16 = vld [vmem:[%s8979_s0 + $0x10] sm:$0xff]  ;;  %vm359_vm9 = vcmask 195584   ;;  %s6279_s27 = smov 32  }
   0x2   :  { %v50_v3 = vld [vmem:[%s8978_s1] sm:$0xff]  ;;  %183 = vperm.xlu1 %6018, %v175_v1   ;;  %6007 = vmatprep.subr.bf16.mxu1 %v8987_v2  ;;  %v176_v8 = vld [vmem:[%s8977_s2 + $0x8] sm:$0xff]  ;;  %v127_v11 = vmul.f32 %v45_v6, %v45_v6  ;;  %v128_v18 = vmul.f32 %v46_v16, %v46_v16  ;;  %v47_v19 = vld [vmem:[%s8979_s0 + $0x18] sm:$0xff] }
   0x3   :  { %v54_v4 = vpack.c.bf16 %v50_v3, %v50_v3  ;;  %v44_v5 = vld [vmem:[%s8979_s0] sm:$0xff]  ;;  %5537 = vmatprep.mubr.msk.bf16.mxu0 %vm6275_vm1, %v8987_v2  ;;  %5545 = vmatprep.mubr.msk.bf16.mxu1 %vm6275_vm1, %v8987_v2  ;;  %v49_v9 = vld [vmem:[%s8979_s0 + $0x28] sm:$0xff]  ;;  %v6378_v22 = vpack.c.bf16 %v47_v19, %v46_v16  ;;  %v129_v26 = vmul.f32 %v47_v19, %v47_v19  ;;  %v177_v28 = vld [vmem:[%s8977_s2 + $0x10] sm:$0xff] }
   0x4   :  { %v48_v7 = vld [vmem:[%s8979_s0 + $0x20] sm:$0xff]  ;;  %v126_v10 = vmul.f32 %v44_v5, %v44_v5  ;;  %v6355_v13 = vpack.c.bf16 %v45_v6, %v44_v5  ;;  %6019 = vset.pattern.permute.xlu0 %v8991_v0  ;;  %v135_v17 = vsel %vm55_vm2, %v127_v11, 0.0  ;;  %v138_v20 = vsel %vm55_vm2, %v128_v18, 0.0  ;;  %v180_v29 = vld [vmem:[%s8977_s2 + $0x28] sm:$0xff]  ;;  %v178_v30 = vld [vmem:[%s8977_s2 + $0x18] sm:$0xff] }
   0x5   :  { %v67_v12 = vsel %vm65_vm0, %v54_v4, 0  ;;  %v6357_v14 = vpack.c.bf16 %v49_v9, %v48_v7  ;;  %v130_v21 = vmul.f32 %v48_v7, %v48_v7  ;;  %v131_v24 = vmul.f32 %v49_v9, %v49_v9  ;;  %v179_v31 = vld [vmem:[%s8977_s2 + $0x20] sm:$0xff] }
   0x6   :  { %5536 = vmatpush3.bf16.msra.mxu0 %v67_v12  ;;  %6008 = vmatpush3.bf16.msra.mxu1 %v67_v12  ;;  %v132_v15 = vsel %vm55_vm2, %v126_v10, 0.0  ;;  %v141_v27 = vsel %vm55_vm2, %v129_v26, 0.0  ;;  %v150_v33 = vmul.f32 %v50_v3, %v50_v3  ;;  %v5037_v55 = vld [vmem:[%s8980_s3] ss:$0 sm:$0xff] }
   0x7   :  { %186 = vperm.xlu1 %6018, %v176_v8   ;;  %133 = vadd.xlane.f32.xlu0 %v132_v15  ;;  %v144_v23 = vsel %vm55_vm2, %v130_v21, 0.0  ;;  %v147_v25 = vsel %vm55_vm2, %v131_v24, 0.0 }
   0x8   :  { %5549 = vmatprep.subr.bf16.mxu1 %v8987_v2  ;;  %v151_v34 = vrot.slane %v150_v33, 4 }
   0x9   :  { %5538 = vmatmul.mubr.msk.bf16.vlgmr.msra.gmra.mrb[0].mxu0 %vm55_vm2, %v6355_v13  ;;  %5546 = vmatmul.mubr.msk.bf16.vlgmr.msra.gmra.mrb[0].mxu1 %vm55_vm2, %v6357_v14 }
   0xa   :  { %5541 = vmatprep.mubr.msk.bf16.mxu0 %vm6275_vm1, %v8987_v2  ;;  %5551 = vmatprep.mubr.msk.bf16.mxu1 %vm6275_vm1, %v8987_v2  ;;  %v152_v36 = vadd.f32 %v151_v34, %v150_v33  ;;  %v6023_v33 = vld [vmem:[%s8982_s4 + $0x8] sm:$0xff]   ;;  %v6024_v34 = vld [vmem:[%s8982_s4 + $0x10] sm:$0xff]  }
   0xb   :  { %136 = vadd.xlane.f32.xlu0 %v135_v17 }
   0xc   :  { %v153_v38 = vrot.slane %v152_v36, 2 }
   0xe   :  { %v154_v40 = vadd.f32 %v153_v38, %v152_v36  ;;  %v6026_v36 = vld [vmem:[%s8982_s4 + $0x20] sm:$0xff]   ;;  %v6028_v38 = vld [vmem:[%s8982_s4 + $0x30] sm:$0xff]  }
   0xf   :  { %139 = vadd.xlane.f32.xlu0 %v138_v20 }
  0x10   :  { %v155_v43 = vrot.slane %v154_v40, 1 }
  0x11   :  { %5542 = vmatmul.mubr.msk.bf16.gmra.mrb[4].mxu0 %vm55_vm2, %v6378_v22 }
  0x12   :  { %v156_v48 = vadd.f32 %v155_v43, %v154_v40  ;;  %v8986_v40 = vlaneseq }
  0x13   :  { %145 = vadd.xlane.f32.xlu0 %v144_v23 }
  0x17   :  { %148 = vadd.xlane.f32.xlu0 %v147_v25 }
  0x2b   :  { %142 = vadd.xlane.f32.xlu1 %v141_v27 }
  0x2d   :  { %189 = vperm.xlu0 %6019, %v177_v28  }
  0x31   :  { %198 = vperm.xlu0 %6019, %v180_v29   ;;  %v6020_v29 = vld [vmem:[%s8981_s5 + $0x4] sm:$0xff]  }
  0x32   :  { %5563 = vmatprep.subr.bf16.mxu0 %v6020_v29 }
  0x33   :  { %5564 = vmatpush3.bf16.msra.mxu0 %v6020_v29 }
  0x3c   :  { %192 = vperm.xlu1 %6018, %v178_v30   ;;  %v6021_v30 = vld [vmem:[%s8981_s5 + $0xc] ss:$0 sps:$4 sm:$0xff]  }
  0x3d   :  { %6009 = vmatprep.subr.msk.bf16.mxu0 %vm65_vm0, %v6021_v30 }
  0x40   :  { %195 = vperm.xlu1 %6018, %v179_v31   ;;  %v6022_v31 = vld [vmem:[%s8982_s4] sm:$0xff]  }
  0x41   :  { %5567 = vmatprep.mubr.msk.bf16.mxu0 %vm359_vm9, %v6022_v31 }
  0x81   :  { %v184_v39 = vpop.permute.xlu1 %183 }
  0x82   :  { %vm204_vm3 = vcmp.eq.s32.totalorder %v184_v39, %v5037_v55  ;;  %v6029_v39 = vld [vmem:[%s8982_s4 + $0x38] sm:$0xff]  }
  0x86   :  { %v187_v42 = vpop.permute.xlu1 %186 }
  0x87   :  { %vm205_vm4 = vcmp.eq.s32.totalorder %v187_v42, %v5037_v55 }
  0x94   :  { %v134_v32 = vpop.xlane.xlu0 %133 }
  0x98   :  { %v137_v35 = vpop.xlane.xlu0 %136 }
  0x9c   :  { %v140_v37 = vpop.xlane.xlu0 %139 }
  0xa0   :  { %v146_v41 = vpop.xlane.xlu0 %145 }
  0xa4   :  { %v149_v45 = vpop.xlane.xlu0 %148 }
  0xac   :  { %v190_v7 = vpop.permute.xlu0 %189 }
  0xad   :  { %vm206_vm5 = vcmp.eq.s32.totalorder %v190_v7, %v5037_v55 }
  0xb0   :  { %v199_v23 = vpop.permute.xlu0 %198 }
  0xb1   :  { %vm209_vm8 = vcmp.eq.s32.totalorder %v199_v23, %v5037_v55 }
  0xb8   :  { %v143_v44 = vpop.xlane.xlu1 %142 }
  0xbc   :  { %v193_v9 = vpop.permute.xlu1 %192 }
  0xbd   :  { %vm207_vm6 = vcmp.eq.s32.totalorder %v193_v9, %v5037_v55 }
  0xc0   :  { %v196_v21 = vpop.permute.xlu1 %195 }
  0xc1   :  { %vm208_vm7 = vcmp.eq.s32.totalorder %v196_v21, %v5037_v55 }
  0xdc   :  { %v103_v46 = vpop.f32.mrb[0].mxu0  ;;  %v119_v47 = vpop.f32.mrb[0].mxu1 }
  0xdd   :  { %v157_v49 = vmul.f32 2.0, %v103_v46  ;;  %v161_v50 = vmul.f32 2.0, %v119_v47  ;;  %v5539_v51 = vpop.f32.mrb[1].mxu0  ;;  %v5547_v52 = vpop.f32.mrb[1].mxu1 }
  0xde   :  { %v106_v53 = vpop.f32.mrb[2].mxu0  ;;  %v122_v54 = vpop.f32.mrb[2].mxu1 }
  0xdf   :  { %v163_v56 = vsub.f32 %v134_v32, %v157_v49  ;;  %v167_v57 = vsub.f32 %v146_v41, %v161_v50  ;;  %v158_v58 = vmul.f32 2.0, %v106_v53  ;;  %v5540_v59 = vpop.f32.mrb[3].mxu0  ;;  %v162_v60 = vmul.f32 2.0, %v122_v54  ;;  %v5548_v61 = vpop.f32.mrb[3].mxu1 }
  0xe0   :  { %v385_v32 = vsel %vm65_vm0, %v6021_v30, 0  ;;  %v6460_v41 = vand.u32 127, %v8986_v40 }
  0xe1   :  { %v164_v62 = vsub.f32 %v137_v35, %v158_v58  ;;  %v168_v63 = vsub.f32 %v149_v45, %v162_v60  ;;  %v169_v1 = vadd.f32 %v163_v56, %v156_v48  ;;  %v173_v3 = vadd.f32 %v167_v57, %v156_v48  ;;  %5566 = vmatpush3.bf16.msra.mxu0 %v385_v32  ;;  %v6025_v35 = vld [vmem:[%s8982_s4 + $0x18] sm:$0xff]  }
  0xe3   :  { %v6400_v4 = vsel %vm204_vm3, %v169_v1, 1e+30  ;;  %v170_v5 = vadd.f32 %v164_v62, %v156_v48  ;;  %v174_v6 = vadd.f32 %v168_v63, %v156_v48  ;;  %v6412_v27 = vsel %vm208_vm7, %v173_v3, 1e+30 }
  0xe4   :  { %500 = vmin.xlane.f32.xlu1 %v6400_v4  ;;  %v111_v8 = vpop.f32.mrb[4].mxu0  ;;  %5568 = vmatmul.mubr.msk.bf16.vlgmr.msra.gmra.mrb[8].mxu0 %vm359_vm9, %v6023_v33 }
  0xe5   :  { %v159_v10 = vmul.f32 2.0, %v111_v8  ;;  %v5543_v11 = vpop.f32.mrb[5].mxu0  ;;  %v6403_v12 = vsel %vm205_vm4, %v170_v5, 1e+30  ;;  %v6415_v28 = vsel %vm209_vm8, %v174_v6, 1e+30  ;;  %5571 = vmatprep.mubr.msk.bf16.mxu0 %vm359_vm9, %v6024_v34 }
  0xe6   :  { %502 = vmin.xlane.f32.xlu0 %v6403_v12  ;;  %v114_v15 = vpop.f32.mrb[6].mxu0  ;;  %v218_v5 = vld [vmem:[%s8981_s5] sm:$0xf] }
  0xe7   :  { %v165_v16 = vsub.f32 %v140_v37, %v159_v10  ;;  %v160_v17 = vmul.f32 2.0, %v114_v15  ;;  %v5544_v18 = vpop.f32.mrb[7].mxu0  ;;  %v6027_v37 = vld [vmem:[%s8982_s4 + $0x28] sm:$0xff]   ;;  %v220_v6 = vsel %vm65_vm0, %v218_v5, 0 }
  0xe8   :  { %5550 = vmatpush3.bf16.msra.mxu1 %v220_v6 }
  0xe9   :  { %v166_v19 = vsub.f32 %v143_v44, %v160_v17  ;;  %v171_v20 = vadd.f32 %v165_v16, %v156_v48  ;;  %5583 = vmatprep.subr.bf16.mxu1 %v8987_v2 }
  0xeb   :  { %v6406_v24 = vsel %vm206_vm5, %v171_v20, 1e+30  ;;  %v172_v25 = vadd.f32 %v166_v19, %v156_v48  ;;  %5552 = vmatmul.mubr.msk.bf16.vlgmr.msra.gmra.mrb[4].mxu1 %vm55_vm2, %v6355_v13 }
  0xec   :  { %504 = vmin.xlane.f32.xlu0 %v6406_v24  ;;  %5572 = vmatmul.mubr.msk.bf16.gmra.mrb[12].mxu0 %vm359_vm9, %v6025_v35 }
  0xed   :  { %v6409_v26 = vsel %vm207_vm6, %v172_v25, 1e+30  ;;  %5575 = vmatprep.mubr.msk.bf16.mxu0 %vm359_vm9, %v6026_v36  ;;  %5555 = vmatprep.mubr.msk.bf16.mxu1 %vm6275_vm1, %v8987_v2 }
  0xee   :  { %506 = vmin.xlane.f32.xlu1 %v6409_v26 }
  0xf0   :  { %508 = vmin.xlane.f32.xlu0 %v6412_v27 }
  0xf2   :  { %510 = vmin.xlane.f32.xlu1 %v6415_v28 }
  0xf3   :  { %5556 = vmatmul.mubr.msk.bf16.gmra.mrb[8].mxu1 %vm55_vm2, %v6378_v22 }
  0xf4   :  { %5576 = vmatmul.mubr.msk.bf16.gmra.mrb[16].mxu0 %vm359_vm9, %v6027_v37  ;;  %5559 = vmatprep.mubr.msk.bf16.mxu1 %vm6275_vm1, %v8987_v2 }
  0xf5   :  { %5579 = vmatprep.mubr.msk.bf16.mxu0 %vm359_vm9, %v6028_v38 }
  0xfb   :  { %5560 = vmatmul.mubr.msk.bf16.gmra.mrb[12].mxu1 %vm55_vm2, %v6357_v14 }
  0xfc   :  { %5580 = vmatmul.mubr.msk.bf16.gmra.mrb[20].mxu0 %vm359_vm9, %v6029_v39  ;;  %5599 = vmatprep.mubr.msk.bf16.mxu1 %vm6275_vm1, %v8987_v2 }
  0xfd   :  { %783 = vmatprep.mubr.bf16.mxu0 %v8991_v0 }
 0x171   :  { %v501_v42 = vpop.xlane.xlu1 %500 }
 0x172   :  { %vm512_vm10 = vcmp.eq.f32.partialorder %v6400_v4, %v501_v42 }
 0x173   :  { %v6464_v43 = vsel %vm512_vm10, %v6460_v41, 128  ;;  %v503_v44 = vpop.xlane.xlu0 %502 }
 0x174   :  { %vm513_vm11 = vcmp.eq.f32.partialorder %v6403_v12, %v503_v44  ;;  %v525_v45 = vshra.s32 %v6464_v43, 16  ;;  %v524_v36 = vand.u32 65535, %v6464_v43 }
 0x175   :  { %v6469_v46 = vsel %vm513_vm11, %v6460_v41, 128 }
 0x176   :  { %v6471_v47 = vcvt.s32.f32 %v525_v45  ;;  %v539_v48 = vshra.s32 %v6469_v46, 16  ;;  %v538_v37 = vand.u32 65535, %v6469_v46  ;;  %v526_v39 = vcvt.s32.f32 %v524_v36 }
 0x178   :  { %528 = vmin.xlane.f32.xlu0 %v6471_v47  ;;  %v6475_v49 = vcvt.s32.f32 %v539_v48  ;;  %v540_v45 = vcvt.s32.f32 %v538_v37 }
 0x179   :  { %v505_v50 = vpop.xlane.xlu0 %504 }
 0x17a   :  { %vm514_vm12 = vcmp.eq.f32.partialorder %v6406_v24, %v505_v50  ;;  %542 = vmin.xlane.f32.xlu1 %v6475_v49 }
 0x17b   :  { %v6480_v51 = vsel %vm514_vm12, %v6460_v41, 128  ;;  %v507_v52 = vpop.xlane.xlu1 %506 }
 0x17c   :  { %vm515_vm13 = vcmp.eq.f32.partialorder %v6409_v26, %v507_v52  ;;  %v553_v53 = vshra.s32 %v6480_v51, 16  ;;  %v552_v48 = vand.u32 65535, %v6480_v51 }
 0x17d   :  { %v6485_v54 = vsel %vm515_vm13, %v6460_v41, 128  ;;  %v509_v55 = vpop.xlane.xlu0 %508 }
 0x17e   :  { %vm516_vm14 = vcmp.eq.f32.partialorder %v6412_v27, %v509_v55  ;;  %v6488_v56 = vcvt.s32.f32 %v553_v53  ;;  %v567_v57 = vshra.s32 %v6485_v54, 16  ;;  %v566_v46 = vand.u32 65535, %v6485_v54 }
 0x17f   :  { %v6492_v58 = vsel %vm516_vm14, %v6460_v41, 128  ;;  %v511_v59 = vpop.xlane.xlu1 %510  ;;  %v554_v52 = vcvt.s32.f32 %v552_v48 }
 0x180   :  { %vm517_vm15 = vcmp.eq.f32.partialorder %v6415_v28, %v511_v59  ;;  %556 = vmin.xlane.f32.xlu0 %v6488_v56  ;;  %v6496_v60 = vcvt.s32.f32 %v567_v57  ;;  %v581_v61 = vshra.s32 %v6492_v58, 16  ;;  %v568_v57 = vcvt.s32.f32 %v566_v46 }
 0x181   :  { %v6500_v62 = vsel %vm517_vm15, %v6460_v41, 128 }
 0x182   :  { %570 = vmin.xlane.f32.xlu1 %v6496_v60  ;;  %v6503_v63 = vcvt.s32.f32 %v581_v61  ;;  %v595_v1 = vshra.s32 %v6500_v62, 16  ;;  %v594_v59 = vand.u32 65535, %v6500_v62 }
 0x184   :  { %584 = vmin.xlane.f32.xlu0 %v6503_v63  ;;  %v6507_v3 = vcvt.s32.f32 %v595_v1  ;;  %v596_v5 = vcvt.s32.f32 %v594_v59 }
 0x186   :  { %598 = vmin.xlane.f32.xlu1 %v6507_v3 }
 0x1b7   :  { %v5569_v7 = vpop.f32.mrb[8].mxu0 }
 0x1b8   :  { %v421_v8 = vpop.f32.mrb[9].mxu0 }
 0x1b9   :  { %v5570_v9 = vpop.f32.mrb[10].mxu0 }
 0x1ba   :  { %v6527_v10 = vpack.c.bf16 %v5570_v9, %v5569_v7  ;;  %v424_v13 = vpop.f32.mrb[11].mxu0 }
 0x1bb   :  { %v6529_v11 = vpack.c.bf16 %v424_v13, %v421_v8 }
 0x1bc   :  { %9030 = vst [vmem:[#allocation3_spill] sm:$0xff] %v6527_v10 }
 0x1bd   :  { %9031 = vst [vmem:[#allocation4_spill] sm:$0xff] %v6529_v11  ;;  %5584 = vmatpush3.bf16.msra.mxu1 %v6529_v11 }
 0x1be   :  { %5585 = vmatprep.subr.bf16.mxu1 %v8987_v2 }
 0x1bf   :  { %v5573_v22 = vpop.f32.mrb[12].mxu0 }
 0x1c0   :  { %v437_v15 = vpop.f32.mrb[13].mxu0 }
 0x1c1   :  { %v5574_v16 = vpop.f32.mrb[14].mxu0  ;;  %5586 = vmatpush3.bf16.msra.mxu1 %v6527_v10 }
 0x1c2   :  { %v6534_v14 = vpack.c.bf16 %v5574_v16, %v5573_v22  ;;  %v440_v17 = vpop.f32.mrb[15].mxu0  ;;  %5587 = vmatprep.subr.bf16.mxu1 %v8987_v2 }
 0x1c3   :  { %v6537_v18 = vpack.c.bf16 %v440_v17, %v437_v15 }
 0x1c4   :  { %9032 = vst [vmem:[#allocation5_spill] sm:$0xff] %v6534_v14 }
 0x1c5   :  { %9033 = vst [vmem:[#allocation6_spill] sm:$0xff] %v6537_v18  ;;  %5588 = vmatpush3.bf16.msra.mxu1 %v6537_v18 }
 0x1c6   :  { %5589 = vmatprep.subr.bf16.mxu1 %v8987_v2 }
 0x1c7   :  { %v5577_v19 = vpop.f32.mrb[16].mxu0 }
 0x1c8   :  { %v453_v20 = vpop.f32.mrb[17].mxu0 }
 0x1c9   :  { %v5578_v21 = vpop.f32.mrb[18].mxu0  ;;  %5590 = vmatpush3.bf16.msra.mxu1 %v6534_v14 }
 0x1ca   :  { %v6542_v23 = vpack.c.bf16 %v5578_v21, %v5577_v19  ;;  %v456_v25 = vpop.f32.mrb[19].mxu0  ;;  %5591 = vmatprep.subr.bf16.mxu1 %v8987_v2 }
 0x1cb   :  { %v6545_v29 = vpack.c.bf16 %v456_v25, %v453_v20 }
 0x1cc   :  { %9034 = vst [vmem:[#allocation7_spill] sm:$0xff] %v6542_v23 }
 0x1cd   :  { %9035 = vst [vmem:[#allocation8_spill] sm:$0xff] %v6545_v29  ;;  %5592 = vmatpush3.bf16.msra.mxu1 %v6545_v29 }
 0x1ce   :  { %5593 = vmatprep.subr.bf16.mxu1 %v8987_v2 }
 0x1cf   :  { %v5581_v30 = vpop.f32.mrb[20].mxu0 }
 0x1d0   :  { %v469_v31 = vpop.f32.mrb[21].mxu0 }
 0x1d1   :  { %v5582_v32 = vpop.f32.mrb[22].mxu0  ;;  %5594 = vmatpush3.bf16.msra.mxu1 %v6542_v23 }
 0x1d2   :  { %v6550_v33 = vpack.c.bf16 %v5582_v32, %v5581_v30  ;;  %v472_v34 = vpop.f32.mrb[23].mxu0  ;;  %5595 = vmatprep.subr.bf16.mxu1 %v8987_v2  ;;  %v8989_v30 = vmov 1.0|1.0  }
 0x1d3   :  { %v6553_v35 = vpack.c.bf16 %v472_v34, %v469_v31 }
 0x1d4   :  { %9036 = vst [vmem:[#allocation9_spill] sm:$0xff] %v6550_v33 }
 0x1d5   :  { %9037 = vst [vmem:[#allocation10_spill] sm:$0xff] %v6553_v35  ;;  %5596 = vmatpush3.bf16.msra.mxu1 %v6553_v35 }
 0x1d6   :  { %5597 = vmatprep.subr.bf16.mxu1 %v8987_v2 }
 0x1d9   :  { %5598 = vmatpush3.bf16.msra.mxu1 %v6550_v33 }
 0x1da   :  { %5611 = vmatprep.subr.bf16.mxu1 %v8987_v2 }
 0x205   :  { %v529_v38 = vpop.xlane.xlu0 %528 }
 0x206   :  { %vm530_vm0 = vcmp.eq.f32.partialorder %v6471_v47, %v529_v38  ;;  %v580_v47 = vand.u32 65535, %v6492_v58  ;;  %v535_v58 = vcvt.f32.s32 %v529_v38 }
 0x207   :  { %v543_v42 = vpop.xlane.xlu1 %542  ;;  %v531_v44 = vsel %vm530_vm0, %v526_v39, inf }
 0x208   :  { %532 = vmin.xlane.f32.xlu0 %v531_v44  ;;  %vm544_vm2 = vcmp.eq.f32.partialorder %v6475_v49, %v543_v42  ;;  %v582_v51 = vcvt.s32.f32 %v580_v47  ;;  %v549_v6 = vcvt.f32.s32 %v543_v42  ;;  %v536_v7 = vshll.u32 %v535_v58, 16  ;;  %v6633_v47 = vld [vmem:[%s8983_s6 + $0x4] ss:$12 sps:$4 sm:$0xff]  }
 0x209   :  { %v545_v43 = vsel %vm544_vm2, %v540_v45, inf  ;;  %751 = vmatprep.subr.bf16.mxu0 %v6633_v47 }
 0x20a   :  { %546 = vmin.xlane.f32.xlu1 %v545_v43  ;;  %v550_v9 = vshll.u32 %v549_v6, 16  ;;  %v6665_v6 = vld [vmem:[%s8983_s6 + $0x34] ss:$12 sps:$4 sm:$0xff]  }
 0x20d   :  { %v557_v50 = vpop.xlane.xlu0 %556 }
 0x20e   :  { %vm558_vm3 = vcmp.eq.f32.partialorder %v6488_v56, %v557_v50  ;;  %v563_v15 = vcvt.f32.s32 %v557_v50 }
 0x20f   :  { %v571_v53 = vpop.xlane.xlu1 %570  ;;  %v559_v55 = vsel %vm558_vm3, %v554_v52, inf }
 0x210   :  { %560 = vmin.xlane.f32.xlu0 %v559_v55  ;;  %vm572_vm4 = vcmp.eq.f32.partialorder %v6496_v60, %v571_v53  ;;  %v577_v17 = vcvt.f32.s32 %v571_v53  ;;  %v564_v20 = vshll.u32 %v563_v15, 16  ;;  %v6638_v53 = vld [vmem:[%s8983_s6] ss:$12 sps:$4 sm:$0xff]  }
 0x211   :  { %v585_v49 = vpop.xlane.xlu0 %584  ;;  %v573_v61 = vsel %vm572_vm4, %v568_v57, inf  ;;  %v6643_v57 = vld [vmem:[%s8983_s6 + $0x1c] ss:$12 sps:$4 sm:$0xff]   ;;  %752 = vmatpush1.bf16.msra.mxu0 %v6638_v53 }
 0x212   :  { %574 = vmin.xlane.f32.xlu1 %v573_v61  ;;  %vm586_vm5 = vcmp.eq.f32.partialorder %v6503_v63, %v585_v49  ;;  %v591_v21 = vcvt.f32.s32 %v585_v49  ;;  %v578_v31 = vshll.u32 %v577_v17, 16  ;;  %v6651_v49 = vld [vmem:[%s8983_s6 + $0x18] ss:$12 sps:$4 sm:$0xff]   ;;  %753 = vmatprep.subr.bf16.mxu0 %v6643_v57 }
 0x213   :  { %v599_v54 = vpop.xlane.xlu1 %598  ;;  %v587_v1 = vsel %vm586_vm5, %v582_v51, inf }
 0x214   :  { %588 = vmin.xlane.f32.xlu0 %v587_v1  ;;  %vm600_vm6 = vcmp.eq.f32.partialorder %v6507_v3, %v599_v54  ;;  %v605_v32 = vcvt.f32.s32 %v599_v54  ;;  %v592_v37 = vshll.u32 %v591_v21, 16 }
 0x215   :  { %v601_v56 = vsel %vm600_vm6, %v596_v5, inf  ;;  %754 = vmatpush1.bf16.msra.mxu0 %v6651_v49 }
 0x216   :  { %602 = vmin.xlane.f32.xlu1 %v601_v56  ;;  %v606_v45 = vshll.u32 %v605_v32, 16  ;;  %755 = vmatprep.subr.bf16.mxu0 %v6665_v6 }
 0x295   :  { %v533_v62 = vpop.xlane.xlu0 %532 }
 0x296   :  { %v534_v8 = vcvt.f32.s32 %v533_v62  ;;  %v6670_v62 = vld [vmem:[%s8983_s6 + $0x30] ss:$12 sps:$4 sm:$0xff]  }
 0x297   :  { %v547_v60 = vpop.xlane.xlu1 %546  ;;  %756 = vmatpush1.bf16.msra.mxu0 %v6670_v62 }
 0x298   :  { %v537_v13 = vadd.s32 %v536_v7, %v534_v8  ;;  %v548_v22 = vcvt.f32.s32 %v547_v60  ;;  %v6677_v7 = vld [vmem:[%s8983_s6 + $0x4c] ss:$12 sps:$4 sm:$0xff]   ;;  %v6682_v8 = vld [vmem:[%s8983_s6 + $0x48] ss:$12 sps:$4 sm:$0xff]  }
 0x299   :  { %757 = vmatprep.subr.bf16.mxu0 %v6677_v7 }
 0x29a   :  { %v551_v16 = vadd.s32 %v550_v9, %v548_v22  ;;  %vm608_vm7 = vcmp.eq.s32.totalorder %v6460_v41, %v537_v13 }
 0x29b   :  { %v6573_v63 = vsel %vm608_vm7, 1e+30, %v6400_v4  ;;  %758 = vmatpush1.bf16.msra.mxu0 %v6682_v8 }
 0x29c   :  { %814 = vmin.xlane.f32.xlu0 %v6573_v63  ;;  %vm609_vm8 = vcmp.eq.s32.totalorder %v6460_v41, %v551_v16  ;;  %1024 = vmatprep.subr.bf16.mxu0 %v6633_v47 }
 0x29d   :  { %v561_v3 = vpop.xlane.xlu0 %560  ;;  %v6578_v19 = vsel %vm609_vm8, 1e+30, %v6403_v12  ;;  %vm5065_vm9 = vmpackc.low %vm609_vm8, %vm608_vm7  ;;  %vm741_vm7 = vcmask 523264  }
 0x29e   :  { %v562_v25 = vcvt.f32.s32 %v561_v3  ;;  %816 = vmin.xlane.f32.xlu1 %v6578_v19  ;;  %5600 = vmatmul.mubr.msk.bf16.vlgmr.msra.gmra.mrb[16].mxu1 %vm5065_vm9, %v8989_v30 }
 0x29f   :  { %v575_v4 = vpop.xlane.xlu1 %574  ;;  %5603 = vmatprep.mubr.msk.bf16.mxu1 %vm6275_vm1, %v8987_v2  ;;  %5612 = vmatpush3.bf16.msra.mxu1 %v6529_v11 }
 0x2a0   :  { %v565_v34 = vadd.s32 %v564_v20, %v562_v25  ;;  %v576_v12 = vcvt.f32.s32 %v575_v4  ;;  %5613 = vmatprep.subr.bf16.mxu1 %v8987_v2 }
 0x2a1   :  { %v589_v36 = vpop.xlane.xlu0 %588 }
 0x2a2   :  { %v579_v38 = vadd.s32 %v578_v31, %v576_v12  ;;  %v590_v39 = vcvt.f32.s32 %v589_v36  ;;  %vm610_vm10 = vcmp.eq.s32.totalorder %v6460_v41, %v565_v34 }
 0x2a3   :  { %v603_v42 = vpop.xlane.xlu1 %602  ;;  %v6588_v44 = vsel %vm610_vm10, 1e+30, %v6406_v24  ;;  %5614 = vmatpush3.bf16.msra.mxu1 %v6527_v10 }
 0x2a4   :  { %v593_v43 = vadd.s32 %v592_v37, %v590_v39  ;;  %v604_v48 = vcvt.f32.s32 %v603_v42  ;;  %818 = vmin.xlane.f32.xlu0 %v6588_v44  ;;  %vm611_vm11 = vcmp.eq.s32.totalorder %v6460_v41, %v579_v38  ;;  %5615 = vmatprep.subr.bf16.mxu1 %v8987_v2 }
 0x2a5   :  { %v6595_v46 = vsel %vm611_vm11, 1e+30, %v6409_v26  ;;  %vm5067_vm12 = vmpackc.low %vm611_vm11, %vm610_vm10 }
 0x2a6   :  { %v607_v50 = vadd.s32 %v606_v45, %v604_v48  ;;  %820 = vmin.xlane.f32.xlu1 %v6595_v46  ;;  %5604 = vmatmul.mubr.msk.bf16.gmra.mrb[20].mxu1 %vm5067_vm12, %v8989_v30  ;;  %vm612_vm13 = vcmp.eq.s32.totalorder %v6460_v41, %v593_v43 }
 0x2a7   :  { %v6601_v24 = vsel %vm612_vm13, 1e+30, %v6412_v27  ;;  %5607 = vmatprep.mubr.msk.bf16.mxu1 %vm6275_vm1, %v8987_v2  ;;  %5616 = vmatpush3.bf16.msra.mxu1 %v6537_v18  ;;  %v6626_v27 = vpop.f32.mrb[4].mxu1 }
 0x2a8   :  { %822 = vmin.xlane.f32.xlu0 %v6601_v24  ;;  %vm613_vm14 = vcmp.eq.s32.totalorder %v6460_v41, %v607_v50  ;;  %5617 = vmatprep.subr.bf16.mxu1 %v8987_v2  ;;  %v279_v50 = vsub.f32 0.0, %v6626_v27 }
 0x2a9   :  { %v6610_v26 = vsel %vm613_vm14, 1e+30, %v6415_v28  ;;  %vm5069_vm15 = vmpackc.low %vm613_vm14, %vm612_vm13  ;;  %v5553_v28 = vpop.f32.mrb[5].mxu1 }
 0x2aa   :  { %824 = vmin.xlane.f32.xlu1 %v6610_v26  ;;  %v6628_v52 = vpop.f32.mrb[6].mxu1  ;;  %v30_v28 = vld [vmem:[%s8984_s7] ss:$0 sm:$0xff] }
 0x2ab   :  { %5618 = vmatpush3.bf16.msra.mxu1 %v6534_v14  ;;  %v5554_v55 = vpop.f32.mrb[7].mxu1 }
 0x2ac   :  { %5619 = vmatprep.subr.bf16.mxu1 %v8987_v2  ;;  %v6645_v59 = vpop.f32.mrb[8].mxu1  ;;  %v280_v55 = vsub.f32 0.0, %v6628_v52 }
 0x2ad   :  { %v5557_v61 = vpop.f32.mrb[9].mxu1 }
 0x2ae   :  { %5608 = vmatmul.mubr.msk.bf16.gmra.mrb[24].mxu1 %vm5069_vm15, %v8989_v30  ;;  %v6654_v51 = vpop.f32.mrb[10].mxu1  ;;  %v6740_v61 = vadd.f32 %v279_v50, %v30_v28 }
 0x2af   :  { %5620 = vmatpush3.bf16.msra.mxu1 %v6545_v29  ;;  %5627 = vmatprep.mubr.msk.bf16.mxu1 %vm6275_vm1, %v8987_v2  ;;  %v5558_v54 = vpop.f32.mrb[11].mxu1 }
 0x2b0   :  { %5621 = vmatprep.subr.bf16.mxu1 %v8987_v2  ;;  %v6657_v1 = vpop.f32.mrb[12].mxu1  ;;  %v6742_v54 = vadd.f32 %v280_v55, %v30_v28 }
 0x2b1   :  { %v5561_v5 = vpop.f32.mrb[13].mxu1 }
 0x2b2   :  { %v6660_v56 = vpop.f32.mrb[14].mxu1 }
 0x2b3   :  { %5622 = vmatpush3.bf16.msra.mxu1 %v6542_v23  ;;  %v5562_v58 = vpop.f32.mrb[15].mxu1  ;;  %v284_v50 = vsub.f32 0.0, %v6660_v56 }
 0x2b4   :  { %5623 = vmatprep.subr.bf16.mxu1 %v8987_v2  ;;  %v281_v58 = vsub.f32 0.0, %v6645_v59  ;;  %v283_v59 = vsub.f32 0.0, %v6657_v1 }
 0x2b7   :  { %5624 = vmatpush3.bf16.msra.mxu1 %v6553_v35 }
 0x2b8   :  { %5625 = vmatprep.subr.bf16.mxu1 %v8987_v2 }
 0x2bb   :  { %5626 = vmatpush3.bf16.msra.mxu1 %v6550_v33 }
 0x2bc   :  { %5639 = vmatprep.subr.bf16.mxu1 %v8987_v2 }
 0x329   :  { %v815_v60 = vpop.xlane.xlu0 %814 }
 0x32a   :  { %vm826_vm0 = vcmp.eq.f32.partialorder %v6573_v63, %v815_v60 }
 0x32b   :  { %v6689_v9 = vsel %vm826_vm0, %v6460_v41, 128  ;;  %v817_v13 = vpop.xlane.xlu1 %816 }
 0x32c   :  { %vm827_vm2 = vcmp.eq.f32.partialorder %v6578_v19, %v817_v13  ;;  %v839_v22 = vshra.s32 %v6689_v9, 16 }
 0x32d   :  { %v6694_v15 = vsel %vm827_vm2, %v6460_v41, 128 }
 0x32e   :  { %v6696_v16 = vcvt.s32.f32 %v839_v22  ;;  %v853_v17 = vshra.s32 %v6694_v15, 16 }
 0x330   :  { %842 = vmin.xlane.f32.xlu0 %v6696_v16  ;;  %v6700_v3 = vcvt.s32.f32 %v853_v17  ;;  %v282_v17 = vsub.f32 0.0, %v6654_v51 }
 0x331   :  { %v819_v20 = vpop.xlane.xlu0 %818 }
 0x332   :  { %vm828_vm3 = vcmp.eq.f32.partialorder %v6588_v44, %v819_v20  ;;  %856 = vmin.xlane.f32.xlu1 %v6700_v3 }
 0x333   :  { %v6705_v21 = vsel %vm828_vm3, %v6460_v41, 128  ;;  %v821_v25 = vpop.xlane.xlu1 %820 }
 0x334   :  { %vm829_vm4 = vcmp.eq.f32.partialorder %v6595_v46, %v821_v25  ;;  %v867_v4 = vshra.s32 %v6705_v21, 16  ;;  %v6748_v25 = vadd.f32 %v281_v58, %v30_v28  ;;  %v6760_v58 = vadd.f32 %v283_v59, %v30_v28 }
 0x335   :  { %v6710_v31 = vsel %vm829_vm4, %v6460_v41, 128  ;;  %v823_v32 = vpop.xlane.xlu0 %822  ;;  %v838_v59 = vand.u32 65535, %v6689_v9 }
 0x336   :  { %vm830_vm5 = vcmp.eq.f32.partialorder %v6601_v24, %v823_v32  ;;  %v6713_v34 = vcvt.s32.f32 %v867_v4  ;;  %v881_v12 = vshra.s32 %v6710_v31, 16  ;;  %v6750_v32 = vadd.f32 %v282_v17, %v30_v28 }
 0x337   :  { %v6717_v36 = vsel %vm830_vm5, %v6460_v41, 128  ;;  %v825_v37 = vpop.xlane.xlu1 %824 }
 0x338   :  { %vm831_vm6 = vcmp.eq.f32.partialorder %v6610_v26, %v825_v37  ;;  %870 = vmin.xlane.f32.xlu0 %v6713_v34  ;;  %v6721_v38 = vcvt.s32.f32 %v881_v12  ;;  %v895_v39 = vshra.s32 %v6717_v36, 16 }
 0x339   :  { %v6725_v42 = vsel %vm831_vm6, %v6460_v41, 128 }
 0x33a   :  { %884 = vmin.xlane.f32.xlu1 %v6721_v38  ;;  %v6728_v45 = vcvt.s32.f32 %v895_v39  ;;  %v909_v43 = vshra.s32 %v6725_v42, 16 }
 0x33c   :  { %898 = vmin.xlane.f32.xlu0 %v6728_v45  ;;  %v6732_v48 = vcvt.s32.f32 %v909_v43 }
 0x33e   :  { %912 = vmin.xlane.f32.xlu1 %v6732_v48 }
 0x371   :  { %v669_v5 = vpop.f32.mrb[16].mxu1 }
 0x372   :  { %v670_v60 = vadd.f32 %v669_v5, %v6740_v61  ;;  %v5601_v13 = vpop.f32.mrb[17].mxu1 }
 0x373   :  { %v672_v22 = vpop.f32.mrb[18].mxu1  ;;  %v6763_v13 = vadd.f32 %v284_v50, %v30_v28 }
 0x374   :  { %v673_v27 = vadd.f32 %v672_v22, %v6742_v54  ;;  %v5602_v20 = vpop.f32.mrb[19].mxu1  ;;  %v692_v4 = vmax.f32 %v670_v60, 0.0 }
 0x376   :  { %v693_v52 = vmax.f32 %v673_v27, 0.0 }
 0x378   :  { %v698_v12 = vpack.c.bf16 %v693_v52, %v692_v4 }
 0x379   :  { %v677_v37 = vpop.f32.mrb[20].mxu1 }
 0x37a   :  { %v678_v39 = vadd.f32 %v677_v37, %v6748_v25  ;;  %v5605_v43 = vpop.f32.mrb[21].mxu1  ;;  %5079 = vmatmul.mubr.msk.bf16.vlgmr.msra.gmra.mrb[24].mxu0 %vm741_vm7, %v698_v12 }
 0x37b   :  { %v680_v51 = vpop.f32.mrb[22].mxu1  ;;  %793 = vmatprep.mubr.bf16.mxu0 %v8991_v0  ;;  %1025 = vmatpush1.bf16.msra.mxu0 %v6638_v53 }
 0x37c   :  { %v681_v55 = vadd.f32 %v680_v51, %v6750_v32  ;;  %v5606_v5 = vpop.f32.mrb[23].mxu1  ;;  %1026 = vmatprep.subr.bf16.mxu0 %v6643_v57  ;;  %v694_v1 = vmax.f32 %v678_v39, 0.0  ;;  %v852_v39 = vand.u32 65535, %v6694_v15  ;;  %v840_v51 = vcvt.s32.f32 %v838_v59 }
 0x37d   :  { %v894_v15 = vand.u32 65535, %v6717_v36 }
 0x37e   :  { %v695_v60 = vmax.f32 %v681_v55, 0.0  ;;  %v854_v5 = vcvt.s32.f32 %v852_v39 }
 0x37f   :  { %1027 = vmatpush1.bf16.msra.mxu0 %v6651_v49 }
 0x380   :  { %v699_v22 = vpack.c.bf16 %v695_v60, %v694_v1  ;;  %1028 = vmatprep.subr.bf16.mxu0 %v6665_v6  ;;  %v866_v60 = vand.u32 65535, %v6705_v21  ;;  %v896_v21 = vcvt.s32.f32 %v894_v15 }
 0x381   :  { %v685_v17 = vpop.f32.mrb[24].mxu1 }
 0x382   :  { %v686_v27 = vadd.f32 %v685_v17, %v6760_v58  ;;  %v5609_v56 = vpop.f32.mrb[25].mxu1  ;;  %5080 = vmatmul.mubr.msk.bf16.gmra.mrb[28].mxu0 %vm741_vm7, %v699_v22  ;;  %v880_v22 = vand.u32 65535, %v6710_v31  ;;  %v868_v9 = vcvt.s32.f32 %v866_v60 }
 0x383   :  { %v688_v20 = vpop.f32.mrb[26].mxu1  ;;  %803 = vmatprep.mubr.bf16.mxu0 %v8991_v0  ;;  %1029 = vmatpush1.bf16.msra.mxu0 %v6670_v62 }
 0x384   :  { %v689_v4 = vadd.f32 %v688_v20, %v6763_v13  ;;  %v5610_v52 = vpop.f32.mrb[27].mxu1  ;;  %1030 = vmatprep.subr.bf16.mxu0 %v6677_v7  ;;  %v696_v28 = vmax.f32 %v686_v27, 0.0  ;;  %v882_v56 = vcvt.s32.f32 %v880_v22  ;;  %v908_v20 = vand.u32 65535, %v6725_v42 }
 0x386   :  { %v697_v12 = vmax.f32 %v689_v4, 0.0 }
 0x387   :  { %1031 = vmatpush1.bf16.msra.mxu0 %v6682_v8 }
 0x388   :  { %v700_v37 = vpack.c.bf16 %v697_v12, %v696_v28  ;;  %1309 = vmatprep.subr.bf16.mxu0 %v6633_v47  ;;  %v910_v28 = vcvt.s32.f32 %v908_v20 }
 0x38a   :  { %5081 = vmatmul.mubr.msk.bf16.gmra.mrb[32].mxu0 %vm741_vm7, %v700_v37 }
 0x38b   :  { %1056 = vmatprep.mubr.bf16.mxu0 %v8991_v0 }
 0x3bd   :  { %v843_v43 = vpop.xlane.xlu0 %842 }
 0x3be   :  { %vm844_vm8 = vcmp.eq.f32.partialorder %v6696_v16, %v843_v43  ;;  %v849_v36 = vcvt.f32.s32 %v843_v43 }
 0x3bf   :  { %v857_v50 = vpop.xlane.xlu1 %856  ;;  %v845_v55 = vsel %vm844_vm8, %v840_v51, inf }
 0x3c0   :  { %846 = vmin.xlane.f32.xlu0 %v845_v55  ;;  %vm858_vm9 = vcmp.eq.f32.partialorder %v6700_v3, %v857_v50  ;;  %v863_v12 = vcvt.f32.s32 %v857_v50 }
 0x3c1   :  { %v859_v1 = vsel %vm858_vm9, %v854_v5, inf }
 0x3c2   :  { %860 = vmin.xlane.f32.xlu1 %v859_v1 }
 0x3c5   :  { %v871_v17 = vpop.xlane.xlu0 %870 }
 0x3c6   :  { %vm872_vm10 = vcmp.eq.f32.partialorder %v6713_v34, %v871_v17 }
 0x3c7   :  { %v885_v27 = vpop.xlane.xlu1 %884  ;;  %v873_v16 = vsel %vm872_vm10, %v868_v9, inf }
 0x3c8   :  { %874 = vmin.xlane.f32.xlu0 %v873_v16  ;;  %vm886_vm11 = vcmp.eq.f32.partialorder %v6721_v38, %v885_v27  ;;  %v850_v38 = vshll.u32 %v849_v36, 16  ;;  %v891_v50 = vcvt.f32.s32 %v885_v27 }
 0x3c9   :  { %v899_v3 = vpop.xlane.xlu0 %898  ;;  %v887_v4 = vsel %vm886_vm11, %v882_v56, inf }
 0x3ca   :  { %888 = vmin.xlane.f32.xlu1 %v887_v4  ;;  %vm900_vm12 = vcmp.eq.f32.partialorder %v6728_v45, %v899_v3  ;;  %v864_v45 = vshll.u32 %v863_v12, 16 }
 0x3cb   :  { %v913_v31 = vpop.xlane.xlu1 %912  ;;  %v901_v52 = vsel %vm900_vm12, %v896_v21, inf }
 0x3cc   :  { %902 = vmin.xlane.f32.xlu0 %v901_v52  ;;  %vm914_vm13 = vcmp.eq.f32.partialorder %v6732_v48, %v913_v31  ;;  %v877_v48 = vcvt.f32.s32 %v871_v17  ;;  %v905_v17 = vcvt.f32.s32 %v899_v3  ;;  %v919_v21 = vcvt.f32.s32 %v913_v31 }
 0x3cd   :  { %v915_v34 = vsel %vm914_vm13, %v910_v28, inf }
 0x3ce   :  { %916 = vmin.xlane.f32.xlu1 %v915_v34  ;;  %v878_v56 = vshll.u32 %v877_v48, 16  ;;  %v906_v36 = vshll.u32 %v905_v17, 16 }
 0x44d   :  { %v847_v42 = vpop.xlane.xlu0 %846  ;;  %v6788_v37 = vpop.f32.mrb[24].mxu0 }
 0x44e   :  { %v848_v59 = vcvt.f32.s32 %v847_v42  ;;  %v6790_v39 = vpop.f32.mrb[25].mxu0 }
 0x44f   :  { %v861_v51 = vpop.xlane.xlu1 %860  ;;  %v6792_v55 = vpop.f32.mrb[26].mxu0 }
 0x450   :  { %v851_v5 = vadd.s32 %v850_v38, %v848_v59  ;;  %v862_v1 = vcvt.f32.s32 %v861_v51  ;;  %v6794_v60 = vpop.f32.mrb[27].mxu0  ;;  %v920_v51 = vshll.u32 %v919_v21, 16 }
 0x452   :  { %v865_v22 = vadd.s32 %v864_v45, %v862_v1  ;;  %vm922_vm14 = vcmp.eq.s32.totalorder %v6460_v41, %v851_v5 }
 0x453   :  { %v6798_v43 = vsel %vm922_vm14, 1e+30, %v6573_v63 }
 0x454   :  { %1099 = vmin.xlane.f32.xlu0 %v6798_v43  ;;  %vm923_vm15 = vcmp.eq.s32.totalorder %v6460_v41, %v865_v22 }
 0x455   :  { %v875_v9 = vpop.xlane.xlu0 %874  ;;  %v6802_v15 = vpop.f32.mrb[28].mxu0  ;;  %v6805_v16 = vsel %vm923_vm15, 1e+30, %v6578_v19  ;;  %vm5088_vm0 = vmpackc.low %vm923_vm15, %vm922_vm14  ;;  %v892_v19 = vshll.u32 %v891_v50, 16 }
 0x456   :  { %v876_v20 = vcvt.f32.s32 %v875_v9  ;;  %1101 = vmin.xlane.f32.xlu1 %v6805_v16  ;;  %v6808_v4 = vpop.f32.mrb[29].mxu0  ;;  %5628 = vmatmul.mubr.msk.bf16.vlgmr.msra.gmra.mrb[28].mxu1 %vm5088_vm0, %v8989_v30 }
 0x457   :  { %v889_v63 = vpop.xlane.xlu1 %888  ;;  %v6811_v27 = vpop.f32.mrb[30].mxu0  ;;  %5631 = vmatprep.mubr.msk.bf16.mxu1 %vm6275_vm1, %v8987_v2  ;;  %5640 = vmatpush3.bf16.msra.mxu1 %v6529_v11 }
 0x458   :  { %v879_v52 = vadd.s32 %v878_v56, %v876_v20  ;;  %v890_v28 = vcvt.f32.s32 %v889_v63  ;;  %v6816_v3 = vpop.f32.mrb[31].mxu0  ;;  %5641 = vmatprep.subr.bf16.mxu1 %v8987_v2 }
 0x459   :  { %v903_v34 = vpop.xlane.xlu0 %902 }
 0x45a   :  { %v893_v12 = vadd.s32 %v892_v19, %v890_v28  ;;  %v904_v42 = vcvt.f32.s32 %v903_v34  ;;  %vm924_vm2 = vcmp.eq.s32.totalorder %v6460_v41, %v879_v52 }
 0x45b   :  { %v917_v38 = vpop.xlane.xlu1 %916  ;;  %v6821_v59 = vsel %vm924_vm2, 1e+30, %v6588_v44  ;;  %5642 = vmatpush3.bf16.msra.mxu1 %v6527_v10 }
 0x45c   :  { %v907_v31 = vadd.s32 %v906_v36, %v904_v42  ;;  %v918_v45 = vcvt.f32.s32 %v917_v38  ;;  %1103 = vmin.xlane.f32.xlu0 %v6821_v59  ;;  %vm925_vm3 = vcmp.eq.s32.totalorder %v6460_v41, %v893_v12  ;;  %5643 = vmatprep.subr.bf16.mxu1 %v8987_v2 }
 0x45d   :  { %v6827_v5 = vpop.f32.mrb[32].mxu0  ;;  %v6830_v1 = vsel %vm925_vm3, 1e+30, %v6595_v46  ;;  %vm5090_vm4 = vmpackc.low %vm925_vm3, %vm924_vm2 }
 0x45e   :  { %v921_v48 = vadd.s32 %v920_v51, %v918_v45  ;;  %1105 = vmin.xlane.f32.xlu1 %v6830_v1  ;;  %v6833_v44 = vpop.f32.mrb[33].mxu0  ;;  %5632 = vmatmul.mubr.msk.bf16.gmra.mrb[32].mxu1 %vm5090_vm4, %v8989_v30  ;;  %vm926_vm5 = vcmp.eq.s32.totalorder %v6460_v41, %v907_v31 }
 0x45f   :  { %v6837_v22 = vpop.f32.mrb[34].mxu0  ;;  %v6840_v50 = vsel %vm926_vm5, 1e+30, %v6601_v24  ;;  %5635 = vmatprep.mubr.msk.bf16.mxu1 %vm6275_vm1, %v8987_v2  ;;  %5644 = vmatpush3.bf16.msra.mxu1 %v6537_v18 }
 0x460   :  { %9038 = vst [vmem:[#allocation11_spill] sm:$0xff] %v6837_v22  ;;  %1107 = vmin.xlane.f32.xlu0 %v6840_v50  ;;  %v6846_v46 = vpop.f32.mrb[35].mxu0  ;;  %vm927_vm6 = vcmp.eq.s32.totalorder %v6460_v41, %v921_v48  ;;  %5645 = vmatprep.subr.bf16.mxu1 %v8987_v2 }
 0x461   :  { %9039 = vst [vmem:[#allocation12_spill] sm:$0xff] %v6846_v46  ;;  %v6851_v9 = vsel %vm927_vm6, 1e+30, %v6610_v26  ;;  %vm5092_vm8 = vmpackc.low %vm927_vm6, %vm926_vm5 }
 0x462   :  { %1109 = vmin.xlane.f32.xlu1 %v6851_v9 }
 0x463   :  { %5646 = vmatpush3.bf16.msra.mxu1 %v6534_v14 }
 0x464   :  { %5647 = vmatprep.subr.bf16.mxu1 %v8987_v2 }
 0x466   :  { %5636 = vmatmul.mubr.msk.bf16.gmra.mrb[36].mxu1 %vm5092_vm8, %v8989_v30 }
 0x467   :  { %5648 = vmatpush3.bf16.msra.mxu1 %v6545_v29  ;;  %5655 = vmatprep.mubr.msk.bf16.mxu1 %vm6275_vm1, %v8987_v2 }
 0x468   :  { %5649 = vmatprep.subr.bf16.mxu1 %v8987_v2 }
 0x46b   :  { %5650 = vmatpush3.bf16.msra.mxu1 %v6542_v23  ;;  %v9040_v23 = vmov 0  }
 0x46c   :  { %5651 = vmatprep.subr.bf16.mxu1 %v8987_v2 }
 0x46f   :  { %5652 = vmatpush3.bf16.msra.mxu1 %v6553_v35 }
 0x470   :  { %5653 = vmatprep.subr.bf16.mxu1 %v8987_v2 }
 0x473   :  { %5654 = vmatpush3.bf16.msra.mxu1 %v6550_v33 }
 0x474   :  { %5667 = vmatprep.subr.bf16.mxu1 %v8987_v2 }
 0x4e1   :  { %v1100_v24 = vpop.xlane.xlu0 %1099 }
 0x4e2   :  { %vm1111_vm9 = vcmp.eq.f32.partialorder %v6798_v43, %v1100_v24 }
 0x4e3   :  { %v6869_v26 = vsel %vm1111_vm9, %v6460_v41, 128  ;;  %v1102_v56 = vpop.xlane.xlu1 %1101 }
 0x4e4   :  { %vm1112_vm10 = vcmp.eq.f32.partialorder %v6805_v16, %v1102_v56  ;;  %v1124_v17 = vshra.s32 %v6869_v26, 16 }
 0x4e5   :  { %v6874_v20 = vsel %vm1112_vm10, %v6460_v41, 128 }
 0x4e6   :  { %v6876_v63 = vcvt.s32.f32 %v1124_v17  ;;  %v1138_v19 = vshra.s32 %v6874_v20, 16 }
 0x4e8   :  { %1127 = vmin.xlane.f32.xlu0 %v6876_v63  ;;  %v6880_v21 = vcvt.s32.f32 %v1138_v19 }
 0x4e9   :  { %v1104_v52 = vpop.xlane.xlu0 %1103 }
 0x4ea   :  { %vm1113_vm11 = vcmp.eq.f32.partialorder %v6821_v59, %v1104_v52  ;;  %1141 = vmin.xlane.f32.xlu1 %v6880_v21 }
 0x4eb   :  { %v6885_v28 = vsel %vm1113_vm11, %v6460_v41, 128  ;;  %v1106_v34 = vpop.xlane.xlu1 %1105 }
 0x4ec   :  { %vm1114_vm12 = vcmp.eq.f32.partialorder %v6830_v1, %v1106_v34  ;;  %v1152_v36 = vshra.s32 %v6885_v28, 16 }
 0x4ed   :  { %v6890_v12 = vsel %vm1114_vm12, %v6460_v41, 128  ;;  %v1108_v42 = vpop.xlane.xlu0 %1107 }
 0x4ee   :  { %vm1115_vm13 = vcmp.eq.f32.partialorder %v6840_v50, %v1108_v42  ;;  %v6893_v38 = vcvt.s32.f32 %v1152_v36  ;;  %v1166_v51 = vshra.s32 %v6890_v12, 16 }
 0x4ef   :  { %v6897_v31 = vsel %vm1115_vm13, %v6460_v41, 128  ;;  %v1110_v45 = vpop.xlane.xlu1 %1109 }
 0x4f0   :  { %vm1116_vm14 = vcmp.eq.f32.partialorder %v6851_v9, %v1110_v45  ;;  %1155 = vmin.xlane.f32.xlu0 %v6893_v38  ;;  %v6901_v48 = vcvt.s32.f32 %v1166_v51  ;;  %v1180_v24 = vshra.s32 %v6897_v31, 16 }
 0x4f1   :  { %v6905_v56 = vsel %vm1116_vm14, %v6460_v41, 128 }
 0x4f2   :  { %1169 = vmin.xlane.f32.xlu1 %v6901_v48  ;;  %v6908_v17 = vcvt.s32.f32 %v1180_v24  ;;  %v1194_v19 = vshra.s32 %v6905_v56, 16 }
 0x4f4   :  { %1183 = vmin.xlane.f32.xlu0 %v6908_v17  ;;  %v6912_v52 = vcvt.s32.f32 %v1194_v19 }
 0x4f6   :  { %1197 = vmin.xlane.f32.xlu1 %v6912_v52 }
 0x529   :  { %v983_v34 = vpop.f32.mrb[28].mxu1 }
 0x52a   :  { %v984_v36 = vadd.f32 %v983_v34, %v6740_v61  ;;  %v5629_v42 = vpop.f32.mrb[29].mxu1 }
 0x52b   :  { %v986_v51 = vpop.f32.mrb[30].mxu1 }
 0x52c   :  { %v987_v45 = vadd.f32 %v986_v51, %v6742_v54  ;;  %v5630_v40 = vpop.f32.mrb[31].mxu1  ;;  %v1006_v2 = vmax.f32 %v984_v36, 0.0 }
 0x52e   :  { %v1007_v30 = vmax.f32 %v987_v45, 0.0 }
 0x530   :  { %v1012_v24 = vpack.c.bf16 %v1007_v30, %v1006_v2 }
 0x531   :  { %v991_v0 = vpop.f32.mrb[32].mxu1 }
 0x532   :  { %v992_v33 = vadd.f32 %v991_v0, %v6748_v25  ;;  %v5633_v35 = vpop.f32.mrb[33].mxu1  ;;  %5094 = vmatmul.mubr.msk.bf16.vlgmr.msra.gmra.mrb[36].mxu0 %vm741_vm7, %v1012_v24  ;;  %v1123_v24 = vand.u32 65535, %v6869_v26 }
 0x533   :  { %v994_v19 = vpop.f32.mrb[34].mxu1  ;;  %1066 = vmatprep.mubr.bf16.mxu0 %v9040_v23  ;;  %1310 = vmatpush1.bf16.msra.mxu0 %v6638_v53 }
 0x534   :  { %v995_v34 = vadd.f32 %v994_v19, %v6750_v32  ;;  %v5634_v42 = vpop.f32.mrb[35].mxu1  ;;  %1311 = vmatprep.subr.bf16.mxu0 %v6643_v57  ;;  %v1008_v40 = vmax.f32 %v992_v33, 0.0  ;;  %v1137_v19 = vand.u32 65535, %v6874_v20  ;;  %v1179_v20 = vand.u32 65535, %v6897_v31 }
 0x535   :  { %v1125_v42 = vcvt.s32.f32 %v1123_v24 }
 0x536   :  { %v1009_v36 = vmax.f32 %v995_v34, 0.0 }
 0x537   :  { %1312 = vmatpush1.bf16.msra.mxu0 %v6651_v49 }
 0x538   :  { %v1013_v2 = vpack.c.bf16 %v1009_v36, %v1008_v40  ;;  %1313 = vmatprep.subr.bf16.mxu0 %v6665_v6 }
 0x539   :  { %v999_v0 = vpop.f32.mrb[36].mxu1 }
 0x53a   :  { %v1000_v35 = vadd.f32 %v999_v0, %v6760_v58  ;;  %v5637_v30 = vpop.f32.mrb[37].mxu1  ;;  %5095 = vmatmul.mubr.msk.bf16.gmra.mrb[40].mxu0 %vm741_vm7, %v1013_v2  ;;  %v1139_v2 = vcvt.s32.f32 %v1137_v19 }
 0x53b   :  { %v1002_v51 = vpop.f32.mrb[38].mxu1  ;;  %1076 = vmatprep.mubr.bf16.mxu0 %v9040_v23  ;;  %1314 = vmatpush1.bf16.msra.mxu0 %v6670_v62  ;;  %v1165_v30 = vand.u32 65535, %v6890_v12 }
 0x53c   :  { %v1003_v53 = vadd.f32 %v1002_v51, %v6763_v13  ;;  %v5638_v33 = vpop.f32.mrb[39].mxu1  ;;  %1315 = vmatprep.subr.bf16.mxu0 %v6677_v7  ;;  %v1010_v57 = vmax.f32 %v1000_v35, 0.0  ;;  %v1151_v35 = vand.u32 65535, %v6885_v28  ;;  %v1181_v28 = vcvt.s32.f32 %v1179_v20 }
 0x53d   :  { %v1167_v33 = vcvt.s32.f32 %v1165_v30 }
 0x53e   :  { %v1011_v49 = vmax.f32 %v1003_v53, 0.0  ;;  %v1153_v26 = vcvt.s32.f32 %v1151_v35 }
 0x53f   :  { %1316 = vmatpush1.bf16.msra.mxu0 %v6682_v8 }
 0x540   :  { %v1014_v45 = vpack.c.bf16 %v1011_v49, %v1010_v57  ;;  %1594 = vmatprep.subr.bf16.mxu0 %v6633_v47  ;;  %v1193_v57 = vand.u32 65535, %v6905_v56 }
 0x542   :  { %5096 = vmatmul.mubr.msk.bf16.gmra.mrb[44].mxu0 %vm741_vm7, %v1014_v45  ;;  %v1195_v31 = vcvt.s32.f32 %v1193_v57 }
 0x543   :  { %1341 = vmatprep.mubr.bf16.mxu0 %v9040_v23 }
 0x575   :  { %v1128_v34 = vpop.xlane.xlu0 %1127 }
 0x576   :  { %vm1129_vm15 = vcmp.eq.f32.partialorder %v6876_v63, %v1128_v34  ;;  %v1134_v56 = vcvt.f32.s32 %v1128_v34 }
 0x577   :  { %v1142_v40 = vpop.xlane.xlu1 %1141  ;;  %v1130_v36 = vsel %vm1129_vm15, %v1125_v42, inf }
 0x578   :  { %1131 = vmin.xlane.f32.xlu0 %v1130_v36  ;;  %vm1143_vm0 = vcmp.eq.f32.partialorder %v6880_v21, %v1142_v40  ;;  %v1148_v24 = vcvt.f32.s32 %v1142_v40  ;;  %v1135_v42 = vshll.u32 %v1134_v56, 16 }
 0x579   :  { %v1144_v0 = vsel %vm1143_vm0, %v1139_v2, inf }
 0x57a   :  { %1145 = vmin.xlane.f32.xlu1 %v1144_v0 }
 0x57d   :  { %v1156_v51 = vpop.xlane.xlu0 %1155 }
 0x57e   :  { %vm1157_vm2 = vcmp.eq.f32.partialorder %v6893_v38, %v1156_v51 }
 0x57f   :  { %v1170_v53 = vpop.xlane.xlu1 %1169  ;;  %v1158_v63 = vsel %vm1157_vm2, %v1153_v26, inf }
 0x580   :  { %1159 = vmin.xlane.f32.xlu0 %v1158_v63  ;;  %vm1171_vm3 = vcmp.eq.f32.partialorder %v6901_v48, %v1170_v53 }
 0x581   :  { %v1184_v21 = vpop.xlane.xlu0 %1183  ;;  %v1172_v49 = vsel %vm1171_vm3, %v1167_v33, inf  ;;  %v1162_v33 = vcvt.f32.s32 %v1156_v51 }
 0x582   :  { %1173 = vmin.xlane.f32.xlu1 %v1172_v49  ;;  %vm1185_vm4 = vcmp.eq.f32.partialorder %v6908_v17, %v1184_v21  ;;  %v1176_v49 = vcvt.f32.s32 %v1170_v53  ;;  %v1190_v51 = vcvt.f32.s32 %v1184_v21 }
 0x583   :  { %v6946_v12 = vpop.xlane.xlu1 %1197  ;;  %v1186_v45 = vsel %vm1185_vm4, %v1181_v28, inf  ;;  %v1163_v56 = vshll.u32 %v1162_v33, 16 }
 0x584   :  { %1187 = vmin.xlane.f32.xlu0 %v1186_v45  ;;  %vm1199_vm5 = vcmp.eq.f32.partialorder %v6912_v52, %v6946_v12  ;;  %v1149_v52 = vshll.u32 %v1148_v24, 16  ;;  %v1204_v21 = vcvt.f32.s32 %v6946_v12 }
 0x585   :  { %v1200_v38 = vsel %vm1199_vm5, %v1195_v31, inf }
 0x586   :  { %1201 = vmin.xlane.f32.xlu1 %v1200_v38 }
 0x605   :  { %v1132_v19 = vpop.xlane.xlu0 %1131  ;;  %v6950_v48 = vpop.f32.mrb[36].mxu0 }
 0x606   :  { %v1133_v36 = vcvt.f32.s32 %v1132_v19  ;;  %v6954_v2 = vpop.f32.mrb[37].mxu0  ;;  %v9041_v19 = vmov 1.0|1.0  }
 0x607   :  { %v1146_v35 = vpop.xlane.xlu1 %1145  ;;  %v6958_v30 = vpop.f32.mrb[38].mxu0 }
 0x608   :  { %v1136_v26 = vadd.s32 %v1135_v42, %v1133_v36  ;;  %v1147_v34 = vcvt.f32.s32 %v1146_v35  ;;  %v6962_v20 = vpop.f32.mrb[39].mxu0  ;;  %v1177_v42 = vshll.u32 %v1176_v49, 16  ;;  %v1191_v36 = vshll.u32 %v1190_v51, 16 }
 0x60a   :  { %v1150_v57 = vadd.s32 %v1149_v52, %v1147_v34  ;;  %vm1207_vm6 = vcmp.eq.s32.totalorder %v6460_v41, %v1136_v26  ;;  %v9042_v52 = vmov 0.0  }
 0x60b   :  { %v6968_v28 = vsel %vm1207_vm6, 1e+30, %v6798_v43 }
 0x60c   :  { %1384 = vmin.xlane.f32.xlu0 %v6968_v28  ;;  %vm1208_vm8 = vcmp.eq.s32.totalorder %v6460_v41, %v1150_v57 }
 0x60d   :  { %v1160_v45 = vpop.xlane.xlu0 %1159  ;;  %v6972_v31 = vpop.f32.mrb[40].mxu0  ;;  %v6975_v38 = vsel %vm1208_vm8, 1e+30, %v6805_v16  ;;  %vm5103_vm9 = vmpackc.low %vm1208_vm8, %vm1207_vm6 }
 0x60e   :  { %v1161_v24 = vcvt.f32.s32 %v1160_v45  ;;  %1386 = vmin.xlane.f32.xlu1 %v6975_v38  ;;  %v6980_v43 = vpop.f32.mrb[41].mxu0  ;;  %5656 = vmatmul.mubr.msk.bf16.vlgmr.msra.gmra.mrb[40].mxu1 %vm5103_vm9, %v9041_v19 }
 0x60f   :  { %v1174_v35 = vpop.xlane.xlu1 %1173  ;;  %v6985_v16 = vpop.f32.mrb[42].mxu0  ;;  %5659 = vmatprep.mubr.msk.bf16.mxu1 %vm6275_vm1, %v9042_v52  ;;  %5668 = vmatpush3.bf16.msra.mxu1 %v6529_v11 }
 0x610   :  { %v1164_v26 = vadd.s32 %v1163_v56, %v1161_v24  ;;  %v1175_v34 = vcvt.f32.s32 %v1174_v35  ;;  %v6993_v57 = vpop.f32.mrb[43].mxu0  ;;  %5669 = vmatprep.subr.bf16.mxu1 %v9042_v52  ;;  %v1205_v56 = vshll.u32 %v1204_v21, 16 }
 0x611   :  { %v1188_v45 = vpop.xlane.xlu0 %1187 }
 0x612   :  { %v1178_v53 = vadd.s32 %v1177_v42, %v1175_v34  ;;  %v1189_v63 = vcvt.f32.s32 %v1188_v45  ;;  %vm1209_vm10 = vcmp.eq.s32.totalorder %v6460_v41, %v1164_v26  ;;  %v9047_v45 = vld [vmem:[#allocation10_spill] sm:$0xff] }
 0x613   :  { %v1202_v40 = vpop.xlane.xlu1 %1201  ;;  %v7000_v12 = vsel %vm1209_vm10, 1e+30, %v6821_v59  ;;  %5670 = vmatpush3.bf16.msra.mxu1 %v6527_v10 }
 0x614   :  { %v1192_v24 = vadd.s32 %v1191_v36, %v1189_v63  ;;  %v1203_v35 = vcvt.f32.s32 %v1202_v40  ;;  %1388 = vmin.xlane.f32.xlu0 %v7000_v12  ;;  %vm1210_vm11 = vcmp.eq.s32.totalorder %v6460_v41, %v1178_v53  ;;  %5671 = vmatprep.subr.bf16.mxu1 %v9042_v52 }
 0x615   :  { %v7006_v51 = vpop.f32.mrb[44].mxu0  ;;  %v7009_v42 = vsel %vm1210_vm11, 1e+30, %v6830_v1  ;;  %vm5105_vm12 = vmpackc.low %vm1210_vm11, %vm1209_vm10 }
 0x616   :  { %v1206_v26 = vadd.s32 %v1205_v56, %v1203_v35  ;;  %1390 = vmin.xlane.f32.xlu1 %v7009_v42  ;;  %v7014_v63 = vpop.f32.mrb[45].mxu0  ;;  %5660 = vmatmul.mubr.msk.bf16.gmra.mrb[44].mxu1 %vm5105_vm12, %v9041_v19  ;;  %vm1211_vm13 = vcmp.eq.s32.totalorder %v6460_v41, %v1192_v24  ;;  %v9048_v56 = vld [vmem:[#allocation9_spill] sm:$0xff] }
 0x617   :  { %v7020_v53 = vpop.f32.mrb[46].mxu0  ;;  %v7025_v1 = vsel %vm1211_vm13, 1e+30, %v6840_v50  ;;  %5663 = vmatprep.mubr.msk.bf16.mxu1 %vm6275_vm1, %v9042_v52  ;;  %5672 = vmatpush3.bf16.msra.mxu1 %v6537_v18 }
 0x618   :  { %9043 = vst [vmem:[#allocation13_spill] sm:$0xff] %v7020_v53  ;;  %1392 = vmin.xlane.f32.xlu0 %v7025_v1  ;;  %v7033_v21 = vpop.f32.mrb[47].mxu0  ;;  %vm1212_vm14 = vcmp.eq.s32.totalorder %v6460_v41, %v1206_v26  ;;  %5673 = vmatprep.subr.bf16.mxu1 %v9042_v52 }
 0x619   :  { %9044 = vst [vmem:[#allocation14_spill] sm:$0xff] %v7033_v21  ;;  %v7040_v34 = vsel %vm1212_vm14, 1e+30, %v6851_v9  ;;  %vm5107_vm15 = vmpackc.low %vm1212_vm14, %vm1211_vm13  ;;  %v9046_v9 = vld [vmem:[#allocation7_spill] sm:$0xff] }
 0x61a   :  { %9045 = vst [vmem:[#allocation15_spill] sm:$0xff] %v7040_v34  ;;  %1394 = vmin.xlane.f32.xlu1 %v7040_v34 }
 0x61b   :  { %5674 = vmatpush3.bf16.msra.mxu1 %v6534_v14 }
 0x61c   :  { %5675 = vmatprep.subr.bf16.mxu1 %v9042_v52 }
 0x61e   :  { %5664 = vmatmul.mubr.msk.bf16.gmra.mrb[48].mxu1 %vm5107_vm15, %v9041_v19 }
 0x61f   :  { %5676 = vmatpush3.bf16.msra.mxu1 %v6545_v29  ;;  %5683 = vmatprep.mubr.msk.bf16.mxu1 %vm6275_vm1, %v9042_v52 }
 0x620   :  { %5677 = vmatprep.subr.bf16.mxu1 %v9042_v52 }
 0x623   :  { %5678 = vmatpush3.bf16.msra.mxu1 %v9046_v9 }
 0x624   :  { %5679 = vmatprep.subr.bf16.mxu1 %v9042_v52 }
 0x627   :  { %5680 = vmatpush3.bf16.msra.mxu1 %v9047_v45 }
 0x628   :  { %5681 = vmatprep.subr.bf16.mxu1 %v9042_v52 }
 0x62b   :  { %5682 = vmatpush3.bf16.msra.mxu1 %v9048_v56 }
 0x62c   :  { %1879 = vmatprep.subr.bf16.mxu1 %v6633_v47 }
 0x699   :  { %v1385_v24 = vpop.xlane.xlu0 %1384 }
 0x69a   :  { %vm1396_vm0 = vcmp.eq.f32.partialorder %v6968_v28, %v1385_v24 }
 0x69b   :  { %v7060_v35 = vsel %vm1396_vm0, %v6460_v41, 128  ;;  %v1387_v26 = vpop.xlane.xlu1 %1386 }
 0x69c   :  { %vm1397_vm2 = vcmp.eq.f32.partialorder %v6975_v38, %v1387_v26  ;;  %v1409_v50 = vshra.s32 %v7060_v35, 16 }
 0x69d   :  { %v7065_v36 = vsel %vm1397_vm2, %v6460_v41, 128 }
 0x69e   :  { %v7067_v40 = vcvt.s32.f32 %v1409_v50  ;;  %v1423_v59 = vshra.s32 %v7065_v36, 16 }
 0x6a0   :  { %1412 = vmin.xlane.f32.xlu0 %v7067_v40  ;;  %v7071_v47 = vcvt.s32.f32 %v1423_v59 }
 0x6a1   :  { %v1389_v24 = vpop.xlane.xlu0 %1388 }
 0x6a2   :  { %vm1398_vm3 = vcmp.eq.f32.partialorder %v7000_v12, %v1389_v24  ;;  %1426 = vmin.xlane.f32.xlu1 %v7071_v47 }
 0x6a3   :  { %v7076_v26 = vsel %vm1398_vm3, %v6460_v41, 128  ;;  %v1391_v49 = vpop.xlane.xlu1 %1390 }
 0x6a4   :  { %vm1399_vm4 = vcmp.eq.f32.partialorder %v7009_v42, %v1391_v49  ;;  %v1437_v50 = vshra.s32 %v7076_v26, 16 }
 0x6a5   :  { %v7081_v33 = vsel %vm1399_vm4, %v6460_v41, 128  ;;  %v1393_v0 = vpop.xlane.xlu0 %1392 }
 0x6a6   :  { %vm1400_vm5 = vcmp.eq.f32.partialorder %v7025_v1, %v1393_v0  ;;  %v7084_v59 = vcvt.s32.f32 %v1437_v50  ;;  %v1451_v24 = vshra.s32 %v7081_v33, 16 }
 0x6a7   :  { %v7088_v17 = vsel %vm1400_vm5, %v6460_v41, 128  ;;  %v1395_v56 = vpop.xlane.xlu1 %1394 }
 0x6a8   :  { %vm1401_vm6 = vcmp.eq.f32.partialorder %v7040_v34, %v1395_v56  ;;  %1440 = vmin.xlane.f32.xlu0 %v7084_v59  ;;  %v7092_v49 = vcvt.s32.f32 %v1451_v24  ;;  %v1465_v45 = vshra.s32 %v7088_v17, 16 }
 0x6a9   :  { %v7096_v9 = vsel %vm1401_vm6, %v6460_v41, 128 }
 0x6aa   :  { %1454 = vmin.xlane.f32.xlu1 %v7092_v49  ;;  %v7099_v0 = vcvt.s32.f32 %v1465_v45  ;;  %v1479_v50 = vshra.s32 %v7096_v9, 16 }
 0x6ac   :  { %1468 = vmin.xlane.f32.xlu0 %v7099_v0  ;;  %v7103_v29 = vcvt.s32.f32 %v1479_v50 }
 0x6ae   :  { %1482 = vmin.xlane.f32.xlu1 %v7103_v29 }
 0x6e1   :  { %v1268_v56 = vpop.f32.mrb[40].mxu1 }
 0x6e2   :  { %v1269_v24 = vadd.f32 %v1268_v56, %v6740_v61  ;;  %v5657_v14 = vpop.f32.mrb[41].mxu1 }
 0x6e3   :  { %v1271_v18 = vpop.f32.mrb[42].mxu1  ;;  %v7114_v14 = vld [vmem:[%s8983_s6] ss:$12 sps:$4 sm:$0xff]  }
 0x6e4   :  { %v1272_v10 = vadd.f32 %v1271_v18, %v6742_v54  ;;  %v5658_v11 = vpop.f32.mrb[43].mxu1  ;;  %v1291_v34 = vmax.f32 %v1269_v24, 0.0  ;;  %v7121_v18 = vld [vmem:[%s8983_s6 + $0x1c] ss:$12 sps:$4 sm:$0xff]  }
 0x6e6   :  { %v1292_v21 = vmax.f32 %v1272_v10, 0.0 }
 0x6e8   :  { %v1297_v45 = vpack.c.bf16 %v1292_v21, %v1291_v34  ;;  %v7127_v21 = vld [vmem:[%s8983_s6 + $0x18] ss:$12 sps:$4 sm:$0xff]  }
 0x6e9   :  { %v1276_v46 = vpop.f32.mrb[44].mxu1 }
 0x6ea   :  { %v1277_v53 = vadd.f32 %v1276_v46, %v6748_v25  ;;  %v5661_v22 = vpop.f32.mrb[45].mxu1  ;;  %5109 = vmatmul.mubr.msk.bf16.vlgmr.msra.gmra.mrb[48].mxu0 %vm741_vm7, %v1297_v45 }
 0x6eb   :  { %v1279_v50 = vpop.f32.mrb[46].mxu1  ;;  %1351 = vmatprep.mubr.bf16.mxu0 %v9040_v23  ;;  %1595 = vmatpush1.bf16.msra.mxu0 %v7114_v14 }
 0x6ec   :  { %v1280_v11 = vadd.f32 %v1279_v50, %v6750_v32  ;;  %v5662_v10 = vpop.f32.mrb[47].mxu1  ;;  %1596 = vmatprep.subr.bf16.mxu0 %v7121_v18  ;;  %v1293_v22 = vmax.f32 %v1277_v53, 0.0 }
 0x6ee   :  { %v1294_v46 = vmax.f32 %v1280_v11, 0.0 }
 0x6ef   :  { %1597 = vmatpush1.bf16.msra.mxu0 %v7127_v21 }
 0x6f0   :  { %v1298_v34 = vpack.c.bf16 %v1294_v46, %v1293_v22  ;;  %1598 = vmatprep.subr.bf16.mxu0 %v6665_v6  ;;  %v1408_v46 = vand.u32 65535, %v7060_v35 }
 0x6f1   :  { %v1284_v56 = vpop.f32.mrb[48].mxu1 }
 0x6f2   :  { %v1285_v24 = vadd.f32 %v1284_v56, %v6760_v58  ;;  %v5665_v45 = vpop.f32.mrb[49].mxu1  ;;  %5110 = vmatmul.mubr.msk.bf16.gmra.mrb[52].mxu0 %vm741_vm7, %v1298_v34  ;;  %v1410_v56 = vcvt.s32.f32 %v1408_v46 }
 0x6f3   :  { %v1287_v50 = vpop.f32.mrb[50].mxu1  ;;  %1361 = vmatprep.mubr.bf16.mxu0 %v9040_v23  ;;  %1599 = vmatpush1.bf16.msra.mxu0 %v6670_v62  ;;  %v1422_v62 = vand.u32 65535, %v7065_v36  ;;  %v1464_v36 = vand.u32 65535, %v7088_v17 }
 0x6f4   :  { %v1288_v53 = vadd.f32 %v1287_v50, %v6763_v13  ;;  %v5666_v11 = vpop.f32.mrb[51].mxu1  ;;  %1600 = vmatprep.subr.bf16.mxu0 %v6677_v7  ;;  %v1295_v10 = vmax.f32 %v1285_v24, 0.0  ;;  %v1436_v50 = vand.u32 65535, %v7076_v26 }
 0x6f5   :  { %v1424_v45 = vcvt.s32.f32 %v1422_v62  ;;  %v1466_v26 = vcvt.s32.f32 %v1464_v36 }
 0x6f6   :  { %v1296_v22 = vmax.f32 %v1288_v53, 0.0  ;;  %v1450_v53 = vand.u32 65535, %v7081_v33  ;;  %v1438_v35 = vcvt.s32.f32 %v1436_v50  ;;  %v9049_v50 = vmax.f32 %v6788_v37, %v6950_v48 }
 0x6f7   :  { %1601 = vmatpush1.bf16.msra.mxu0 %v6682_v8  ;;  %v9052_v37 = vmax.f32 %v6794_v60, %v6962_v20 }
 0x6f8   :  { %v1299_v6 = vpack.c.bf16 %v1296_v22, %v1295_v10  ;;  %5695 = vmatprep.subr.bf16.mxu0 %v9042_v52  ;;  %v1452_v22 = vcvt.s32.f32 %v1450_v53 }
 0x6fa   :  { %5111 = vmatmul.mubr.msk.bf16.gmra.mrb[56].mxu0 %vm741_vm7, %v1299_v6  ;;  %v1478_v6 = vand.u32 65535, %v7096_v9 }
 0x6fb   :  { %1626 = vmatprep.mubr.bf16.mxu0 %v9040_v23 }
 0x6fc   :  { %v1480_v17 = vcvt.s32.f32 %v1478_v6  ;;  %v9051_v6 = vmax.f32 %v6792_v55, %v6958_v30 }
 0x72d   :  { %v1413_v34 = vpop.xlane.xlu0 %1412 }
 0x72e   :  { %vm1414_vm8 = vcmp.eq.f32.partialorder %v7067_v40, %v1413_v34  ;;  %v1419_v9 = vcvt.f32.s32 %v1413_v34 }
 0x72f   :  { %v1427_v7 = vpop.xlane.xlu1 %1426  ;;  %v1415_v24 = vsel %vm1414_vm8, %v1410_v56, inf }
 0x730   :  { %1416 = vmin.xlane.f32.xlu0 %v1415_v24  ;;  %vm1428_vm9 = vcmp.eq.f32.partialorder %v7071_v47, %v1427_v7  ;;  %v1433_v56 = vcvt.f32.s32 %v1427_v7 }
 0x731   :  { %v1429_v8 = vsel %vm1428_vm9, %v1424_v45, inf  ;;  %v1420_v45 = vshll.u32 %v1419_v9, 16  ;;  %v9053_v9 = vmax.f32 %v6802_v15, %v6972_v31 }
 0x732   :  { %1430 = vmin.xlane.f32.xlu1 %v1429_v8 }
 0x735   :  { %v1441_v11 = vpop.xlane.xlu0 %1440 }
 0x736   :  { %vm1442_vm10 = vcmp.eq.f32.partialorder %v7084_v59, %v1441_v11 }
 0x737   :  { %v1455_v10 = vpop.xlane.xlu1 %1454  ;;  %v1443_v40 = vsel %vm1442_vm10, %v1438_v35, inf  ;;  %v9050_v35 = vmax.f32 %v6790_v39, %v6954_v2 }
 0x738   :  { %1444 = vmin.xlane.f32.xlu0 %v1443_v40  ;;  %vm1456_vm11 = vcmp.eq.f32.partialorder %v7092_v49, %v1455_v10  ;;  %v1461_v2 = vcvt.f32.s32 %v1455_v10 }
 0x739   :  { %v1469_v47 = vpop.xlane.xlu0 %1468  ;;  %v1457_v46 = vsel %vm1456_vm11, %v1452_v22, inf  ;;  %v1434_v22 = vshll.u32 %v1433_v56, 16 }
 0x73a   :  { %1458 = vmin.xlane.f32.xlu1 %v1457_v46  ;;  %vm1470_vm12 = vcmp.eq.f32.partialorder %v7099_v0, %v1469_v47  ;;  %v1475_v20 = vcvt.f32.s32 %v1469_v47  ;;  %v1462_v56 = vshll.u32 %v1461_v2, 16 }
 0x73b   :  { %v7152_v33 = vpop.xlane.xlu1 %1482  ;;  %v1471_v62 = vsel %vm1470_vm12, %v1466_v26, inf }
 0x73c   :  { %1472 = vmin.xlane.f32.xlu0 %v1471_v62  ;;  %vm1484_vm13 = vcmp.eq.f32.partialorder %v7103_v29, %v7152_v33  ;;  %v1447_v62 = vcvt.f32.s32 %v1441_v11  ;;  %v1489_v15 = vcvt.f32.s32 %v7152_v33 }
 0x73d   :  { %v1485_v59 = vsel %vm1484_vm13, %v1480_v17, inf }
 0x73e   :  { %1486 = vmin.xlane.f32.xlu1 %v1485_v59  ;;  %v1448_v60 = vshll.u32 %v1447_v62, 16 }
 0x7bd   :  { %v1417_v24 = vpop.xlane.xlu0 %1416  ;;  %v1343_v49 = vpop.f32.mrb[48].mxu0 }
 0x7be   :  { %v1418_v8 = vcvt.f32.s32 %v1417_v24  ;;  %v7159_v0 = vmax.f32 %v9049_v50, %v1343_v49  ;;  %v1345_v53 = vpop.f32.mrb[49].mxu0  ;;  %v9054_v24 = vmax.f32 %v6808_v4, %v6980_v43  ;;  %v9056_v4 = vmax.f32 %v6816_v3, %v6993_v57  ;;  %v7222_v3 = vld [vmem:[%s8983_s6 + $0x34] ss:$12 sps:$4 sm:$0xff]  }
 0x7bf   :  { %v7164_v36 = vmax.f32 %v9050_v35, %v1345_v53  ;;  %v1431_v29 = vpop.xlane.xlu1 %1430  ;;  %v1347_v40 = vpop.f32.mrb[50].mxu0 }
 0x7c0   :  { %v1421_v34 = vadd.s32 %v1420_v45, %v1418_v8  ;;  %v1432_v7 = vcvt.f32.s32 %v1431_v29  ;;  %v7169_v46 = vmax.f32 %v9051_v6, %v1347_v40  ;;  %v1349_v26 = vpop.f32.mrb[51].mxu0  ;;  %v9055_v8 = vmax.f32 %v6811_v27, %v6985_v16 }
 0x7c1   :  { %v7174_v48 = vmax.f32 %v9052_v37, %v1349_v26  ;;  %v1476_v29 = vshll.u32 %v1475_v20, 16  ;;  %v1490_v27 = vshll.u32 %v1489_v15, 16  ;;  %v9057_v26 = vmax.f32 %v6827_v5, %v7006_v51  ;;  %v7251_v5 = vld [vmem:[%s8983_s6 + $0x30] ss:$12 sps:$4 sm:$0xff]  }
 0x7c2   :  { %v1435_v39 = vadd.s32 %v1434_v22, %v1432_v7  ;;  %vm1492_vm14 = vcmp.eq.s32.totalorder %v6460_v41, %v1421_v34  ;;  %9060 = vst [vmem:[#allocation17_spill] sm:$0xff] %v7251_v5  ;;  %v9061_v51 = vld [vmem:[#allocation11_spill] sm:$0xff]  ;;  %v9066_v20 = vld [vmem:[#allocation12_spill] sm:$0xff] }
 0x7c3   :  { %v7178_v17 = vsel %vm1492_vm14, 1e+30, %v6968_v28 }
 0x7c4   :  { %1669 = vmin.xlane.f32.xlu0 %v7178_v17  ;;  %vm1493_vm15 = vcmp.eq.s32.totalorder %v6460_v41, %v1435_v39  ;;  %v9058_v39 = vmax.f32 %v6833_v44, %v7014_v63  ;;  %v9062_v44 = vld [vmem:[#allocation13_spill] sm:$0xff] }
 0x7c5   :  { %v1445_v55 = vpop.xlane.xlu0 %1444  ;;  %v1353_v30 = vpop.f32.mrb[52].mxu0  ;;  %v7183_v59 = vsel %vm1493_vm15, 1e+30, %v6975_v38  ;;  %vm5118_vm0 = vmpackc.low %vm1493_vm15, %vm1492_vm14  ;;  %v9063_v63 = vmax.f32 %v9061_v51, %v9062_v44 }
 0x7c6   :  { %v1446_v11 = vcvt.f32.s32 %v1445_v55  ;;  %v7188_v10 = vmax.f32 %v9053_v9, %v1353_v30  ;;  %1671 = vmin.xlane.f32.xlu1 %v7183_v59  ;;  %v1355_v28 = vpop.f32.mrb[53].mxu0  ;;  %5684 = vmatmul.mubr.msk.bf16.vlgmr.msra.gmra.mrb[52].mxu1 %vm5118_vm0, %v9041_v19 }
 0x7c7   :  { %v7195_v38 = vmax.f32 %v9054_v24, %v1355_v28  ;;  %v1459_v49 = vpop.xlane.xlu1 %1458  ;;  %v1357_v45 = vpop.f32.mrb[54].mxu0  ;;  %5687 = vmatprep.mubr.msk.bf16.mxu1 %vm6275_vm1, %v9042_v52  ;;  %1880 = vmatpush1.bf16.msra.mxu1 %v7114_v14 }
 0x7c8   :  { %v1449_v31 = vadd.s32 %v1448_v60, %v1446_v11  ;;  %v1460_v47 = vcvt.f32.s32 %v1459_v49  ;;  %v7204_v50 = vmax.f32 %v9055_v8, %v1357_v45  ;;  %v1359_v53 = vpop.f32.mrb[55].mxu0  ;;  %1881 = vmatprep.subr.bf16.mxu1 %v7121_v18  ;;  %v9067_v11 = vld [vmem:[#allocation14_spill] sm:$0xff] }
 0x7c9   :  { %v7210_v43 = vmax.f32 %v9056_v4, %v1359_v53  ;;  %v1473_v35 = vpop.xlane.xlu0 %1472  ;;  %v9068_v9 = vmax.f32 %v9066_v20, %v9067_v11  ;;  %v7279_v49 = vld [vmem:[%s8983_s6 + $0x48] ss:$12 sps:$4 sm:$0xff]  }
 0x7ca   :  { %v1463_v40 = vadd.s32 %v1462_v56, %v1460_v47  ;;  %v1474_v22 = vcvt.f32.s32 %v1473_v35  ;;  %vm1494_vm2 = vcmp.eq.s32.totalorder %v6460_v41, %v1449_v31  ;;  %v9070_v56 = vld [vmem:[#allocation15_spill] sm:$0xff]  ;;  %9071 = vst [vmem:[#allocation14_spill] sm:$0xff] %v7279_v49 }
 0x7cb   :  { %v1487_v33 = vpop.xlane.xlu1 %1486  ;;  %v7214_v34 = vsel %vm1494_vm2, 1e+30, %v7000_v12  ;;  %1882 = vmatpush1.bf16.msra.mxu1 %v7127_v21 }
 0x7cc   :  { %v1477_v16 = vadd.s32 %v1476_v29, %v1474_v22  ;;  %v1488_v7 = vcvt.f32.s32 %v1487_v33  ;;  %1673 = vmin.xlane.f32.xlu0 %v7214_v34  ;;  %vm1495_vm3 = vcmp.eq.s32.totalorder %v6460_v41, %v1463_v40  ;;  %1883 = vmatprep.subr.bf16.mxu1 %v7222_v3 }
 0x7cd   :  { %v1363_v57 = vpop.f32.mrb[56].mxu0  ;;  %v7226_v12 = vsel %vm1495_vm3, 1e+30, %v7009_v42  ;;  %vm5120_vm4 = vmpackc.low %vm1495_vm3, %vm1494_vm2 }
 0x7ce   :  { %v1491_v6 = vadd.s32 %v1490_v27, %v1488_v7  ;;  %v7231_v37 = vmax.f32 %v9057_v26, %v1363_v57  ;;  %1675 = vmin.xlane.f32.xlu1 %v7226_v12  ;;  %v1365_v62 = vpop.f32.mrb[57].mxu0  ;;  %5688 = vmatmul.mubr.msk.bf16.gmra.mrb[56].mxu1 %vm5120_vm4, %v9041_v19  ;;  %vm1496_vm5 = vcmp.eq.s32.totalorder %v6460_v41, %v1477_v16 }
 0x7cf   :  { %v7239_v2 = vmax.f32 %v9058_v39, %v1365_v62  ;;  %v1367_v42 = vpop.f32.mrb[58].mxu0  ;;  %v7244_v55 = vsel %vm1496_vm5, 1e+30, %v7025_v1  ;;  %5691 = vmatprep.mubr.msk.bf16.mxu1 %vm6275_vm1, %v9042_v52  ;;  %1884 = vmatpush1.bf16.msra.mxu1 %v7251_v5  ;;  %v7264_v1 = vld [vmem:[%s8983_s6 + $0x4c] ss:$12 sps:$4 sm:$0xff]  }
 0x7d0   :  { %v7257_v30 = vmax.f32 %v9063_v63, %v1367_v42  ;;  %1677 = vmin.xlane.f32.xlu0 %v7244_v55  ;;  %v1369_v60 = vpop.f32.mrb[59].mxu0  ;;  %vm1497_vm6 = vcmp.eq.s32.totalorder %v6460_v41, %v1491_v6  ;;  %9065 = vst [vmem:[#allocation13_spill] sm:$0xff] %v7264_v1  ;;  %1885 = vmatprep.subr.bf16.mxu1 %v7264_v1 }
 0x7d1   :  { %9059 = vst [vmem:[#allocation16_spill] sm:$0xff] %v7239_v2  ;;  %v7270_v28 = vmax.f32 %v9068_v9, %v1369_v60  ;;  %v7273_v24 = vsel %vm1497_vm6, 1e+30, %v9070_v56  ;;  %vm5122_vm8 = vmpackc.low %vm1497_vm6, %vm1496_vm5 }
 0x7d2   :  { %9064 = vst [vmem:[#allocation11_spill] sm:$0xff] %v7257_v30  ;;  %1679 = vmin.xlane.f32.xlu1 %v7273_v24 }
 0x7d3   :  { %9069 = vst [vmem:[#allocation12_spill] sm:$0xff] %v7270_v28  ;;  %1886 = vmatpush1.bf16.msra.mxu1 %v7279_v49 }
 0x7d4   :  { %5723 = vmatprep.subr.bf16.mxu1 %v9042_v52 }
 0x7d6   :  { %5692 = vmatmul.mubr.msk.bf16.gmra.mrb[60].mxu1 %vm5122_vm8, %v9041_v19 }
 0x7d7   :  { %1911 = vmatprep.mubr.bf16.mxu1 %v9040_v23 }
 0x851   :  { %v1670_v45 = vpop.xlane.xlu0 %1669 }
 0x852   :  { %vm1681_vm9 = vcmp.eq.f32.partialorder %v7178_v17, %v1670_v45 }
 0x853   :  { %v7289_v15 = vsel %vm1681_vm9, %v6460_v41, 128  ;;  %v1672_v31 = vpop.xlane.xlu1 %1671 }
 0x854   :  { %vm1682_vm10 = vcmp.eq.f32.partialorder %v7183_v59, %v1672_v31  ;;  %v1694_v47 = vshra.s32 %v7289_v15, 16 }
 0x855   :  { %v7294_v8 = vsel %vm1682_vm10, %v6460_v41, 128 }
 0x856   :  { %v7296_v53 = vcvt.s32.f32 %v1694_v47  ;;  %v1708_v4 = vshra.s32 %v7294_v8, 16 }
 0x858   :  { %1697 = vmin.xlane.f32.xlu0 %v7296_v53  ;;  %v7300_v35 = vcvt.s32.f32 %v1708_v4 }
 0x859   :  { %v1674_v29 = vpop.xlane.xlu0 %1673 }
 0x85a   :  { %vm1683_vm11 = vcmp.eq.f32.partialorder %v7214_v34, %v1674_v29  ;;  %1711 = vmin.xlane.f32.xlu1 %v7300_v35 }
 0x85b   :  { %v7305_v40 = vsel %vm1683_vm11, %v6460_v41, 128  ;;  %v1676_v22 = vpop.xlane.xlu1 %1675 }
 0x85c   :  { %vm1684_vm12 = vcmp.eq.f32.partialorder %v7226_v12, %v1676_v22  ;;  %v1722_v33 = vshra.s32 %v7305_v40, 16 }
 0x85d   :  { %v7310_v27 = vsel %vm1684_vm12, %v6460_v41, 128  ;;  %v1678_v16 = vpop.xlane.xlu0 %1677 }
 0x85e   :  { %vm1685_vm13 = vcmp.eq.f32.partialorder %v7244_v55, %v1678_v16  ;;  %v7313_v7 = vcvt.s32.f32 %v1722_v33  ;;  %v1736_v57 = vshra.s32 %v7310_v27, 16 }
 0x85f   :  { %v7317_v6 = vsel %vm1685_vm13, %v6460_v41, 128  ;;  %v1680_v26 = vpop.xlane.xlu1 %1679 }
 0x860   :  { %vm1686_vm14 = vcmp.eq.f32.partialorder %v7273_v24, %v1680_v26  ;;  %1725 = vmin.xlane.f32.xlu0 %v7313_v7  ;;  %v7321_v62 = vcvt.s32.f32 %v1736_v57  ;;  %v1750_v39 = vshra.s32 %v7317_v6, 16  ;;  %v9072_v57 = vld [vmem:[#allocation4_spill] sm:$0xff] }
 0x861   :  { %v7325_v42 = vsel %vm1686_vm14, %v6460_v41, 128 }
 0x862   :  { %1739 = vmin.xlane.f32.xlu1 %v7321_v62  ;;  %v7328_v51 = vcvt.s32.f32 %v1750_v39  ;;  %v1764_v44 = vshra.s32 %v7325_v42, 16 }
 0x864   :  { %1753 = vmin.xlane.f32.xlu0 %v7328_v51  ;;  %v7332_v63 = vcvt.s32.f32 %v1764_v44 }
 0x866   :  { %1767 = vmin.xlane.f32.xlu1 %v7332_v63 }
 0x899   :  { %v1553_v60 = vpop.f32.mrb[52].mxu1 }
 0x89a   :  { %v1554_v20 = vadd.f32 %v1553_v60, %v6740_v61  ;;  %v5685_v11 = vpop.f32.mrb[53].mxu1 }
 0x89b   :  { %v1556_v9 = vpop.f32.mrb[54].mxu1 }
 0x89c   :  { %v1557_v56 = vadd.f32 %v1556_v9, %v6742_v54  ;;  %v5686_v45 = vpop.f32.mrb[55].mxu1  ;;  %v1576_v31 = vmax.f32 %v1554_v20, 0.0  ;;  %v9073_v20 = vld [vmem:[#allocation3_spill] sm:$0xff] }
 0x89e   :  { %v1577_v47 = vmax.f32 %v1557_v56, 0.0 }
 0x8a0   :  { %v1582_v4 = vpack.c.bf16 %v1577_v47, %v1576_v31  ;;  %v9074_v47 = vld [vmem:[#allocation6_spill] sm:$0xff] }
 0x8a1   :  { %v1561_v29 = vpop.f32.mrb[56].mxu1 }
 0x8a2   :  { %v1562_v22 = vadd.f32 %v1561_v29, %v6748_v25  ;;  %v5689_v33 = vpop.f32.mrb[57].mxu1  ;;  %5124 = vmatmul.mubr.msk.bf16.vlgmr.msra.gmra.mrb[60].mxu0 %vm741_vm7, %v1582_v4 }
 0x8a3   :  { %v1564_v16 = vpop.f32.mrb[58].mxu1  ;;  %1636 = vmatprep.mubr.bf16.mxu0 %v9040_v23  ;;  %5696 = vmatpush3.bf16.msra.mxu0 %v9072_v57 }
 0x8a4   :  { %v1565_v26 = vadd.f32 %v1564_v16, %v6750_v32  ;;  %v5690_v39 = vpop.f32.mrb[59].mxu1  ;;  %5697 = vmatprep.subr.bf16.mxu0 %v9042_v52  ;;  %v1578_v44 = vmax.f32 %v1562_v22, 0.0  ;;  %v9075_v16 = vld [vmem:[#allocation5_spill] sm:$0xff] }
 0x8a5   :  { %v9076_v39 = vld [vmem:[#allocation8_spill] sm:$0xff] }
 0x8a6   :  { %v1579_v60 = vmax.f32 %v1565_v26, 0.0 }
 0x8a7   :  { %5698 = vmatpush3.bf16.msra.mxu0 %v9073_v20 }
 0x8a8   :  { %v1583_v11 = vpack.c.bf16 %v1579_v60, %v1578_v44  ;;  %5699 = vmatprep.subr.bf16.mxu0 %v9042_v52  ;;  %v9077_v44 = vld [vmem:[#allocation7_spill] sm:$0xff]  ;;  %v9078_v60 = vld [vmem:[#allocation10_spill] sm:$0xff] }
 0x8a9   :  { %v1569_v9 = vpop.f32.mrb[60].mxu1 }
 0x8aa   :  { %v1570_v56 = vadd.f32 %v1569_v9, %v6760_v58  ;;  %v5693_v45 = vpop.f32.mrb[61].mxu1  ;;  %5125 = vmatmul.mubr.msk.bf16.gmra.mrb[64].mxu0 %vm741_vm7, %v1583_v11  ;;  %v9079_v11 = vld [vmem:[#allocation9_spill] sm:$0xff] }
 0x8ab   :  { %v1572_v31 = vpop.f32.mrb[62].mxu1  ;;  %1646 = vmatprep.mubr.bf16.mxu0 %v9040_v23  ;;  %5700 = vmatpush3.bf16.msra.mxu0 %v9074_v47  ;;  %v7366_v9 = vld [vmem:[%s8983_s6 + $0x4] ss:$12 sps:$4 sm:$0xff]   ;;  %v1707_v45 = vand.u32 65535, %v7294_v8 }
 0x8ac   :  { %v1573_v4 = vadd.f32 %v1572_v31, %v6763_v13  ;;  %v5694_v29 = vpop.f32.mrb[63].mxu1  ;;  %5701 = vmatprep.subr.bf16.mxu0 %v9042_v52  ;;  %v1580_v22 = vmax.f32 %v1570_v56, 0.0  ;;  %9080 = vst [vmem:[#allocation15_spill] sm:$0xff] %v7366_v9  ;;  %v1693_v56 = vand.u32 65535, %v7289_v15  ;;  %v1749_v15 = vand.u32 65535, %v7317_v6 }
 0x8ae   :  { %v1581_v33 = vmax.f32 %v1573_v4, 0.0  ;;  %v1695_v4 = vcvt.s32.f32 %v1693_v56 }
 0x8af   :  { %5702 = vmatpush3.bf16.msra.mxu0 %v9075_v16 }
 0x8b0   :  { %v1584_v26 = vpack.c.bf16 %v1581_v33, %v1580_v22  ;;  %5703 = vmatprep.subr.bf16.mxu0 %v9042_v52  ;;  %v1709_v33 = vcvt.s32.f32 %v1707_v45 }
 0x8b2   :  { %5126 = vmatmul.mubr.msk.bf16.gmra.mrb[68].mxu0 %vm741_vm7, %v1584_v26  ;;  %v1721_v26 = vand.u32 65535, %v7305_v40 }
 0x8b3   :  { %5704 = vmatpush3.bf16.msra.mxu0 %v9076_v39  ;;  %5711 = vmatprep.mubr.msk.bf16.mxu0 %vm6275_vm1, %v9042_v52 }
 0x8b4   :  { %5705 = vmatprep.subr.bf16.mxu0 %v9042_v52  ;;  %v1723_v8 = vcvt.s32.f32 %v1721_v26 }
 0x8b7   :  { %5706 = vmatpush3.bf16.msra.mxu0 %v9077_v44 }
 0x8b8   :  { %5707 = vmatprep.subr.bf16.mxu0 %v9042_v52 }
 0x8bb   :  { %5708 = vmatpush3.bf16.msra.mxu0 %v9078_v60 }
 0x8bc   :  { %5709 = vmatprep.subr.bf16.mxu0 %v9042_v52 }
 0x8bf   :  { %5710 = vmatpush3.bf16.msra.mxu0 %v9079_v11 }
 0x8c0   :  { %2164 = vmatprep.subr.bf16.mxu0 %v7366_v9  ;;  %v1735_v9 = vand.u32 65535, %v7310_v27 }
 0x8c2   :  { %v1737_v45 = vcvt.s32.f32 %v1735_v9 }
 0x8e5   :  { %v1698_v31 = vpop.xlane.xlu0 %1697 }
 0x8e6   :  { %vm1699_vm15 = vcmp.eq.f32.partialorder %v7296_v53, %v1698_v31  ;;  %v1763_v53 = vand.u32 65535, %v7325_v42  ;;  %v1704_v42 = vcvt.f32.s32 %v1698_v31 }
 0x8e7   :  { %v1712_v29 = vpop.xlane.xlu1 %1711  ;;  %v1700_v22 = vsel %vm1699_vm15, %v1695_v4, inf }
 0x8e8   :  { %1701 = vmin.xlane.f32.xlu0 %v1700_v22  ;;  %vm1713_vm0 = vcmp.eq.f32.partialorder %v7300_v35, %v1712_v29  ;;  %v1751_v22 = vcvt.s32.f32 %v1749_v15  ;;  %v1718_v9 = vcvt.f32.s32 %v1712_v29  ;;  %v1705_v26 = vshll.u32 %v1704_v42, 16 }
 0x8e9   :  { %v1714_v11 = vsel %vm1713_vm0, %v1709_v33, inf }
 0x8ea   :  { %1715 = vmin.xlane.f32.xlu1 %v1714_v11  ;;  %v1765_v11 = vcvt.s32.f32 %v1763_v53 }
 0x8ed   :  { %v1726_v60 = vpop.xlane.xlu0 %1725 }
 0x8ee   :  { %vm1727_vm2 = vcmp.eq.f32.partialorder %v7313_v7, %v1726_v60 }
 0x8ef   :  { %v1740_v56 = vpop.xlane.xlu1 %1739  ;;  %v1728_v4 = vsel %vm1727_vm2, %v1723_v8, inf }
 0x8f0   :  { %1729 = vmin.xlane.f32.xlu0 %v1728_v4  ;;  %vm1741_vm3 = vcmp.eq.f32.partialorder %v7321_v62, %v1740_v56  ;;  %v1746_v42 = vcvt.f32.s32 %v1740_v56 }
 0x8f1   :  { %v1754_v35 = vpop.xlane.xlu0 %1753  ;;  %v1742_v40 = vsel %vm1741_vm3, %v1737_v45, inf }
 0x8f2   :  { %1743 = vmin.xlane.f32.xlu1 %v1742_v40  ;;  %vm1755_vm4 = vcmp.eq.f32.partialorder %v7328_v51, %v1754_v35 }
 0x8f3   :  { %v7380_v27 = vpop.xlane.xlu1 %1767  ;;  %v1756_v6 = vsel %vm1755_vm4, %v1751_v22, inf }
 0x8f4   :  { %1757 = vmin.xlane.f32.xlu0 %v1756_v6  ;;  %vm1769_vm5 = vcmp.eq.f32.partialorder %v7332_v63, %v7380_v27  ;;  %v1719_v63 = vshll.u32 %v1718_v9, 16 }
 0x8f5   :  { %v1770_v7 = vsel %vm1769_vm5, %v1765_v11, inf  ;;  %v1732_v11 = vcvt.f32.s32 %v1726_v60  ;;  %v1760_v60 = vcvt.f32.s32 %v1754_v35  ;;  %v1774_v35 = vcvt.f32.s32 %v7380_v27 }
 0x8f6   :  { %1771 = vmin.xlane.f32.xlu1 %v1770_v7 }
 0x8f7   :  { %v1761_v29 = vshll.u32 %v1760_v60, 16 }
 0x975   :  { %v1702_v33 = vpop.xlane.xlu0 %1701  ;;  %v7384_v62 = vpop.f32.mrb[60].mxu0 }
 0x976   :  { %v1703_v15 = vcvt.f32.s32 %v1702_v33  ;;  %v7388_v8 = vpop.f32.mrb[61].mxu0 }
 0x977   :  { %v1716_v4 = vpop.xlane.xlu1 %1715  ;;  %v7392_v45 = vpop.f32.mrb[62].mxu0 }
 0x978   :  { %v1706_v40 = vadd.s32 %v1705_v26, %v1703_v15  ;;  %v1717_v31 = vcvt.f32.s32 %v1716_v4  ;;  %v7396_v22 = vpop.f32.mrb[63].mxu0  ;;  %v1733_v4 = vshll.u32 %v1732_v11, 16 }
 0x97a   :  { %v1720_v7 = vadd.s32 %v1719_v63, %v1717_v31  ;;  %vm1777_vm6 = vcmp.eq.s32.totalorder %v6460_v41, %v1706_v40  ;;  %v1747_v40 = vshll.u32 %v1746_v42, 16 }
 0x97b   :  { %v7402_v33 = vsel %vm1777_vm6, 1e+30, %v7178_v17 }
 0x97c   :  { %1954 = vmin.xlane.f32.xlu0 %v7402_v33  ;;  %vm1778_vm8 = vcmp.eq.s32.totalorder %v6460_v41, %v1720_v7 }
 0x97d   :  { %v1730_v9 = vpop.xlane.xlu0 %1729  ;;  %v7406_v26 = vpop.f32.mrb[64].mxu0  ;;  %v7409_v15 = vsel %vm1778_vm8, 1e+30, %v7183_v59  ;;  %vm5133_vm9 = vmpackc.low %vm1778_vm8, %vm1777_vm6 }
 0x97e   :  { %v1731_v63 = vcvt.f32.s32 %v1730_v9  ;;  %1956 = vmin.xlane.f32.xlu1 %v7409_v15  ;;  %v7414_v17 = vpop.f32.mrb[65].mxu0  ;;  %5712 = vmatmul.mubr.msk.bf16.vlgmr.msra.gmra.mrb[72].mxu0 %vm5133_vm9, %v9041_v19 }
 0x97f   :  { %v1744_v7 = vpop.xlane.xlu1 %1743  ;;  %v7419_v59 = vpop.f32.mrb[66].mxu0  ;;  %5715 = vmatprep.mubr.msk.bf16.mxu0 %vm6275_vm1, %v9042_v52  ;;  %2165 = vmatpush1.bf16.msra.mxu0 %v7114_v14 }
 0x980   :  { %v1734_v11 = vadd.s32 %v1733_v4, %v1731_v63  ;;  %v1745_v9 = vcvt.f32.s32 %v1744_v7  ;;  %v7427_v6 = vpop.f32.mrb[67].mxu0  ;;  %2166 = vmatprep.subr.bf16.mxu0 %v7121_v18  ;;  %v1775_v4 = vshll.u32 %v1774_v35, 16 }
 0x981   :  { %v1758_v31 = vpop.xlane.xlu0 %1757 }
 0x982   :  { %v1748_v53 = vadd.s32 %v1747_v40, %v1745_v9  ;;  %v1759_v51 = vcvt.f32.s32 %v1758_v31  ;;  %vm1779_vm10 = vcmp.eq.s32.totalorder %v6460_v41, %v1734_v11 }
 0x983   :  { %v1772_v14 = vpop.xlane.xlu1 %1771  ;;  %v7434_v27 = vsel %vm1779_vm10, 1e+30, %v7214_v34  ;;  %2167 = vmatpush1.bf16.msra.mxu0 %v7127_v21 }
 0x984   :  { %v1762_v63 = vadd.s32 %v1761_v29, %v1759_v51  ;;  %v1773_v7 = vcvt.f32.s32 %v1772_v14  ;;  %1958 = vmin.xlane.f32.xlu0 %v7434_v27  ;;  %vm1780_vm11 = vcmp.eq.s32.totalorder %v6460_v41, %v1748_v53  ;;  %2168 = vmatprep.subr.bf16.mxu0 %v7222_v3 }
 0x985   :  { %v7440_v18 = vpop.f32.mrb[68].mxu0  ;;  %v7443_v60 = vsel %vm1780_vm11, 1e+30, %v7226_v12  ;;  %vm5135_vm12 = vmpackc.low %vm1780_vm11, %vm1779_vm10 }
 0x986   :  { %v1776_v40 = vadd.s32 %v1775_v4, %v1773_v7  ;;  %1960 = vmin.xlane.f32.xlu1 %v7443_v60  ;;  %v7448_v21 = vpop.f32.mrb[69].mxu0  ;;  %5716 = vmatmul.mubr.msk.bf16.gmra.mrb[76].mxu0 %vm5135_vm12, %v9041_v19  ;;  %vm1781_vm13 = vcmp.eq.s32.totalorder %v6460_v41, %v1762_v63 }
 0x987   :  { %9081 = vst [vmem:[#allocation4_spill] sm:$0xff] %v7448_v21  ;;  %v7454_v53 = vpop.f32.mrb[70].mxu0  ;;  %v7459_v12 = vsel %vm1781_vm13, 1e+30, %v7244_v55  ;;  %5719 = vmatprep.mubr.msk.bf16.mxu0 %vm6275_vm1, %v9042_v52  ;;  %2169 = vmatpush1.bf16.msra.mxu0 %v7251_v5 }
 0x988   :  { %9082 = vst [vmem:[#allocation3_spill] sm:$0xff] %v7454_v53  ;;  %9083 = vst [vmem:[#allocation6_spill] sm:$0xff] %v7459_v12  ;;  %1962 = vmin.xlane.f32.xlu0 %v7459_v12  ;;  %v7467_v31 = vpop.f32.mrb[71].mxu0  ;;  %vm1782_vm14 = vcmp.eq.s32.totalorder %v6460_v41, %v1776_v40  ;;  %2170 = vmatprep.subr.bf16.mxu0 %v7264_v1 }
 0x989   :  { %9084 = vst [vmem:[#allocation5_spill] sm:$0xff] %v7467_v31  ;;  %v7474_v35 = vsel %vm1782_vm14, 1e+30, %v7273_v24  ;;  %vm5137_vm15 = vmpackc.low %vm1782_vm14, %vm1781_vm13 }
 0x98a   :  { %9085 = vst [vmem:[#allocation8_spill] sm:$0xff] %v7474_v35  ;;  %1964 = vmin.xlane.f32.xlu1 %v7474_v35 }
 0x98b   :  { %2171 = vmatpush1.bf16.msra.mxu0 %v7279_v49 }
 0x98c   :  { %5751 = vmatprep.subr.bf16.mxu0 %v9042_v52 }
 0x98e   :  { %5720 = vmatmul.mubr.msk.bf16.gmra.mrb[80].mxu0 %vm5137_vm15, %v9041_v19 }
 0x98f   :  { %2196 = vmatprep.mubr.bf16.mxu0 %v9040_v23 }
 0xa09   :  { %v1955_v11 = vpop.xlane.xlu0 %1954 }
 0xa0a   :  { %vm1966_vm0 = vcmp.eq.f32.partialorder %v7402_v33, %v1955_v11 }
 0xa0b   :  { %v7485_v9 = vsel %vm1966_vm0, %v6460_v41, 128  ;;  %v1957_v24 = vpop.xlane.xlu1 %1956 }
 0xa0c   :  { %v1979_v14 = vshra.s32 %v7485_v9, 16  ;;  %vm1967_vm2 = vcmp.eq.f32.partialorder %v7409_v15, %v1957_v24 }
 0xa0d   :  { %v7490_v4 = vsel %vm1967_vm2, %v6460_v41, 128 }
 0xa0e   :  { %v1993_v63 = vshra.s32 %v7490_v4, 16  ;;  %v7493_v7 = vcvt.s32.f32 %v1979_v14 }
 0xa10   :  { %1982 = vmin.xlane.f32.xlu0 %v7493_v7  ;;  %v7496_v40 = vcvt.s32.f32 %v1993_v63 }
 0xa11   :  { %v1959_v11 = vpop.xlane.xlu0 %1958 }
 0xa12   :  { %vm1968_vm3 = vcmp.eq.f32.partialorder %v7434_v27, %v1959_v11  ;;  %1996 = vmin.xlane.f32.xlu1 %v7496_v40 }
 0xa13   :  { %v7501_v55 = vsel %vm1968_vm3, %v6460_v41, 128  ;;  %v1961_v24 = vpop.xlane.xlu1 %1960 }
 0xa14   :  { %v2007_v29 = vshra.s32 %v7501_v55, 16  ;;  %vm1969_vm4 = vcmp.eq.f32.partialorder %v7443_v60, %v1961_v24 }
 0xa15   :  { %v7506_v14 = vsel %vm1969_vm4, %v6460_v41, 128  ;;  %v1963_v51 = vpop.xlane.xlu0 %1962 }
 0xa16   :  { %v2021_v63 = vshra.s32 %v7506_v14, 16  ;;  %vm1970_vm5 = vcmp.eq.f32.partialorder %v7459_v12, %v1963_v51  ;;  %v7510_v34 = vcvt.s32.f32 %v2007_v29 }
 0xa17   :  { %v7513_v11 = vsel %vm1970_vm5, %v6460_v41, 128  ;;  %v1965_v42 = vpop.xlane.xlu1 %1964 }
 0xa18   :  { %v2035_v56 = vshra.s32 %v7513_v11, 16  ;;  %vm1971_vm6 = vcmp.eq.f32.partialorder %v7474_v35, %v1965_v42  ;;  %2010 = vmin.xlane.f32.xlu0 %v7510_v34  ;;  %v7518_v24 = vcvt.s32.f32 %v2021_v63 }
 0xa19   :  { %v7521_v49 = vsel %vm1971_vm6, %v6460_v41, 128 }
 0xa1a   :  { %v2049_v31 = vshra.s32 %v7521_v49, 16  ;;  %2024 = vmin.xlane.f32.xlu1 %v7518_v24  ;;  %v7525_v51 = vcvt.s32.f32 %v2035_v56 }
 0xa1c   :  { %2038 = vmin.xlane.f32.xlu0 %v7525_v51  ;;  %v7528_v29 = vcvt.s32.f32 %v2049_v31 }
 0xa1e   :  { %2052 = vmin.xlane.f32.xlu1 %v7528_v29 }
 0xa51   :  { %v1838_v42 = vpop.f32.mrb[72].mxu0 }
 0xa52   :  { %v1839_v35 = vadd.f32 %v1838_v42, %v6740_v61  ;;  %v5713_v63 = vpop.f32.mrb[73].mxu0 }
 0xa53   :  { %v1841_v28 = vpop.f32.mrb[74].mxu0 }
 0xa54   :  { %v1842_v1 = vadd.f32 %v1841_v28, %v6742_v54  ;;  %v5714_v53 = vpop.f32.mrb[75].mxu0  ;;  %v1861_v30 = vmax.f32 %v1839_v35, 0.0 }
 0xa56   :  { %v1862_v5 = vmax.f32 %v1842_v1, 0.0 }
 0xa58   :  { %v1867_v12 = vpack.c.bf16 %v1862_v5, %v1861_v30 }
 0xa59   :  { %v1846_v21 = vpop.f32.mrb[76].mxu0 }
 0xa5a   :  { %v1847_v56 = vadd.f32 %v1846_v21, %v6748_v25  ;;  %v5717_v2 = vpop.f32.mrb[77].mxu0  ;;  %5139 = vmatmul.mubr.msk.bf16.vlgmr.msra.gmra.mrb[64].mxu1 %vm741_vm7, %v1867_v12 }
 0xa5b   :  { %5724 = vmatpush3.bf16.msra.mxu1 %v9072_v57  ;;  %v1849_v31 = vpop.f32.mrb[78].mxu0  ;;  %1921 = vmatprep.mubr.bf16.mxu1 %v9040_v23 }
 0xa5c   :  { %v1850_v42 = vadd.f32 %v1849_v31, %v6750_v32  ;;  %v5718_v63 = vpop.f32.mrb[79].mxu0  ;;  %5725 = vmatprep.subr.bf16.mxu1 %v9042_v52  ;;  %v1863_v28 = vmax.f32 %v1847_v56, 0.0 }
 0xa5d   :  { %v9086_v63 = vld [vmem:[#allocation10_spill] sm:$0xff] }
 0xa5e   :  { %v1864_v53 = vmax.f32 %v1850_v42, 0.0 }
 0xa5f   :  { %5726 = vmatpush3.bf16.msra.mxu1 %v9073_v20 }
 0xa60   :  { %v1868_v5 = vpack.c.bf16 %v1864_v53, %v1863_v28  ;;  %5727 = vmatprep.subr.bf16.mxu1 %v9042_v52  ;;  %v9087_v28 = vld [vmem:[#allocation9_spill] sm:$0xff]  ;;  %v9088_v53 = vld [vmem:[#allocation15_spill] sm:$0xff] }
 0xa61   :  { %v1854_v2 = vpop.f32.mrb[80].mxu0 }
 0xa62   :  { %v1855_v30 = vadd.f32 %v1854_v2, %v6760_v58  ;;  %v5721_v1 = vpop.f32.mrb[81].mxu0  ;;  %5140 = vmatmul.mubr.msk.bf16.gmra.mrb[68].mxu1 %vm741_vm7, %v1868_v5  ;;  %v1978_v5 = vand.u32 65535, %v7485_v9  ;;  %v1992_v2 = vand.u32 65535, %v7490_v4  ;;  %v2034_v9 = vand.u32 65535, %v7513_v11 }
 0xa63   :  { %5728 = vmatpush3.bf16.msra.mxu1 %v9074_v47  ;;  %v1857_v21 = vpop.f32.mrb[82].mxu0  ;;  %1931 = vmatprep.mubr.bf16.mxu1 %v9040_v23 }
 0xa64   :  { %v1858_v12 = vadd.f32 %v1857_v21, %v6763_v13  ;;  %v5722_v35 = vpop.f32.mrb[83].mxu0  ;;  %5729 = vmatprep.subr.bf16.mxu1 %v9042_v52  ;;  %v1865_v56 = vmax.f32 %v1855_v30, 0.0  ;;  %v1980_v1 = vcvt.s32.f32 %v1978_v5 }
 0xa65   :  { %v1994_v35 = vcvt.s32.f32 %v1992_v2 }
 0xa66   :  { %v1866_v31 = vmax.f32 %v1858_v12, 0.0 }
 0xa67   :  { %5730 = vmatpush3.bf16.msra.mxu1 %v9075_v16 }
 0xa68   :  { %v1869_v42 = vpack.c.bf16 %v1866_v31, %v1865_v56  ;;  %5731 = vmatprep.subr.bf16.mxu1 %v9042_v52  ;;  %v2006_v56 = vand.u32 65535, %v7501_v55 }
 0xa6a   :  { %5141 = vmatmul.mubr.msk.bf16.gmra.mrb[72].mxu1 %vm741_vm7, %v1869_v42  ;;  %v2020_v42 = vand.u32 65535, %v7506_v14  ;;  %v2008_v4 = vcvt.s32.f32 %v2006_v56 }
 0xa6b   :  { %5732 = vmatpush3.bf16.msra.mxu1 %v9076_v39  ;;  %5739 = vmatprep.mubr.msk.bf16.mxu1 %vm6275_vm1, %v9042_v52 }
 0xa6c   :  { %5733 = vmatprep.subr.bf16.mxu1 %v9042_v52  ;;  %v2022_v2 = vcvt.s32.f32 %v2020_v42 }
 0xa6f   :  { %5734 = vmatpush3.bf16.msra.mxu1 %v9077_v44 }
 0xa70   :  { %5735 = vmatprep.subr.bf16.mxu1 %v9042_v52 }
 0xa73   :  { %5736 = vmatpush3.bf16.msra.mxu1 %v9086_v63 }
 0xa74   :  { %5737 = vmatprep.subr.bf16.mxu1 %v9042_v52 }
 0xa77   :  { %5738 = vmatpush3.bf16.msra.mxu1 %v9087_v28 }
 0xa78   :  { %2449 = vmatprep.subr.bf16.mxu1 %v9088_v53 }
 0xa9d   :  { %v1983_v30 = vpop.xlane.xlu0 %1982 }
 0xa9e   :  { %vm1984_vm8 = vcmp.eq.f32.partialorder %v7493_v7, %v1983_v30  ;;  %v2048_v7 = vand.u32 65535, %v7521_v49 }
 0xa9f   :  { %v1997_v21 = vpop.xlane.xlu1 %1996  ;;  %v1985_v12 = vsel %vm1984_vm8, %v1980_v1, inf }
 0xaa0   :  { %1986 = vmin.xlane.f32.xlu0 %v1985_v12  ;;  %vm1998_vm9 = vcmp.eq.f32.partialorder %v7496_v40, %v1997_v21  ;;  %v2036_v12 = vcvt.s32.f32 %v2034_v9 }
 0xaa1   :  { %v1999_v31 = vsel %vm1998_vm9, %v1994_v35, inf  ;;  %v1989_v35 = vcvt.f32.s32 %v1983_v30 }
 0xaa2   :  { %2000 = vmin.xlane.f32.xlu1 %v1999_v31 }
 0xaa3   :  { %v1990_v42 = vshll.u32 %v1989_v35, 16 }
 0xaa5   :  { %v2011_v53 = vpop.xlane.xlu0 %2010 }
 0xaa6   :  { %vm2012_vm10 = vcmp.eq.f32.partialorder %v7510_v34, %v2011_v53  ;;  %v2050_v34 = vcvt.s32.f32 %v2048_v7  ;;  %v9090_v7 = vmax.f32 %v7164_v36, %v7388_v8  ;;  %v2017_v35 = vcvt.f32.s32 %v2011_v53 }
 0xaa7   :  { %v2025_v5 = vpop.xlane.xlu1 %2024  ;;  %v2013_v1 = vsel %vm2012_vm10, %v2008_v4, inf  ;;  %v9089_v4 = vmax.f32 %v7159_v0, %v7384_v62  ;;  %v9092_v0 = vmax.f32 %v7174_v48, %v7396_v22 }
 0xaa8   :  { %2014 = vmin.xlane.f32.xlu0 %v2013_v1  ;;  %vm2026_vm11 = vcmp.eq.f32.partialorder %v7518_v24, %v2025_v5  ;;  %v2003_v24 = vcvt.f32.s32 %v1997_v21  ;;  %v2031_v8 = vcvt.f32.s32 %v2025_v5  ;;  %v2018_v48 = vshll.u32 %v2017_v35, 16 }
 0xaa9   :  { %v7570_v40 = vpop.xlane.xlu0 %2038  ;;  %v2027_v55 = vsel %vm2026_vm11, %v2022_v2, inf  ;;  %v9093_v5 = vmax.f32 %v7188_v10, %v7406_v26  ;;  %v7625_v10 = vld [vmem:[%s8983_s6] ss:$12 sps:$4 sm:$0xff]  }
 0xaaa   :  { %2028 = vmin.xlane.f32.xlu1 %v2027_v55  ;;  %vm2040_vm12 = vcmp.eq.f32.partialorder %v7525_v51, %v7570_v40  ;;  %v2045_v22 = vcvt.f32.s32 %v7570_v40 }
 0xaab   :  { %v7574_v14 = vpop.xlane.xlu1 %2052  ;;  %v2041_v11 = vsel %vm2040_vm12, %v2036_v12, inf  ;;  %v2004_v12 = vshll.u32 %v2003_v24, 16 }
 0xaac   :  { %2042 = vmin.xlane.f32.xlu0 %v2041_v11  ;;  %vm2054_vm13 = vcmp.eq.f32.partialorder %v7528_v29, %v7574_v14  ;;  %v9091_v11 = vmax.f32 %v7169_v46, %v7392_v45  ;;  %v2059_v26 = vcvt.f32.s32 %v7574_v14 }
 0xaad   :  { %v2055_v49 = vsel %vm2054_vm13, %v2050_v34, inf }
 0xaae   :  { %2056 = vmin.xlane.f32.xlu1 %v2055_v49 }
 0xb2d   :  { %v1987_v56 = vpop.xlane.xlu0 %1986  ;;  %v1913_v31 = vpop.f32.mrb[64].mxu1 }
 0xb2e   :  { %v1988_v9 = vcvt.f32.s32 %v1987_v56  ;;  %v7581_v51 = vmax.f32 %v9089_v4, %v1913_v31  ;;  %v1915_v1 = vpop.f32.mrb[65].mxu1 }
 0xb2f   :  { %v7586_v2 = vmax.f32 %v9090_v7, %v1915_v1  ;;  %v2001_v29 = vpop.xlane.xlu1 %2000  ;;  %v1917_v55 = vpop.f32.mrb[66].mxu1 }
 0xb30   :  { %v1991_v30 = vadd.s32 %v1990_v42, %v1988_v9  ;;  %v2002_v21 = vcvt.f32.s32 %v2001_v29  ;;  %v7591_v34 = vmax.f32 %v9091_v11, %v1917_v55  ;;  %v1919_v49 = vpop.f32.mrb[67].mxu1  ;;  %v2032_v42 = vshll.u32 %v2031_v8, 16  ;;  %v7637_v55 = vld [vmem:[%s8983_s6 + $0x1c] ss:$12 sps:$4 sm:$0xff]  }
 0xb31   :  { %v7596_v62 = vmax.f32 %v9092_v0, %v1919_v49  ;;  %v7652_v0 = vld [vmem:[%s8983_s6 + $0x18] ss:$12 sps:$4 sm:$0xff]  }
 0xb32   :  { %v2005_v36 = vadd.s32 %v2004_v12, %v2002_v21  ;;  %vm2062_vm14 = vcmp.eq.s32.totalorder %v6460_v41, %v1991_v30  ;;  %v9096_v12 = vmax.f32 %v7210_v43, %v7427_v6  ;;  %v2046_v21 = vshll.u32 %v2045_v22, 16  ;;  %v9098_v22 = vld [vmem:[#allocation16_spill] sm:$0xff] }
 0xb33   :  { %v7600_v24 = vsel %vm2062_vm14, 1e+30, %v7402_v33  ;;  %v2060_v43 = vshll.u32 %v2059_v26, 16 }
 0xb34   :  { %2239 = vmin.xlane.f32.xlu0 %v7600_v24  ;;  %vm2063_vm15 = vcmp.eq.s32.totalorder %v6460_v41, %v2005_v36 }
 0xb35   :  { %v2015_v46 = vpop.xlane.xlu0 %2014  ;;  %v1923_v45 = vpop.f32.mrb[68].mxu1  ;;  %v7605_v56 = vsel %vm2063_vm15, 1e+30, %v7409_v15  ;;  %vm5148_vm0 = vmpackc.low %vm2063_vm15, %vm2062_vm14  ;;  %v9094_v15 = vmax.f32 %v7195_v38, %v7414_v17  ;;  %v9095_v38 = vmax.f32 %v7204_v50, %v7419_v59 }
 0xb36   :  { %v2016_v53 = vcvt.f32.s32 %v2015_v46  ;;  %v7611_v31 = vmax.f32 %v9093_v5, %v1923_v45  ;;  %2241 = vmin.xlane.f32.xlu1 %v7605_v56  ;;  %v1925_v33 = vpop.f32.mrb[69].mxu1  ;;  %5740 = vmatmul.mubr.msk.bf16.vlgmr.msra.gmra.mrb[76].mxu1 %vm5148_vm0, %v9041_v19  ;;  %v9097_v46 = vmax.f32 %v7231_v37, %v7440_v18  ;;  %v9102_v37 = vld [vmem:[#allocation17_spill] sm:$0xff]  ;;  %v9103_v18 = vld [vmem:[#allocation11_spill] sm:$0xff] }
 0xb37   :  { %v7618_v9 = vmax.f32 %v9094_v15, %v1925_v33  ;;  %v2029_v4 = vpop.xlane.xlu1 %2028  ;;  %v1927_v1 = vpop.f32.mrb[70].mxu1  ;;  %5743 = vmatprep.mubr.msk.bf16.mxu1 %vm6275_vm1, %v9042_v52  ;;  %2450 = vmatpush1.bf16.msra.mxu1 %v7625_v10  ;;  %v9101_v33 = vld [vmem:[#allocation6_spill] sm:$0xff]  ;;  %v9104_v15 = vld [vmem:[#allocation3_spill] sm:$0xff] }
 0xb38   :  { %v2019_v40 = vadd.s32 %v2018_v48, %v2016_v53  ;;  %v2030_v7 = vcvt.f32.s32 %v2029_v4  ;;  %v7632_v17 = vmax.f32 %v9095_v38, %v1927_v1  ;;  %v1929_v29 = vpop.f32.mrb[71].mxu1  ;;  %2451 = vmatprep.subr.bf16.mxu1 %v7637_v55  ;;  %v9105_v4 = vmax.f32 %v9103_v18, %v9104_v15  ;;  %v9108_v38 = vld [vmem:[#allocation5_spill] sm:$0xff] }
 0xb39   :  { %v7643_v30 = vmax.f32 %v9096_v12, %v1929_v29  ;;  %v2043_v14 = vpop.xlane.xlu0 %2042 }
 0xb3a   :  { %v2033_v11 = vadd.s32 %v2032_v42, %v2030_v7  ;;  %v2044_v49 = vcvt.f32.s32 %v2043_v14  ;;  %vm2064_vm2 = vcmp.eq.s32.totalorder %v6460_v41, %v2019_v40  ;;  %v9106_v40 = vld [vmem:[#allocation13_spill] sm:$0xff]  ;;  %v9107_v7 = vld [vmem:[#allocation12_spill] sm:$0xff] }
 0xb3b   :  { %v2057_v50 = vpop.xlane.xlu1 %2056  ;;  %v7647_v59 = vsel %vm2064_vm2, 1e+30, %v7434_v27  ;;  %2452 = vmatpush1.bf16.msra.mxu1 %v7652_v0  ;;  %v9109_v29 = vmax.f32 %v9107_v7, %v9108_v38  ;;  %v9111_v14 = vld [vmem:[#allocation8_spill] sm:$0xff] }
 0xb3c   :  { %v2047_v6 = vadd.s32 %v2046_v21, %v2044_v49  ;;  %v2058_v35 = vcvt.f32.s32 %v2057_v50  ;;  %2243 = vmin.xlane.f32.xlu0 %v7647_v59  ;;  %vm2065_vm3 = vcmp.eq.s32.totalorder %v6460_v41, %v2033_v11  ;;  %2453 = vmatprep.subr.bf16.mxu1 %v7222_v3  ;;  %v9099_v3 = vld [vmem:[#allocation4_spill] sm:$0xff]  ;;  %v9112_v11 = vld [vmem:[#allocation14_spill] sm:$0xff] }
 0xb3d   :  { %v1933_v36 = vpop.f32.mrb[72].mxu1  ;;  %v7659_v27 = vsel %vm2065_vm3, 1e+30, %v7443_v60  ;;  %vm5150_vm4 = vmpackc.low %vm2065_vm3, %vm2064_vm2  ;;  %v9100_v53 = vmax.f32 %v9098_v22, %v9099_v3 }
 0xb3e   :  { %v2061_v8 = vadd.s32 %v2060_v43, %v2058_v35  ;;  %v7664_v45 = vmax.f32 %v9097_v46, %v1933_v36  ;;  %2245 = vmin.xlane.f32.xlu1 %v7659_v27  ;;  %v1935_v48 = vpop.f32.mrb[73].mxu1  ;;  %5744 = vmatmul.mubr.msk.bf16.gmra.mrb[80].mxu1 %vm5150_vm4, %v9041_v19  ;;  %vm2066_vm5 = vcmp.eq.s32.totalorder %v6460_v41, %v2047_v6 }
 0xb3f   :  { %v7672_v5 = vmax.f32 %v9100_v53, %v1935_v48  ;;  %v1937_v60 = vpop.f32.mrb[74].mxu1  ;;  %v7677_v42 = vsel %vm2066_vm5, 1e+30, %v9101_v33  ;;  %5747 = vmatprep.mubr.msk.bf16.mxu1 %vm6275_vm1, %v9042_v52  ;;  %2454 = vmatpush1.bf16.msra.mxu1 %v9102_v37 }
 0xb40   :  { %v7685_v1 = vmax.f32 %v9105_v4, %v1937_v60  ;;  %2247 = vmin.xlane.f32.xlu0 %v7677_v42  ;;  %v1939_v26 = vpop.f32.mrb[75].mxu1  ;;  %vm2067_vm6 = vcmp.eq.s32.totalorder %v6460_v41, %v2061_v8  ;;  %2455 = vmatprep.subr.bf16.mxu1 %v9106_v40 }
 0xb41   :  { %v7693_v12 = vmax.f32 %v9109_v29, %v1939_v26  ;;  %v7696_v21 = vsel %vm2067_vm6, 1e+30, %v9111_v14  ;;  %vm5152_vm8 = vmpackc.low %vm2067_vm6, %vm2066_vm5 }
 0xb42   :  { %2249 = vmin.xlane.f32.xlu1 %v7696_v21 }
 0xb43   :  { %9110 = vst [vmem:[#allocation7_spill] sm:$0xff] %v7693_v12  ;;  %2456 = vmatpush1.bf16.msra.mxu1 %v9112_v11 }
 0xb44   :  { %5779 = vmatprep.subr.bf16.mxu1 %v9042_v52 }
 0xb46   :  { %5748 = vmatmul.mubr.msk.bf16.gmra.mrb[84].mxu1 %vm5152_vm8, %v9041_v19 }
 0xb47   :  { %2481 = vmatprep.mubr.bf16.mxu1 %v9040_v23 }
 0xbc1   :  { %v2240_v49 = vpop.xlane.xlu0 %2239 }
 0xbc2   :  { %vm2251_vm9 = vcmp.eq.f32.partialorder %v7600_v24, %v2240_v49 }
 0xbc3   :  { %v7707_v50 = vsel %vm2251_vm9, %v6460_v41, 128  ;;  %v2242_v43 = vpop.xlane.xlu1 %2241 }
 0xbc4   :  { %v2264_v35 = vshra.s32 %v7707_v50, 16  ;;  %vm2252_vm10 = vcmp.eq.f32.partialorder %v7605_v56, %v2242_v43 }
 0xbc5   :  { %v7712_v36 = vsel %vm2252_vm10, %v6460_v41, 128 }
 0xbc6   :  { %v2278_v6 = vshra.s32 %v7712_v36, 16  ;;  %v7715_v8 = vcvt.s32.f32 %v2264_v35 }
 0xbc8   :  { %2267 = vmin.xlane.f32.xlu0 %v7715_v8  ;;  %v7718_v46 = vcvt.s32.f32 %v2278_v6 }
 0xbc9   :  { %v2244_v48 = vpop.xlane.xlu0 %2243 }
 0xbca   :  { %vm2253_vm11 = vcmp.eq.f32.partialorder %v7647_v59, %v2244_v48  ;;  %2281 = vmin.xlane.f32.xlu1 %v7718_v46 }
 0xbcb   :  { %v7723_v22 = vsel %vm2253_vm11, %v6460_v41, 128  ;;  %v2246_v3 = vpop.xlane.xlu1 %2245 }
 0xbcc   :  { %v2292_v53 = vshra.s32 %v7723_v22, 16  ;;  %vm2254_vm12 = vcmp.eq.f32.partialorder %v7659_v27, %v2246_v3 }
 0xbcd   :  { %v7728_v60 = vsel %vm2254_vm12, %v6460_v41, 128  ;;  %v2248_v33 = vpop.xlane.xlu0 %2247 }
 0xbce   :  { %v2306_v37 = vshra.s32 %v7728_v60, 16  ;;  %vm2255_vm13 = vcmp.eq.f32.partialorder %v7677_v42, %v2248_v33  ;;  %v7732_v18 = vcvt.s32.f32 %v2292_v53 }
 0xbcf   :  { %v7735_v15 = vsel %vm2255_vm13, %v6460_v41, 128  ;;  %v2250_v4 = vpop.xlane.xlu1 %2249 }
 0xbd0   :  { %v2320_v26 = vshra.s32 %v7735_v15, 16  ;;  %vm2256_vm14 = vcmp.eq.f32.partialorder %v7696_v21, %v2250_v4  ;;  %2295 = vmin.xlane.f32.xlu0 %v7732_v18  ;;  %v7740_v40 = vcvt.s32.f32 %v2306_v37 }
 0xbd1   :  { %v7743_v7 = vsel %vm2256_vm14, %v6460_v41, 128 }
 0xbd2   :  { %v2334_v38 = vshra.s32 %v7743_v7, 16  ;;  %2309 = vmin.xlane.f32.xlu1 %v7740_v40  ;;  %v7747_v29 = vcvt.s32.f32 %v2320_v26 }
 0xbd4   :  { %2323 = vmin.xlane.f32.xlu0 %v7747_v29  ;;  %v7750_v14 = vcvt.s32.f32 %v2334_v38 }
 0xbd6   :  { %2337 = vmin.xlane.f32.xlu1 %v7750_v14 }
 0xc09   :  { %v2123_v11 = vpop.f32.mrb[76].mxu1 }
 0xc0a   :  { %v2124_v49 = vadd.f32 %v2123_v11, %v6740_v61  ;;  %v5741_v43 = vpop.f32.mrb[77].mxu1 }
 0xc0b   :  { %v2126_v35 = vpop.f32.mrb[78].mxu1 }
 0xc0c   :  { %v2127_v6 = vadd.f32 %v2126_v35, %v6742_v54  ;;  %v5742_v48 = vpop.f32.mrb[79].mxu1  ;;  %v2146_v3 = vmax.f32 %v2124_v49, 0.0 }
 0xc0e   :  { %v2147_v53 = vmax.f32 %v2127_v6, 0.0 }
 0xc10   :  { %v2152_v33 = vpack.c.bf16 %v2147_v53, %v2146_v3 }
 0xc11   :  { %v2131_v37 = vpop.f32.mrb[80].mxu1 }
 0xc12   :  { %v2132_v4 = vadd.f32 %v2131_v37, %v6748_v25  ;;  %v5745_v26 = vpop.f32.mrb[81].mxu1  ;;  %5154 = vmatmul.mubr.msk.bf16.vlgmr.msra.gmra.mrb[84].mxu0 %vm741_vm7, %v2152_v33 }
 0xc13   :  { %5752 = vmatpush3.bf16.msra.mxu0 %v9072_v57  ;;  %v2134_v38 = vpop.f32.mrb[82].mxu1  ;;  %2206 = vmatprep.mubr.bf16.mxu0 %v9040_v23 }
 0xc14   :  { %v2135_v11 = vadd.f32 %v2134_v38, %v6750_v32  ;;  %v5746_v43 = vpop.f32.mrb[83].mxu1  ;;  %5753 = vmatprep.subr.bf16.mxu0 %v9042_v52  ;;  %v2148_v35 = vmax.f32 %v2132_v4, 0.0 }
 0xc15   :  { %v9113_v43 = vld [vmem:[#allocation15_spill] sm:$0xff] }
 0xc16   :  { %v2149_v49 = vmax.f32 %v2135_v11, 0.0 }
 0xc17   :  { %5754 = vmatpush3.bf16.msra.mxu0 %v9073_v20 }
 0xc18   :  { %v2153_v6 = vpack.c.bf16 %v2149_v49, %v2148_v35  ;;  %5755 = vmatprep.subr.bf16.mxu0 %v9042_v52  ;;  %v2263_v35 = vand.u32 65535, %v7707_v50  ;;  %v2277_v49 = vand.u32 65535, %v7712_v36  ;;  %v2319_v50 = vand.u32 65535, %v7735_v15 }
 0xc19   :  { %v2139_v48 = vpop.f32.mrb[84].mxu1 }
 0xc1a   :  { %v2140_v3 = vadd.f32 %v2139_v48, %v6760_v58  ;;  %v5749_v53 = vpop.f32.mrb[85].mxu1  ;;  %5155 = vmatmul.mubr.msk.bf16.gmra.mrb[88].mxu0 %vm741_vm7, %v2153_v6  ;;  %v2265_v48 = vcvt.s32.f32 %v2263_v35 }
 0xc1b   :  { %5756 = vmatpush3.bf16.msra.mxu0 %v9074_v47  ;;  %v2142_v33 = vpop.f32.mrb[86].mxu1  ;;  %2216 = vmatprep.mubr.bf16.mxu0 %v9040_v23 }
 0xc1c   :  { %v2143_v37 = vadd.f32 %v2142_v33, %v6763_v13  ;;  %v5750_v4 = vpop.f32.mrb[87].mxu1  ;;  %5757 = vmatprep.subr.bf16.mxu0 %v9042_v52  ;;  %v2150_v26 = vmax.f32 %v2140_v3, 0.0  ;;  %v2279_v33 = vcvt.s32.f32 %v2277_v49  ;;  %v2321_v49 = vcvt.s32.f32 %v2319_v50 }
 0xc1e   :  { %v2151_v38 = vmax.f32 %v2143_v37, 0.0  ;;  %v2291_v37 = vand.u32 65535, %v7723_v22 }
 0xc1f   :  { %5758 = vmatpush3.bf16.msra.mxu0 %v9075_v16 }
 0xc20   :  { %v2154_v11 = vpack.c.bf16 %v2151_v38, %v2150_v26  ;;  %5759 = vmatprep.subr.bf16.mxu0 %v9042_v52  ;;  %v2305_v26 = vand.u32 65535, %v7728_v60  ;;  %v2293_v36 = vcvt.s32.f32 %v2291_v37 }
 0xc22   :  { %5156 = vmatmul.mubr.msk.bf16.gmra.mrb[92].mxu0 %vm741_vm7, %v2154_v11  ;;  %v2307_v35 = vcvt.s32.f32 %v2305_v26 }
 0xc23   :  { %5760 = vmatpush3.bf16.msra.mxu0 %v9076_v39  ;;  %5767 = vmatprep.mubr.msk.bf16.mxu0 %vm6275_vm1, %v9042_v52 }
 0xc24   :  { %5761 = vmatprep.subr.bf16.mxu0 %v9042_v52 }
 0xc27   :  { %5762 = vmatpush3.bf16.msra.mxu0 %v9077_v44 }
 0xc28   :  { %5763 = vmatprep.subr.bf16.mxu0 %v9042_v52 }
 0xc2b   :  { %5764 = vmatpush3.bf16.msra.mxu0 %v9086_v63 }
 0xc2c   :  { %5765 = vmatprep.subr.bf16.mxu0 %v9042_v52 }
 0xc2f   :  { %5766 = vmatpush3.bf16.msra.mxu0 %v9087_v28 }
 0xc30   :  { %2728 = vmatprep.subr.bf16.mxu0 %v9113_v43 }
 0xc55   :  { %v2268_v6 = vpop.xlane.xlu0 %2267 }
 0xc56   :  { %vm2269_vm15 = vcmp.eq.f32.partialorder %v7715_v8, %v2268_v6  ;;  %v2333_v8 = vand.u32 65535, %v7743_v7  ;;  %v2274_v7 = vcvt.f32.s32 %v2268_v6 }
 0xc57   :  { %v2282_v3 = vpop.xlane.xlu1 %2281  ;;  %v2270_v53 = vsel %vm2269_vm15, %v2265_v48, inf }
 0xc58   :  { %2271 = vmin.xlane.f32.xlu0 %v2270_v53  ;;  %vm2283_vm0 = vcmp.eq.f32.partialorder %v7718_v46, %v2282_v3  ;;  %v2335_v48 = vcvt.s32.f32 %v2333_v8  ;;  %v2288_v53 = vcvt.f32.s32 %v2282_v3  ;;  %v2275_v37 = vshll.u32 %v2274_v7, 16 }
 0xc59   :  { %v2284_v4 = vsel %vm2283_vm0, %v2279_v33, inf }
 0xc5a   :  { %2285 = vmin.xlane.f32.xlu1 %v2284_v4 }
 0xc5d   :  { %v2296_v38 = vpop.xlane.xlu0 %2295 }
 0xc5e   :  { %vm2297_vm2 = vcmp.eq.f32.partialorder %v7732_v18, %v2296_v38 }
 0xc5f   :  { %v2310_v11 = vpop.xlane.xlu1 %2309  ;;  %v2298_v43 = vsel %vm2297_vm2, %v2293_v36, inf }
 0xc60   :  { %2299 = vmin.xlane.f32.xlu0 %v2298_v43  ;;  %vm2311_vm3 = vcmp.eq.f32.partialorder %v7740_v40, %v2310_v11 }
 0xc61   :  { %v2324_v46 = vpop.xlane.xlu0 %2323  ;;  %v2312_v22 = vsel %vm2311_vm3, %v2307_v35, inf }
 0xc62   :  { %2313 = vmin.xlane.f32.xlu1 %v2312_v22  ;;  %vm2325_vm4 = vcmp.eq.f32.partialorder %v7747_v29, %v2324_v46 }
 0xc63   :  { %v7793_v60 = vpop.xlane.xlu1 %2337  ;;  %v2326_v15 = vsel %vm2325_vm4, %v2321_v49, inf  ;;  %v2302_v49 = vcvt.f32.s32 %v2296_v38  ;;  %v2330_v38 = vcvt.f32.s32 %v2324_v46 }
 0xc64   :  { %2327 = vmin.xlane.f32.xlu0 %v2326_v15  ;;  %vm2339_vm5 = vcmp.eq.f32.partialorder %v7750_v14, %v7793_v60  ;;  %v2289_v14 = vshll.u32 %v2288_v53, 16  ;;  %v2344_v46 = vcvt.f32.s32 %v7793_v60 }
 0xc65   :  { %v2340_v18 = vsel %vm2339_vm5, %v2335_v48, inf  ;;  %v2316_v48 = vcvt.f32.s32 %v2310_v11  ;;  %v2331_v11 = vshll.u32 %v2330_v38, 16 }
 0xc66   :  { %2341 = vmin.xlane.f32.xlu1 %v2340_v18 }
 0xce5   :  { %v2272_v33 = vpop.xlane.xlu0 %2271  ;;  %v7797_v40 = vpop.f32.mrb[84].mxu0 }
 0xce6   :  { %v2273_v4 = vcvt.f32.s32 %v2272_v33  ;;  %v7801_v26 = vpop.f32.mrb[85].mxu0 }
 0xce7   :  { %v2286_v36 = vpop.xlane.xlu1 %2285  ;;  %v7805_v8 = vpop.f32.mrb[86].mxu0 }
 0xce8   :  { %v2276_v43 = vadd.s32 %v2275_v37, %v2273_v4  ;;  %v2287_v6 = vcvt.f32.s32 %v2286_v36  ;;  %v7809_v35 = vpop.f32.mrb[87].mxu0  ;;  %v2303_v37 = vshll.u32 %v2302_v49, 16  ;;  %v2317_v36 = vshll.u32 %v2316_v48, 16 }
 0xcea   :  { %v2290_v15 = vadd.s32 %v2289_v14, %v2287_v6  ;;  %vm2347_vm6 = vcmp.eq.s32.totalorder %v6460_v41, %v2276_v43 }
 0xceb   :  { %v7815_v18 = vsel %vm2347_vm6, 1e+30, %v7600_v24 }
 0xcec   :  { %2524 = vmin.xlane.f32.xlu0 %v7815_v18  ;;  %vm2348_vm8 = vcmp.eq.s32.totalorder %v6460_v41, %v2290_v15 }
 0xced   :  { %v2300_v7 = vpop.xlane.xlu0 %2299  ;;  %v7819_v53 = vpop.f32.mrb[88].mxu0  ;;  %v7822_v33 = vsel %vm2348_vm8, 1e+30, %v7605_v56  ;;  %vm5163_vm9 = vmpackc.low %vm2348_vm8, %vm2347_vm6 }
 0xcee   :  { %v2301_v4 = vcvt.f32.s32 %v2300_v7  ;;  %2526 = vmin.xlane.f32.xlu1 %v7822_v33  ;;  %v7827_v24 = vpop.f32.mrb[89].mxu0  ;;  %5768 = vmatmul.mubr.msk.bf16.vlgmr.msra.gmra.mrb[96].mxu0 %vm5163_vm9, %v9041_v19 }
 0xcef   :  { %v2314_v43 = vpop.xlane.xlu1 %2313  ;;  %v7832_v56 = vpop.f32.mrb[90].mxu0  ;;  %5771 = vmatprep.mubr.msk.bf16.mxu0 %vm6275_vm1, %v9042_v52  ;;  %2729 = vmatpush1.bf16.msra.mxu0 %v7625_v10 }
 0xcf0   :  { %v2304_v6 = vadd.s32 %v2303_v37, %v2301_v4  ;;  %v2315_v49 = vcvt.f32.s32 %v2314_v43  ;;  %v7840_v7 = vpop.f32.mrb[91].mxu0  ;;  %2730 = vmatprep.subr.bf16.mxu0 %v7637_v55  ;;  %v2345_v37 = vshll.u32 %v2344_v46, 16  ;;  %v6269_v55 = vld [vmem:[%s8983_s6 + $0x34] ss:$12 sps:$4 sm:$0xff]  }
 0xcf1   :  { %v2328_v14 = vpop.xlane.xlu0 %2327 }
 0xcf2   :  { %v2318_v22 = vadd.s32 %v2317_v36, %v2315_v49  ;;  %v2329_v3 = vcvt.f32.s32 %v2328_v14  ;;  %vm2349_vm10 = vcmp.eq.s32.totalorder %v6460_v41, %v2304_v6 }
 0xcf3   :  { %v2342_v10 = vpop.xlane.xlu1 %2341  ;;  %v2355_v60 = vsel %vm2349_vm10, 1e+30, %v7647_v59  ;;  %2731 = vmatpush1.bf16.msra.mxu0 %v7652_v0 }
 0xcf4   :  { %v2332_v4 = vadd.s32 %v2331_v11, %v2329_v3  ;;  %v2343_v43 = vcvt.f32.s32 %v2342_v10  ;;  %2528 = vmin.xlane.f32.xlu0 %v2355_v60  ;;  %vm2350_vm11 = vcmp.eq.s32.totalorder %v6460_v41, %v2318_v22  ;;  %2732 = vmatprep.subr.bf16.mxu0 %v6269_v55  ;;  %v6270_v11 = vld [vmem:[%s8983_s6 + $0x30] ss:$12 sps:$4 sm:$0xff]  }
 0xcf5   :  { %v7852_v38 = vpop.f32.mrb[92].mxu0  ;;  %v2356_v36 = vsel %vm2350_vm11, 1e+30, %v7659_v27  ;;  %vm5165_vm12 = vmpackc.low %vm2350_vm11, %vm2349_vm10 }
 0xcf6   :  { %v2346_v14 = vadd.s32 %v2345_v37, %v2343_v43  ;;  %2530 = vmin.xlane.f32.xlu1 %v2356_v36  ;;  %v7857_v0 = vpop.f32.mrb[93].mxu0  ;;  %5772 = vmatmul.mubr.msk.bf16.gmra.mrb[100].mxu0 %vm5165_vm12, %v9041_v19  ;;  %vm2351_vm13 = vcmp.eq.s32.totalorder %v6460_v41, %v2332_v4  ;;  %v6272_v37 = vld [vmem:[%s8983_s6 + $0x48] ss:$12 sps:$4 sm:$0xff]  }
 0xcf7   :  { %v7863_v22 = vpop.f32.mrb[94].mxu0  ;;  %v2357_v27 = vsel %vm2351_vm13, 1e+30, %v7677_v42  ;;  %5775 = vmatprep.mubr.msk.bf16.mxu0 %vm6275_vm1, %v9042_v52  ;;  %2733 = vmatpush1.bf16.msra.mxu0 %v6270_v11  ;;  %v6271_v42 = vld [vmem:[%s8983_s6 + $0x4c] ss:$12 sps:$4 sm:$0xff]  }
 0xcf8   :  { %9114 = vst [vmem:[#allocation10_spill] sm:$0xff] %v7863_v22  ;;  %2532 = vmin.xlane.f32.xlu0 %v2357_v27  ;;  %v7875_v6 = vpop.f32.mrb[95].mxu0  ;;  %vm2352_vm14 = vcmp.eq.s32.totalorder %v6460_v41, %v2346_v14  ;;  %2734 = vmatprep.subr.bf16.mxu0 %v6271_v42 }
 0xcf9   :  { %9115 = vst [vmem:[#allocation9_spill] sm:$0xff] %v7875_v6  ;;  %v2358_v10 = vsel %vm2352_vm14, 1e+30, %v7696_v21  ;;  %vm5167_vm15 = vmpackc.low %vm2352_vm14, %vm2351_vm13 }
 0xcfa   :  { %2534 = vmin.xlane.f32.xlu1 %v2358_v10 }
 0xcfb   :  { %2735 = vmatpush1.bf16.msra.mxu0 %v6272_v37 }
 0xcfe   :  { %5776 = vmatmul.mubr.msk.bf16.gmra.mrb[104].mxu0 %vm5167_vm15, %v9041_v19 }
 0xcff   :  { %2760 = vmatprep.mubr.bf16.mxu0 %v9040_v23 }
 0xd79   :  { %v2525_v43 = vpop.xlane.xlu0 %2524 }
 0xd7a   :  { %vm2536_vm0 = vcmp.eq.f32.partialorder %v7815_v18, %v2525_v43 }
 0xd7b   :  { %v7893_v55 = vsel %vm2536_vm0, %v6460_v41, 128  ;;  %v2527_v21 = vpop.xlane.xlu1 %2526 }
 0xd7c   :  { %v2549_v14 = vshra.s32 %v7893_v55, 16  ;;  %vm2537_vm2 = vcmp.eq.f32.partialorder %v7822_v33, %v2527_v21 }
 0xd7d   :  { %v7898_v11 = vsel %vm2537_vm2, %v6460_v41, 128 }
 0xd7e   :  { %v2563_v4 = vshra.s32 %v7898_v11, 16  ;;  %v7901_v42 = vcvt.s32.f32 %v2549_v14 }
 0xd80   :  { %2552 = vmin.xlane.f32.xlu0 %v7901_v42  ;;  %v7904_v37 = vcvt.s32.f32 %v2563_v4 }
 0xd81   :  { %v2529_v18 = vpop.xlane.xlu0 %2528 }
 0xd82   :  { %vm2538_vm3 = vcmp.eq.f32.partialorder %v2355_v60, %v2529_v18  ;;  %2566 = vmin.xlane.f32.xlu1 %v7904_v37 }
 0xd83   :  { %v7908_v43 = vsel %vm2538_vm3, %v6460_v41, 128  ;;  %v2531_v49 = vpop.xlane.xlu1 %2530 }
 0xd84   :  { %v2577_v33 = vshra.s32 %v7908_v43, 16  ;;  %vm2539_vm4 = vcmp.eq.f32.partialorder %v2356_v36, %v2531_v49 }
 0xd85   :  { %v7912_v21 = vsel %vm2539_vm4, %v6460_v41, 128  ;;  %v2533_v14 = vpop.xlane.xlu0 %2532 }
 0xd86   :  { %v2591_v46 = vshra.s32 %v7912_v21, 16  ;;  %vm2540_vm5 = vcmp.eq.f32.partialorder %v2357_v27, %v2533_v14  ;;  %v7915_v4 = vcvt.s32.f32 %v2577_v33 }
 0xd87   :  { %v7918_v60 = vsel %vm2540_vm5, %v6460_v41, 128  ;;  %v2535_v18 = vpop.xlane.xlu1 %2534 }
 0xd88   :  { %v2605_v3 = vshra.s32 %v7918_v60, 16  ;;  %vm2541_vm6 = vcmp.eq.f32.partialorder %v2358_v10, %v2535_v18  ;;  %2580 = vmin.xlane.f32.xlu0 %v7915_v4  ;;  %v7922_v59 = vcvt.s32.f32 %v2591_v46 }
 0xd89   :  { %v7925_v36 = vsel %vm2541_vm6, %v6460_v41, 128 }
 0xd8a   :  { %v2619_v49 = vshra.s32 %v7925_v36, 16  ;;  %2594 = vmin.xlane.f32.xlu1 %v7922_v59  ;;  %v7929_v27 = vcvt.s32.f32 %v2605_v3 }
 0xd8c   :  { %2608 = vmin.xlane.f32.xlu0 %v7929_v27  ;;  %v7932_v33 = vcvt.s32.f32 %v2619_v49 }
 0xd8e   :  { %2622 = vmin.xlane.f32.xlu1 %v7932_v33 }
 0xdc1   :  { %v2408_v10 = vpop.f32.mrb[96].mxu0 }
 0xdc2   :  { %v2409_v14 = vadd.f32 %v2408_v10, %v6740_v61  ;;  %v5769_v46 = vpop.f32.mrb[97].mxu0 }
 0xdc3   :  { %v2411_v18 = vpop.f32.mrb[98].mxu0 }
 0xdc4   :  { %v2412_v48 = vadd.f32 %v2411_v18, %v6742_v54  ;;  %v5770_v15 = vpop.f32.mrb[99].mxu0  ;;  %v2431_v50 = vmax.f32 %v2409_v14, 0.0 }
 0xdc6   :  { %v2432_v29 = vmax.f32 %v2412_v48, 0.0 }
 0xdc8   :  { %v2437_v6 = vpack.c.bf16 %v2432_v29, %v2431_v50 }
 0xdc9   :  { %v2416_v12 = vpop.f32.mrb[100].mxu0 }
 0xdca   :  { %v2417_v3 = vadd.f32 %v2416_v12, %v6748_v25  ;;  %v5773_v22 = vpop.f32.mrb[101].mxu0  ;;  %5169 = vmatmul.mubr.msk.bf16.vlgmr.msra.gmra.mrb[88].mxu1 %vm741_vm7, %v2437_v6 }
 0xdcb   :  { %5780 = vmatpush3.bf16.msra.mxu1 %v9072_v57  ;;  %v2419_v49 = vpop.f32.mrb[102].mxu0  ;;  %2491 = vmatprep.mubr.bf16.mxu1 %v9040_v23 }
 0xdcc   :  { %v2420_v10 = vadd.f32 %v2419_v49, %v6750_v32  ;;  %v5774_v46 = vpop.f32.mrb[103].mxu0  ;;  %5781 = vmatprep.subr.bf16.mxu1 %v9042_v52  ;;  %v2433_v15 = vmax.f32 %v2417_v3, 0.0 }
 0xdce   :  { %v2434_v14 = vmax.f32 %v2420_v10, 0.0 }
 0xdcf   :  { %5782 = vmatpush3.bf16.msra.mxu1 %v9073_v20 }
 0xdd0   :  { %v2438_v29 = vpack.c.bf16 %v2434_v14, %v2433_v15  ;;  %5783 = vmatprep.subr.bf16.mxu1 %v9042_v52 }
 0xdd1   :  { %v2424_v12 = vpop.f32.mrb[104].mxu0 }
 0xdd2   :  { %v2425_v50 = vadd.f32 %v2424_v12, %v6760_v58  ;;  %v5777_v48 = vpop.f32.mrb[105].mxu0  ;;  %5170 = vmatmul.mubr.msk.bf16.gmra.mrb[92].mxu1 %vm741_vm7, %v2438_v29 }
 0xdd3   :  { %5784 = vmatpush3.bf16.msra.mxu1 %v9074_v47  ;;  %v2427_v57 = vpop.f32.mrb[106].mxu0  ;;  %2501 = vmatprep.mubr.bf16.mxu1 %v9040_v23  ;;  %v2548_v47 = vand.u32 65535, %v7893_v55  ;;  %v2604_v55 = vand.u32 65535, %v7918_v60 }
 0xdd4   :  { %v2428_v22 = vadd.f32 %v2427_v57, %v6763_v13  ;;  %v5778_v6 = vpop.f32.mrb[107].mxu0  ;;  %5785 = vmatprep.subr.bf16.mxu1 %v9042_v52  ;;  %v2435_v20 = vmax.f32 %v2425_v50, 0.0 }
 0xdd5   :  { %v2550_v49 = vcvt.s32.f32 %v2548_v47  ;;  %v2606_v48 = vcvt.s32.f32 %v2604_v55 }
 0xdd6   :  { %v2436_v18 = vmax.f32 %v2428_v22, 0.0 }
 0xdd7   :  { %5786 = vmatpush3.bf16.msra.mxu1 %v9075_v16  ;;  %v2562_v16 = vand.u32 65535, %v7898_v11 }
 0xdd8   :  { %v2439_v3 = vpack.c.bf16 %v2436_v18, %v2435_v20  ;;  %5787 = vmatprep.subr.bf16.mxu1 %v9042_v52 }
 0xdd9   :  { %v2564_v15 = vcvt.s32.f32 %v2562_v16  ;;  %v9117_v16 = vmax.f32 %v7586_v2, %v7801_v26 }
 0xdda   :  { %5171 = vmatmul.mubr.msk.bf16.gmra.mrb[96].mxu1 %vm741_vm7, %v2439_v3  ;;  %v9116_v3 = vmax.f32 %v7581_v51, %v7797_v40  ;;  %v9119_v51 = vmax.f32 %v7596_v62, %v7809_v35 }
 0xddb   :  { %5788 = vmatpush3.bf16.msra.mxu1 %v9076_v39  ;;  %5795 = vmatprep.mubr.msk.bf16.mxu1 %vm6275_vm1, %v9042_v52 }
 0xddc   :  { %5789 = vmatprep.subr.bf16.mxu1 %v9042_v52 }
 0xddf   :  { %5790 = vmatpush3.bf16.msra.mxu1 %v9077_v44  ;;  %v2576_v44 = vand.u32 65535, %v7908_v43 }
 0xde0   :  { %5791 = vmatprep.subr.bf16.mxu1 %v9042_v52 }
 0xde1   :  { %v2578_v11 = vcvt.s32.f32 %v2576_v44  ;;  %v9118_v44 = vmax.f32 %v7591_v34, %v7805_v8  ;;  %v9120_v8 = vmax.f32 %v7611_v31, %v7819_v53  ;;  %v9122_v31 = vmax.f32 %v7632_v17, %v7832_v56 }
 0xde3   :  { %5792 = vmatpush3.bf16.msra.mxu1 %v9086_v63 }
 0xde4   :  { %5793 = vmatprep.subr.bf16.mxu1 %v9042_v52 }
 0xde7   :  { %5794 = vmatpush3.bf16.msra.mxu1 %v9087_v28  ;;  %v2590_v28 = vand.u32 65535, %v7912_v21 }
 0xde9   :  { %v2592_v50 = vcvt.s32.f32 %v2590_v28 }
 0xe0d   :  { %v2553_v39 = vpop.xlane.xlu0 %2552 }
 0xe0e   :  { %vm2554_vm8 = vcmp.eq.f32.partialorder %v7901_v42, %v2553_v39  ;;  %v2618_v42 = vand.u32 65535, %v7925_v36  ;;  %v2559_v36 = vcvt.f32.s32 %v2553_v39 }
 0xe0f   :  { %v2567_v10 = vpop.xlane.xlu1 %2566  ;;  %v2555_v46 = vsel %vm2554_vm8, %v2550_v49, inf }
 0xe10   :  { %2556 = vmin.xlane.f32.xlu0 %v2555_v46  ;;  %vm2568_vm9 = vcmp.eq.f32.partialorder %v7904_v37, %v2567_v10  ;;  %v2620_v57 = vcvt.s32.f32 %v2618_v42  ;;  %v2573_v22 = vcvt.f32.s32 %v2567_v10  ;;  %v2560_v20 = vshll.u32 %v2559_v36, 16 }
 0xe11   :  { %v2569_v63 = vsel %vm2568_vm9, %v2564_v15, inf  ;;  %vm3316_vm9 = vcmp.lt.s32.totalorder %v6460_v41, 38 }
 0xe12   :  { %2570 = vmin.xlane.f32.xlu1 %v2569_v63  ;;  %v2574_v15 = vshll.u32 %v2573_v22, 16 }
 0xe15   :  { %v2581_v14 = vpop.xlane.xlu0 %2580 }
 0xe16   :  { %vm2582_vm10 = vcmp.eq.f32.partialorder %v7915_v4, %v2581_v14  ;;  %v2587_v55 = vcvt.f32.s32 %v2581_v14  ;;  %v9121_v14 = vmax.f32 %v7618_v9, %v7827_v24 }
 0xe17   :  { %v2595_v29 = vpop.xlane.xlu1 %2594  ;;  %v2583_v12 = vsel %vm2582_vm10, %v2578_v11, inf  ;;  %vm3409_vm10 = vcmask 392192  }
 0xe18   :  { %2584 = vmin.xlane.f32.xlu0 %v2583_v12  ;;  %vm2596_vm11 = vcmp.eq.f32.partialorder %v7922_v59, %v2595_v29  ;;  %v2601_v26 = vcvt.f32.s32 %v2595_v29  ;;  %v2588_v12 = vshll.u32 %v2587_v55, 16 }
 0xe19   :  { %v7973_v37 = vpop.xlane.xlu0 %2608  ;;  %v2597_v43 = vsel %vm2596_vm11, %v2592_v50, inf  ;;  %vm3815_vm11 = vcmask 523520  }
 0xe1a   :  { %2598 = vmin.xlane.f32.xlu1 %v2597_v43  ;;  %vm2610_vm12 = vcmp.eq.f32.partialorder %v7929_v27, %v7973_v37  ;;  %v2615_v22 = vcvt.f32.s32 %v7973_v37  ;;  %v9125_v37 = vmax.f32 %v7672_v5, %v7857_v0  ;;  %v6042_v5 = vld [vmem:[%s8981_s5 + $0x50] sm:$0xff]  }
 0xe1b   :  { %v2623_v21 = vpop.xlane.xlu1 %2622  ;;  %v2611_v60 = vsel %vm2610_vm12, %v2606_v48, inf  ;;  %5397 = vmatprep.subr.bf16.mxu0 %v6042_v5  ;;  %v6072_v5 = vld [vmem:[%s8983_s6 + $0x16c] ss:$12 sps:$4 sm:$0xff]   ;;  %vm4077_vm12 = vcmask 785920  }
 0xe1c   :  { %2612 = vmin.xlane.f32.xlu0 %v2611_v60  ;;  %vm2624_vm13 = vcmp.eq.f32.partialorder %v7932_v33, %v2623_v21  ;;  %v2629_v35 = vcvt.f32.s32 %v2623_v21  ;;  %v2602_v60 = vshll.u32 %v2601_v26, 16  ;;  %v9123_v21 = vmax.f32 %v7643_v30, %v7840_v7 }
 0xe1d   :  { %v2625_v4 = vsel %vm2624_vm13, %v2620_v57, inf  ;;  %v2616_v56 = vshll.u32 %v2615_v22, 16  ;;  %v9124_v30 = vmax.f32 %v7664_v45, %v7852_v38  ;;  %v9128_v38 = vld [vmem:[#allocation7_spill] sm:$0xff]  ;;  %vm4339_vm13 = vcmask 1048320  }
 0xe1e   :  { %2626 = vmin.xlane.f32.xlu1 %v2625_v4 }
 0xe9d   :  { %v2557_v6 = vpop.xlane.xlu0 %2556  ;;  %v2483_v59 = vpop.f32.mrb[88].mxu1 }
 0xe9e   :  { %v2558_v18 = vcvt.f32.s32 %v2557_v6  ;;  %v7981_v47 = vmax.f32 %v9116_v3, %v2483_v59  ;;  %v2485_v27 = vpop.f32.mrb[89].mxu1  ;;  %v2630_v59 = vshll.u32 %v2629_v35, 16 }
 0xe9f   :  { %v7986_v49 = vmax.f32 %v9117_v16, %v2485_v27  ;;  %v2571_v33 = vpop.xlane.xlu1 %2570  ;;  %v2487_v46 = vpop.f32.mrb[90].mxu1 }
 0xea0   :  { %v2561_v39 = vadd.s32 %v2560_v20, %v2558_v18  ;;  %v2572_v10 = vcvt.f32.s32 %v2571_v33  ;;  %v7991_v63 = vmax.f32 %v9118_v44, %v2487_v46  ;;  %v2489_v28 = vpop.f32.mrb[91].mxu1 }
 0xea1   :  { %v7996_v40 = vmax.f32 %v9119_v51, %v2489_v28  ;;  %v9129_v28 = vld [vmem:[#allocation9_spill] sm:$0xff] }
 0xea2   :  { %v2575_v2 = vadd.s32 %v2574_v15, %v2572_v10  ;;  %vm2632_vm14 = vcmp.eq.s32.totalorder %v6460_v41, %v2561_v39  ;;  %v9126_v39 = vld [vmem:[#allocation10_spill] sm:$0xff]  ;;  %v9130_v51 = vmax.f32 %v9128_v38, %v9129_v28  ;;  %v6062_v38 = vld [vmem:[%s8983_s6 + $0x138] ss:$12 sps:$4 sm:$0xff]   ;;  %v6068_v28 = vld [vmem:[%s8983_s6 + $0x154] ss:$12 sps:$4 sm:$0xff]  }
 0xea3   :  { %v9127_v10 = vmax.f32 %v7685_v1, %v9126_v39  ;;  %v6058_v39 = vld [vmem:[%s8983_s6 + $0x120] ss:$12 sps:$4 sm:$0xff]  }
 0xea4   :  { %vm2633_vm15 = vcmp.eq.s32.totalorder %v6460_v41, %v2575_v2 }
 0xea5   :  { %vm5178_vm0 = vmpackc.low %vm2633_vm15, %vm2632_vm14  ;;  %v2585_v11 = vpop.xlane.xlu0 %2584  ;;  %v2493_v42 = vpop.f32.mrb[92].mxu1 }
 0xea6   :  { %v2586_v34 = vcvt.f32.s32 %v2585_v11  ;;  %v8003_v50 = vmax.f32 %v9120_v8, %v2493_v42  ;;  %v2495_v62 = vpop.f32.mrb[93].mxu1  ;;  %5796 = vmatmul.mubr.msk.bf16.vlgmr.msra.gmra.mrb[100].mxu1 %vm5178_vm0, %v9041_v19 }
 0xea7   :  { %v8009_v29 = vmax.f32 %v9121_v14, %v2495_v62  ;;  %v2599_v43 = vpop.xlane.xlu1 %2598  ;;  %v2497_v48 = vpop.f32.mrb[94].mxu1  ;;  %5799 = vmatprep.mubr.msk.bf16.mxu1 %vm6275_vm1, %v9042_v52  ;;  %v6044_v62 = vld [vmem:[%s8981_s5 + $0x58] sm:$0xff]  }
 0xea8   :  { %v2589_v57 = vadd.s32 %v2588_v12, %v2586_v34  ;;  %v2600_v4 = vcvt.f32.s32 %v2599_v43  ;;  %v8016_v53 = vmax.f32 %v9122_v31, %v2497_v48  ;;  %v2499_v36 = vpop.f32.mrb[95].mxu1  ;;  %v6047_v31 = vld [vmem:[%s8981_s5 + $0x20] sm:$0xff]  }
 0xea9   :  { %v8021_v9 = vmax.f32 %v9123_v21, %v2499_v36  ;;  %v2613_v24 = vpop.xlane.xlu0 %2612  ;;  %v6048_v21 = vld [vmem:[%s8981_s5 + $0x68] sm:$0xff]  }
 0xeaa   :  { %v2603_v6 = vadd.s32 %v2602_v60, %v2600_v4  ;;  %v2614_v18 = vcvt.f32.s32 %v2613_v24  ;;  %vm2634_vm2 = vcmp.eq.s32.totalorder %v6460_v41, %v2589_v57  ;;  %v6046_v57 = vld [vmem:[%s8981_s5 + $0x60] sm:$0xff]  }
 0xeab   :  { %v2627_v20 = vpop.xlane.xlu1 %2626 }
 0xeac   :  { %v2628_v3 = vcvt.f32.s32 %v2627_v20  ;;  %vm2635_vm3 = vcmp.eq.s32.totalorder %v6460_v41, %v2603_v6  ;;  %v2617_v15 = vadd.s32 %v2616_v56, %v2614_v18  ;;  %v6051_v56 = vld [vmem:[%s8981_s5 + $0x30] sm:$0xff]  }
 0xead   :  { %v2503_v17 = vpop.f32.mrb[96].mxu1  ;;  %vm5180_vm4 = vmpackc.low %vm2635_vm3, %vm2634_vm2 }
 0xeae   :  { %v2631_v27 = vadd.s32 %v2630_v59, %v2628_v3  ;;  %v8029_v7 = vmax.f32 %v9124_v30, %v2503_v17  ;;  %v2505_v16 = vpop.f32.mrb[97].mxu1  ;;  %5800 = vmatmul.mubr.msk.bf16.gmra.mrb[104].mxu1 %vm5180_vm4, %v9041_v19  ;;  %vm2636_vm6 = vcmp.eq.s32.totalorder %v6460_v41, %v2617_v15  ;;  %v6049_v59 = vld [vmem:[%s8981_s5 + $0x28] sm:$0xff]   ;;  %v6050_v3 = vld [vmem:[%s8981_s5 + $0x70] sm:$0xff]   ;;  %v6052_v30 = vld [vmem:[%s8981_s5 + $0x78] sm:$0xff]  }
 0xeaf   :  { %v8035_v33 = vmax.f32 %v9125_v37, %v2505_v16  ;;  %v2507_v46 = vpop.f32.mrb[98].mxu1  ;;  %5803 = vmatprep.mubr.msk.bf16.mxu1 %vm6275_vm1, %v9042_v52  ;;  %v6054_v16 = vld [vmem:[%s8981_s5 + $0x80] sm:$0xff]   ;;  %v6057_v15 = vld [vmem:[%s8981_s5 + $0x48] sm:$0xff]  }
 0xeb0   :  { %v8042_v44 = vmax.f32 %v9127_v10, %v2507_v46  ;;  %v2509_v45 = vpop.f32.mrb[99].mxu1  ;;  %vm2637_vm5 = vcmp.eq.s32.totalorder %v6460_v41, %v2631_v27  ;;  %v6055_v37 = vld [vmem:[%s8981_s5 + $0x40] sm:$0xff]   ;;  %v6056_v46 = vld [vmem:[%s8981_s5 + $0x88] sm:$0xff]  }
 0xeb1   :  { %v8047_v55 = vmax.f32 %v9130_v51, %v2509_v45  ;;  %vm5182_vm8 = vmpackc.low %vm2637_vm5, %vm2636_vm6  ;;  %v6060_v10 = vld [vmem:[%s8983_s6 + $0x124] ss:$12 sps:$4 sm:$0xff]   ;;  %v6064_v45 = vld [vmem:[%s8983_s6 + $0x13c] ss:$12 sps:$4 sm:$0xff]  }
 0xeb2   :  { %3196 = vmatprep.subr.bf16.mxu1 %v6060_v10  ;;  %v6066_v51 = vld [vmem:[%s8983_s6 + $0x150] ss:$12 sps:$4 sm:$0xff]  }
 0xeb3   :  { %3197 = vmatpush1.bf16.msra.mxu1 %v6058_v39  ;;  %v6073_v10 = vld [vmem:[%s8983_s6 + $0x170] ss:$12 sps:$4 sm:$0xff]  }
 0xeb4   :  { %3198 = vmatprep.subr.bf16.mxu1 %v6064_v45 }
 0xeb6   :  { %5804 = vmatmul.mubr.msk.bf16.gmra.mrb[108].mxu1 %vm5182_vm8, %v9041_v19  ;;  %v6043_v19 = vld [vmem:[%s8981_s5 + $0x10] sm:$0xff]  }
 0xeb7   :  { %3228 = vmatprep.mubr.bf16.mxu1 %v9040_v23  ;;  %3199 = vmatpush1.bf16.msra.mxu1 %v6062_v38 }
 0xeb8   :  { %3200 = vmatprep.subr.bf16.mxu1 %v6068_v28 }
 0xebb   :  { %3201 = vmatpush1.bf16.msra.mxu1 %v6066_v51 }
 0xebc   :  { %3202 = vmatprep.subr.bf16.mxu1 %v6072_v5  ;;  %v6084_v5 = vld [vmem:[%s8983_s6 + $0x1b4] ss:$12 sps:$4 sm:$0xff]  }
 0xf79   :  { %v2687_v1 = vpop.f32.mrb[100].mxu1 }
 0xf7a   :  { %v2688_v0 = vadd.f32 %v2687_v1, %v6740_v61  ;;  %v5797_v2 = vpop.f32.mrb[101].mxu1  ;;  %v6070_v1 = vld [vmem:[%s8983_s6 + $0x168] ss:$12 sps:$4 sm:$0xff]  }
 0xf7b   :  { %v2690_v26 = vpop.f32.mrb[102].mxu1  ;;  %3203 = vmatpush1.bf16.msra.mxu1 %v6070_v1  ;;  %v6074_v2 = vld [vmem:[%s8983_s6 + $0x180] ss:$12 sps:$4 sm:$0xff]   ;;  %v6082_v1 = vld [vmem:[%s8983_s6 + $0x1b0] ss:$12 sps:$4 sm:$0xff]  }
 0xf7c   :  { %v2691_v11 = vadd.f32 %v2690_v26, %v6742_v54  ;;  %v5798_v42 = vpop.f32.mrb[103].mxu1  ;;  %v2710_v12 = vmax.f32 %v2688_v0, 0.0  ;;  %v6045_v54 = vld [vmem:[%s8981_s5 + $0x18] sm:$0xff]   ;;  %v6076_v0 = vld [vmem:[%s8983_s6 + $0x184] ss:$12 sps:$4 sm:$0xff]  }
 0xf7d   :  { %3204 = vmatprep.subr.bf16.mxu1 %v6076_v0  ;;  %v6080_v26 = vld [vmem:[%s8983_s6 + $0x19c] ss:$12 sps:$4 sm:$0xff]   ;;  %v9131_v42 = vlaneseq  ;;  %v6085_v0 = vld [vmem:[%s8983_s6 + $0x1b8] ss:$12 sps:$4 sm:$0xff]  }
 0xf7e   :  { %v2711_v34 = vmax.f32 %v2691_v11, 0.0  ;;  %v6078_v11 = vld [vmem:[%s8983_s6 + $0x198] ss:$12 sps:$4 sm:$0xff]  }
 0xf7f   :  { %3205 = vmatpush1.bf16.msra.mxu1 %v6074_v2  ;;  %v6088_v2 = vld [vmem:[%s8983_s6 + $0x1cc] ss:$12 sps:$4 sm:$0xff]  }
 0xf80   :  { %v2716_v8 = vpack.c.bf16 %v2711_v34, %v2710_v12  ;;  %3206 = vmatprep.subr.bf16.mxu1 %v6080_v26  ;;  %v8150_v12 = vshrl.u32 %v9131_v42, 7  ;;  %v6086_v26 = vld [vmem:[%s8983_s6 + $0x1c8] ss:$12 sps:$4 sm:$0xff]  }
 0xf81   :  { %v2695_v35 = vpop.f32.mrb[104].mxu1 }
 0xf82   :  { %v2696_v14 = vadd.f32 %v2695_v35, %v6748_v25  ;;  %v5801_v61 = vpop.f32.mrb[105].mxu1  ;;  %5184 = vmatmul.mubr.msk.bf16.vlgmr.msra.gmra.mrb[108].mxu0 %vm741_vm7, %v2716_v8  ;;  %v8153_v34 = vsub.s32 0, %v8150_v12  ;;  %v8159_v8 = vsub.s32 1, %v8150_v12 }
 0xf83   :  { %v2698_v43 = vpop.f32.mrb[106].mxu1  ;;  %2770 = vmatprep.mubr.bf16.mxu0 %v9040_v23  ;;  %5398 = vmatpush3.bf16.msra.mxu0 %v6043_v19  ;;  %v5031_v19 = vld [vmem:[%s8984_s7 + $0x1] ss:$8 sm:$0x3] }
 0xf84   :  { %v2699_v48 = vadd.f32 %v2698_v43, %v6750_v32  ;;  %v5802_v60 = vpop.f32.mrb[107].mxu1  ;;  %5399 = vmatprep.subr.bf16.mxu0 %v6044_v62  ;;  %v2712_v25 = vmax.f32 %v2696_v14, 0.0  ;;  %3207 = vmatpush1.bf16.msra.mxu1 %v6078_v11  ;;  %v2807_v14 = vrot.slane %v5031_v19, %v8153_v34  ;;  %v6089_v11 = vld [vmem:[%s8983_s6 + $0x1d0] ss:$12 sps:$4 sm:$0xff]  }
 0xf85   :  { %3208 = vmatprep.subr.bf16.mxu1 %v6084_v5 }
 0xf86   :  { %v2713_v4 = vmax.f32 %v2699_v48, 0.0 }
 0xf87   :  { %5400 = vmatpush3.bf16.msra.mxu0 %v6045_v54  ;;  %v2811_v54 = vrot.slane %v5031_v19, %v8159_v8 }
 0xf88   :  { %v2717_v36 = vpack.c.bf16 %v2713_v4, %v2712_v25  ;;  %5401 = vmatprep.subr.bf16.mxu0 %v6046_v57  ;;  %3209 = vmatpush1.bf16.msra.mxu1 %v6082_v1 }
 0xf89   :  { %v2703_v32 = vpop.f32.mrb[108].mxu1  ;;  %3210 = vmatprep.subr.bf16.mxu1 %v6088_v2 }
 0xf8a   :  { %v2704_v24 = vadd.f32 %v2703_v32, %v6760_v58  ;;  %v5805_v22 = vpop.f32.mrb[109].mxu1  ;;  %5185 = vmatmul.mubr.msk.bf16.gmra.mrb[112].mxu0 %vm741_vm7, %v2717_v36 }
 0xf8b   :  { %v2706_v6 = vpop.f32.mrb[110].mxu1  ;;  %2780 = vmatprep.mubr.bf16.mxu0 %v9040_v23  ;;  %5402 = vmatpush3.bf16.msra.mxu0 %v6047_v31  ;;  %v6061_v22 = vld [vmem:[%s8983_s6 + $0x128] ss:$12 sps:$4 sm:$0xff]  }
 0xf8c   :  { %v2707_v20 = vadd.f32 %v2706_v6, %v6763_v13  ;;  %v5806_v18 = vpop.f32.mrb[111].mxu1  ;;  %5403 = vmatprep.subr.bf16.mxu0 %v6048_v21  ;;  %v2714_v58 = vmax.f32 %v2704_v24, 0.0  ;;  %v6053_v13 = vld [vmem:[%s8981_s5 + $0x38] sm:$0xff]   ;;  %3211 = vmatpush1.bf16.msra.mxu1 %v6086_v26 }
 0xf8d   :  { %5835 = vmatprep.subr.bf16.mxu1 %v9042_v52 }
 0xf8e   :  { %v2715_v17 = vmax.f32 %v2707_v20, 0.0 }
 0xf8f   :  { %5404 = vmatpush3.bf16.msra.mxu0 %v6049_v59 }
 0xf90   :  { %v2718_v27 = vpack.c.bf16 %v2715_v17, %v2714_v58  ;;  %5405 = vmatprep.subr.bf16.mxu0 %v6050_v3  ;;  %v6065_v3 = vld [vmem:[%s8983_s6 + $0x140] ss:$12 sps:$4 sm:$0xff]  }
 0xf92   :  { %5186 = vmatmul.mubr.msk.bf16.gmra.mrb[116].mxu0 %vm741_vm7, %v2718_v27  ;;  %vm3333_vm7 = vcmask 261120  }
 0xf93   :  { %5406 = vmatpush3.bf16.msra.mxu0 %v6051_v56 }
 0xf94   :  { %5407 = vmatprep.subr.bf16.mxu0 %v6052_v30 }
 0xf97   :  { %5408 = vmatpush3.bf16.msra.mxu0 %v6053_v13 }
 0xf98   :  { %5409 = vmatprep.subr.bf16.mxu0 %v6054_v16 }
 0xf9b   :  { %5410 = vmatpush3.bf16.msra.mxu0 %v6055_v37 }
 0xf9c   :  { %5411 = vmatprep.subr.bf16.mxu0 %v6056_v46 }
 0xf9f   :  { %5412 = vmatpush3.bf16.msra.mxu0 %v6057_v15 }
 0xfa0   :  { %5807 = vmatprep.subr.bf16.mxu0 %v9042_v52 }
0x1055   :  { %v2762_v62 = vpop.f32.mrb[108].mxu0 }
0x1056   :  { %v2791_v35 = vmax.f32 %v7981_v47, %v2762_v62  ;;  %v2764_v61 = vpop.f32.mrb[109].mxu0 }
0x1057   :  { %v2792_v43 = vmax.f32 %v7986_v49, %v2764_v61  ;;  %v2766_v48 = vpop.f32.mrb[110].mxu0 }
0x1058   :  { %v2793_v60 = vmax.f32 %v7991_v63, %v2766_v48  ;;  %v2768_v57 = vpop.f32.mrb[111].mxu0  ;;  %v2814_v4 = vadd.f32 %v2807_v14, %v2791_v35 }
0x1059   :  { %v2794_v25 = vmax.f32 %v7996_v40, %v2768_v57  ;;  %v2815_v36 = vadd.f32 %v2811_v54, %v2792_v43 }
0x105a   :  { %v2816_v31 = vadd.f32 %v2807_v14, %v2793_v60 }
0x105b   :  { %v2817_v21 = vadd.f32 %v2811_v54, %v2794_v25 }
0x105c   :  { %v2826_v32 = vpack.c.bf16 %v2816_v31, %v2814_v4 }
0x105d   :  { %v2772_v24 = vpop.f32.mrb[112].mxu0  ;;  %v2827_v47 = vpack.c.bf16 %v2817_v21, %v2815_v36 }
0x105e   :  { %v2795_v49 = vmax.f32 %v8003_v50, %v2772_v24  ;;  %v2774_v6 = vpop.f32.mrb[113].mxu0 }
0x105f   :  { %v2796_v59 = vmax.f32 %v8009_v29, %v2774_v6  ;;  %v2776_v63 = vpop.f32.mrb[114].mxu0  ;;  %2992 = vmatprep.mubr.bf16.mxu0 %v2827_v47 }
0x1060   :  { %v2797_v40 = vmax.f32 %v8016_v53, %v2776_v63  ;;  %v2778_v20 = vpop.f32.mrb[115].mxu0  ;;  %2993 = vmatmul.mubr.bf16.vlgmr.msra.gmra.mrb[120].mxu0 %v2826_v32  ;;  %v2818_v58 = vadd.f32 %v2807_v14, %v2795_v49  ;;  %v6069_v53 = vld [vmem:[%s8983_s6 + $0x158] ss:$12 sps:$4 sm:$0xff]  }
0x1061   :  { %v2798_v18 = vmax.f32 %v8021_v9, %v2778_v20  ;;  %5808 = vmatpush3.bf16.msra.mxu0 %v6061_v22  ;;  %v2819_v50 = vadd.f32 %v2811_v54, %v2796_v59 }
0x1062   :  { %v2820_v17 = vadd.f32 %v2807_v14, %v2797_v40  ;;  %5809 = vmatprep.subr.bf16.mxu0 %v9042_v52 }
0x1063   :  { %v2821_v56 = vadd.f32 %v2811_v54, %v2798_v18 }
0x1064   :  { %v2828_v29 = vpack.c.bf16 %v2820_v17, %v2818_v58  ;;  %v5032_v58 = vld [vmem:[%s8984_s7 + $0x3] ss:$8 sm:$0x7]  ;;  %v3063_v17 = vsub.s32 2, %v8150_v12 }
0x1065   :  { %v2782_v27 = vpop.f32.mrb[116].mxu0  ;;  %v2829_v30 = vpack.c.bf16 %v2821_v56, %v2819_v50  ;;  %5810 = vmatpush3.bf16.msra.mxu0 %v6065_v3  ;;  %v3056_v50 = vrot.slane %v5032_v58, %v8153_v34 }
0x1066   :  { %v2799_v9 = vmax.f32 %v8029_v7, %v2782_v27  ;;  %v2784_v13 = vpop.f32.mrb[117].mxu0  ;;  %5811 = vmatprep.subr.bf16.mxu0 %v9042_v52  ;;  %v3064_v56 = vrot.slane %v5032_v58, %v3063_v17 }
0x1067   :  { %v2800_v16 = vmax.f32 %v8035_v33, %v2784_v13  ;;  %v2786_v37 = vpop.f32.mrb[118].mxu0  ;;  %3000 = vmatprep.mubr.bf16.mxu0 %v2829_v30  ;;  %v3060_v30 = vrot.slane %v5032_v58, %v8159_v8 }
0x1068   :  { %v2801_v46 = vmax.f32 %v8042_v44, %v2786_v37  ;;  %v2788_v15 = vpop.f32.mrb[119].mxu0  ;;  %3001 = vmatmul.mubr.bf16.gmra.mrb[124].mxu0 %v2828_v29  ;;  %v2822_v45 = vadd.f32 %v2807_v14, %v2799_v9  ;;  %v6077_v44 = vld [vmem:[%s8983_s6 + $0x188] ss:$12 sps:$4 sm:$0xff]  }
0x1069   :  { %v2802_v39 = vmax.f32 %v8047_v55, %v2788_v15  ;;  %5812 = vmatpush3.bf16.msra.mxu0 %v6069_v53  ;;  %v2823_v38 = vadd.f32 %v2811_v54, %v2800_v16  ;;  %v6081_v55 = vld [vmem:[%s8983_s6 + $0x1a0] ss:$12 sps:$4 sm:$0xff]  }
0x106a   :  { %v2824_v7 = vadd.f32 %v2807_v14, %v2801_v46  ;;  %5813 = vmatprep.subr.bf16.mxu0 %v9042_v52  ;;  %v33_v14 = vld [vmem:[%s8984_s7 + $0x2] ss:$0 sm:$0xff] }
0x106b   :  { %v2825_v28 = vadd.f32 %v2811_v54, %v2802_v39 }
0x106c   :  { %v2830_v33 = vpack.c.bf16 %v2824_v7, %v2822_v45 }
0x106d   :  { %v2831_v51 = vpack.c.bf16 %v2825_v28, %v2823_v38  ;;  %5814 = vmatpush3.bf16.msra.mxu0 %v6073_v10 }
0x106e   :  { %5815 = vmatprep.subr.bf16.mxu0 %v9042_v52 }
0x106f   :  { %3008 = vmatprep.mubr.bf16.mxu0 %v2831_v51 }
0x1070   :  { %3009 = vmatmul.mubr.bf16.gmra.mrb[128].mxu0 %v2830_v33 }
0x1071   :  { %5816 = vmatpush3.bf16.msra.mxu0 %v6077_v44  ;;  %5823 = vmatprep.mubr.msk.bf16.mxu0 %vm6275_vm1, %v9042_v52 }
0x1072   :  { %5817 = vmatprep.subr.bf16.mxu0 %v9042_v52 }
0x1075   :  { %5818 = vmatpush3.bf16.msra.mxu0 %v6081_v55 }
0x1076   :  { %5819 = vmatprep.subr.bf16.mxu0 %v9042_v52 }
0x1079   :  { %5820 = vmatpush3.bf16.msra.mxu0 %v6085_v0 }
0x107a   :  { %5821 = vmatprep.subr.bf16.mxu0 %v9042_v52 }
0x107d   :  { %5822 = vmatpush3.bf16.msra.mxu0 %v6089_v11 }
0x107e   :  { %5871 = vmatprep.subr.bf16.mxu0 %v9042_v52 }
0x1133   :  { %v5413_v42 = vpop.f32.mrb[120].mxu0 }
0x1134   :  { %v5414_v19 = vpop.f32.mrb[121].mxu0 }
0x1135   :  { %v5415_v62 = vadd.f32 %v5414_v19, %v5413_v42  ;;  %v5416_v35 = vpop.f32.mrb[122].mxu0 }
0x1136   :  { %v5417_v61 = vpop.f32.mrb[123].mxu0 }
0x1137   :  { %v5418_v43 = vadd.f32 %v5417_v61, %v5416_v35  ;;  %v8225_v54 = vadd.f32 %v5415_v62, %v33_v14 }
0x1139   :  { %v8227_v48 = vadd.f32 %v5418_v43, %v33_v14 }
0x113b   :  { %v3017_v60 = vpack.c.bf16 %v8227_v48, %v8225_v54  ;;  %v5419_v57 = vpop.f32.mrb[124].mxu0 }
0x113c   :  { %v5420_v25 = vpop.f32.mrb[125].mxu0 }
0x113d   :  { %v5421_v4 = vadd.f32 %v5420_v25, %v5419_v57  ;;  %v5422_v31 = vpop.f32.mrb[126].mxu0  ;;  %3229 = vmatmul.mubr.bf16.vlgmr.msra.gmra.mrb[112].mxu1 %v3017_v60  ;;  %5824 = vmatmul.mubr.bf16.vlgmr.msra.gmra.mrb[132].mxu0 %v3017_v60 }
0x113e   :  { %v5423_v36 = vpop.f32.mrb[127].mxu0  ;;  %3238 = vmatprep.mubr.bf16.mxu1 %v9040_v23  ;;  %5827 = vmatprep.mubr.msk.bf16.mxu0 %vm6275_vm1, %v9042_v52 }
0x113f   :  { %v5424_v21 = vadd.f32 %v5423_v36, %v5422_v31  ;;  %v8234_v32 = vadd.f32 %v5421_v4, %v33_v14 }
0x1141   :  { %v8236_v24 = vadd.f32 %v5424_v21, %v33_v14 }
0x1143   :  { %v5425_v47 = vpop.f32.mrb[128].mxu0  ;;  %v3018_v22 = vpack.c.bf16 %v8236_v24, %v8234_v32 }
0x1144   :  { %v5426_v49 = vpop.f32.mrb[129].mxu0 }
0x1145   :  { %v5427_v6 = vadd.f32 %v5426_v49, %v5425_v47  ;;  %v5428_v59 = vpop.f32.mrb[130].mxu0  ;;  %3239 = vmatmul.mubr.bf16.gmra.mrb[116].mxu1 %v3018_v22  ;;  %5828 = vmatmul.mubr.bf16.gmra.mrb[136].mxu0 %v3018_v22 }
0x1146   :  { %v5429_v63 = vpop.f32.mrb[131].mxu0  ;;  %3248 = vmatprep.mubr.bf16.mxu1 %v9040_v23  ;;  %5831 = vmatprep.mubr.msk.bf16.mxu0 %vm6275_vm1, %v9042_v52 }
0x1147   :  { %v5430_v40 = vadd.f32 %v5429_v63, %v5428_v59  ;;  %v8243_v20 = vadd.f32 %v5427_v6, %v33_v14 }
0x1149   :  { %v8245_v18 = vadd.f32 %v5430_v40, %v33_v14 }
0x114b   :  { %v3019_v3 = vpack.c.bf16 %v8245_v18, %v8243_v20 }
0x114d   :  { %3249 = vmatmul.mubr.bf16.gmra.mrb[120].mxu1 %v3019_v3  ;;  %5832 = vmatmul.mubr.bf16.gmra.mrb[140].mxu0 %v3019_v3 }
0x114e   :  { %5841 = vmatprep.mubr.msk.bf16.mxu1 %vm6275_vm1, %v9042_v52  ;;  %5877 = vmatprep.mubr.msk.bf16.mxu0 %vm6275_vm1, %v9042_v52 }
0x1210   :  { %v3230_v29 = vpop.f32.mrb[112].mxu1  ;;  %v3293_v27 = vpop.f32.mrb[132].mxu0 }
0x1211   :  { %v3231_v53 = vadd.f32 %v3230_v29, %v3056_v50  ;;  %v3232_v9 = vpop.f32.mrb[113].mxu1  ;;  %v5825_v13 = vpop.f32.mrb[133].mxu0  ;;  %v3294_v46 = vadd.f32 %v3293_v27, %v3064_v56 }
0x1212   :  { %v3234_v16 = vpop.f32.mrb[114].mxu1  ;;  %v3296_v37 = vpop.f32.mrb[134].mxu0  ;;  %v3233_v7 = vadd.f32 %v3232_v9, %v3060_v30 }
0x1213   :  { %v3235_v15 = vadd.f32 %v3234_v16, %v3056_v50  ;;  %v3297_v39 = vadd.f32 %v3296_v37, %v3064_v56  ;;  %v3236_v10 = vpop.f32.mrb[115].mxu1  ;;  %v5826_v45 = vpop.f32.mrb[135].mxu0  ;;  %v3318_v12 = vmul.f32 0.17677669, %v3231_v53 }
0x1214   :  { %v3237_v38 = vadd.f32 %v3236_v10, %v3060_v30 }
0x1215   :  { %v3319_v28 = vmul.f32 0.17677669, %v3235_v15  ;;  %v8259_v33 = vpack.c.bf16 %v3297_v39, %v3294_v46 }
0x1216   :  { %v8261_v51 = vpack.c.bf16 %v3237_v38, %v3233_v7 }
0x1217   :  { %v8263_v44 = vpack.c.bf16 %v3319_v28, %v3318_v12 }
0x1218   :  { %v3240_v55 = vpop.f32.mrb[116].mxu1  ;;  %3563 = vrot.lane.b32.xlu0 %v8261_v51, %s6277_s25  ;;  %v3301_v5 = vpop.f32.mrb[136].mxu0  ;;  %v3344_v1 = vsel %vm3333_vm7, %v8261_v51, 0 }
0x1219   :  { %v3241_v0 = vadd.f32 %v3240_v55, %v3056_v50  ;;  %v3242_v2 = vpop.f32.mrb[117].mxu1  ;;  %v5829_v26 = vpop.f32.mrb[137].mxu0  ;;  %5836 = vmatpush3.bf16.xpose.msra.mxu1 %v3344_v1  ;;  %v3302_v19 = vadd.f32 %v3301_v5, %v3064_v56 }
0x121a   :  { %v3244_v11 = vpop.f32.mrb[118].mxu1  ;;  %v3304_v42 = vpop.f32.mrb[138].mxu0  ;;  %5837 = vmatprep.subr.bf16.mxu1 %v9042_v52  ;;  %v3243_v43 = vadd.f32 %v3242_v2, %v3060_v30 }
0x121b   :  { %v3245_v62 = vadd.f32 %v3244_v11, %v3056_v50  ;;  %v3305_v35 = vadd.f32 %v3304_v42, %v3064_v56  ;;  %v3246_v14 = vpop.f32.mrb[119].mxu1  ;;  %v5830_v61 = vpop.f32.mrb[139].mxu0  ;;  %v3320_v57 = vmul.f32 0.17677669, %v3241_v0 }
0x121c   :  { %v3247_v60 = vadd.f32 %v3246_v14, %v3060_v30  ;;  %3554 = vrot.lane.b32.xlu0 %v8263_v44, %s6277_s25 }
0x121d   :  { %v3321_v25 = vmul.f32 0.17677669, %v3245_v62  ;;  %v8272_v4 = vpack.c.bf16 %v3305_v35, %v3302_v19 }
0x121e   :  { %v3328_v31 = vpack.c.bf16 %v3247_v60, %v3243_v43 }
0x121f   :  { %v3325_v36 = vpack.c.bf16 %v3321_v25, %v3320_v57  ;;  %v6280_v25 = vmov -1e+30  }
0x1220   :  { %3565 = vrot.lane.b32.xlu1 %v3328_v31, %s6277_s25  ;;  %v3250_v21 = vpop.f32.mrb[120].mxu1  ;;  %v3309_v47 = vpop.f32.mrb[140].mxu0  ;;  %v3347_v22 = vsel %vm3333_vm7, %v3328_v31, 0 }
0x1221   :  { %v3251_v49 = vadd.f32 %v3250_v21, %v3056_v50  ;;  %5838 = vmatpush3.bf16.xpose.msra.mxu1 %v3347_v22  ;;  %3556 = vrot.lane.b32.xlu0 %v3325_v36, %s6277_s25  ;;  %v3252_v6 = vpop.f32.mrb[121].mxu1  ;;  %v5833_v59 = vpop.f32.mrb[141].mxu0  ;;  %v3310_v3 = vadd.f32 %v3309_v47, %v3064_v56 }
0x1222   :  { %v3254_v63 = vpop.f32.mrb[122].mxu1  ;;  %v3312_v40 = vpop.f32.mrb[142].mxu0  ;;  %5839 = vmatprep.subr.bf16.mxu1 %v9042_v52  ;;  %v3253_v53 = vadd.f32 %v3252_v6, %v3060_v30 }
0x1223   :  { %v3255_v58 = vadd.f32 %v3254_v63, %v3056_v50  ;;  %v3313_v17 = vadd.f32 %v3312_v40, %v3064_v56  ;;  %v3256_v29 = vpop.f32.mrb[123].mxu1  ;;  %v5834_v27 = vpop.f32.mrb[143].mxu0  ;;  %v3322_v13 = vmul.f32 0.17677669, %v3251_v49 }
0x1224   :  { %v3257_v9 = vadd.f32 %v3256_v29, %v3060_v30 }
0x1225   :  { %v3323_v16 = vmul.f32 0.17677669, %v3255_v58  ;;  %v8278_v37 = vpack.c.bf16 %v3313_v17, %v3310_v3 }
0x1226   :  { %v3329_v46 = vpack.c.bf16 %v3257_v9, %v3253_v53 }
0x1227   :  { %v3326_v15 = vpack.c.bf16 %v3323_v16, %v3322_v13 }
0x1228   :  { %3567 = vrot.lane.b32.xlu1 %v3329_v46, %s6277_s25  ;;  %v3350_v39 = vsel %vm3333_vm7, %v3329_v46, 0 }
0x1229   :  { %5840 = vmatpush3.bf16.xpose.msra.mxu1 %v3350_v39  ;;  %3558 = vrot.lane.b32.xlu0 %v3326_v15, %s6277_s25 }
0x122a   :  { %5853 = vmatprep.subr.bf16.mxu1 %v9042_v52 }
0x122c   :  { %3828 = vrot.lane.b32.xlu1 %v8261_v51, %s6278_s26 }
0x122d   :  { %3822 = vrot.lane.b32.xlu0 %v8263_v44, %s6278_s26 }
0x1230   :  { %3830 = vrot.lane.b32.xlu1 %v3328_v31, %s6278_s26  ;;  %5842 = vmatmul.mubr.msk.bf16.vlgmr.msra.gmra.mrb[124].mxu1 %vm3333_vm7, %v8263_v44 }
0x1231   :  { %5854 = vmatpush3.bf16.msra.mxu1 %v8259_v33  ;;  %3824 = vrot.lane.b32.xlu0 %v3325_v36, %s6278_s26 }
0x1232   :  { %5855 = vmatprep.subr.bf16.mxu1 %v9042_v52  ;;  %5845 = vmatprep.mubr.msk.bf16.mxu1 %vm6275_vm1, %v9042_v52 }
0x1234   :  { %3832 = vrot.lane.b32.xlu1 %v3329_v46, %s6278_s26 }
0x1235   :  { %5856 = vmatpush3.bf16.msra.mxu1 %v8272_v4  ;;  %3826 = vrot.lane.b32.xlu0 %v3326_v15, %s6278_s26 }
0x1236   :  { %5857 = vmatprep.subr.bf16.mxu1 %v9042_v52 }
0x1238   :  { %4090 = vrot.lane.b32.xlu1 %v8261_v51, %s6279_s27  ;;  %5846 = vmatmul.mubr.msk.bf16.gmra.mrb[128].mxu1 %vm3333_vm7, %v3325_v36 }
0x1239   :  { %5858 = vmatpush3.bf16.msra.mxu1 %v8278_v37  ;;  %4084 = vrot.lane.b32.xlu0 %v8263_v44, %s6279_s27 }
0x123a   :  { %5849 = vmatprep.mubr.msk.bf16.mxu1 %vm6275_vm1, %v9042_v52  ;;  %5889 = vmatprep.subr.bf16.mxu1 %v9042_v52 }
0x123c   :  { %4092 = vrot.lane.b32.xlu1 %v3328_v31, %s6279_s27  ;;  %v8370_v31 = vsel %vm3316_vm9, 0.0, %v6280_v25 }
0x123d   :  { %4088 = vrot.lane.b32.xlu0 %v3326_v15, %s6279_s27 }
0x1240   :  { %4094 = vrot.lane.b32.xlu1 %v3329_v46, %s6279_s27  ;;  %5850 = vmatmul.mubr.msk.bf16.gmra.mrb[132].mxu1 %vm3333_vm7, %v3326_v15 }
0x1241   :  { %3716 = vrot.lane.b32.xlu0 %v8259_v33, %s6277_s25  ;;  %5859 = vmatprep.mubr.msk.bf16.mxu1 %vm6275_vm1, %v9042_v52 }
0x1244   :  { %4086 = vrot.lane.b32.xlu1 %v3325_v36, %s6279_s27 }
0x1245   :  { %3720 = vrot.lane.b32.xlu0 %v8278_v37, %s6277_s25 }
0x1248   :  { %3718 = vrot.lane.b32.xlu1 %v8272_v4, %s6277_s25 }
0x124c   :  { %3978 = vrot.lane.b32.xlu1 %v8259_v33, %s6278_s26 }
0x128a   :  { %v3564_v50 = vpop.permute.xlu0 %3563 }
0x128b   :  { %v3579_v56 = vsel %vm3333_vm7, %v3564_v50, 0 }
0x128c   :  { %5872 = vmatpush3.bf16.xpose.msra.mxu0 %v3579_v56 }
0x128d   :  { %5873 = vmatprep.subr.bf16.mxu0 %v9042_v52 }
0x128e   :  { %v3555_v12 = vpop.permute.xlu0 %3554 }
0x1292   :  { %v3566_v30 = vpop.permute.xlu1 %3565 }
0x1293   :  { %v3582_v10 = vsel %vm3333_vm7, %v3566_v30, 0  ;;  %v3557_v44 = vpop.permute.xlu0 %3556 }
0x1294   :  { %5874 = vmatpush3.bf16.xpose.msra.mxu0 %v3582_v10 }
0x1295   :  { %5875 = vmatprep.subr.bf16.mxu0 %v9042_v52 }
0x129a   :  { %v3568_v45 = vpop.permute.xlu1 %3567 }
0x129b   :  { %v3585_v7 = vsel %vm3333_vm7, %v3568_v45, 0  ;;  %v3559_v1 = vpop.permute.xlu0 %3558 }
0x129c   :  { %5876 = vmatpush3.bf16.xpose.msra.mxu0 %v3585_v7 }
0x129d   :  { %5907 = vmatprep.subr.bf16.mxu0 %v9042_v52 }
0x129e   :  { %v3829_v38 = vpop.permute.xlu1 %3828 }
0x129f   :  { %v3844_v28 = vsel %vm3333_vm7, %v3829_v38, 0  ;;  %v3823_v26 = vpop.permute.xlu0 %3822 }
0x12a2   :  { %v3831_v51 = vpop.permute.xlu1 %3830 }
0x12a3   :  { %5878 = vmatmul.mubr.msk.bf16.vlgmr.msra.gmra.mrb[144].mxu0 %vm3333_vm7, %v3555_v12  ;;  %v3847_v55 = vsel %vm3333_vm7, %v3831_v51, 0  ;;  %v3825_v19 = vpop.permute.xlu0 %3824 }
0x12a4   :  { %5908 = vmatpush3.bf16.xpose.msra.mxu0 %v3844_v28  ;;  %5881 = vmatprep.mubr.msk.bf16.mxu0 %vm6275_vm1, %v9042_v52 }
0x12a5   :  { %5909 = vmatprep.subr.bf16.mxu0 %v9042_v52 }
0x12a6   :  { %v3833_v5 = vpop.permute.xlu1 %3832 }
0x12a7   :  { %v3850_v0 = vsel %vm3333_vm7, %v3833_v5, 0  ;;  %v3827_v14 = vpop.permute.xlu0 %3826 }
0x12aa   :  { %v4091_v2 = vpop.permute.xlu1 %4090 }
0x12ab   :  { %5882 = vmatmul.mubr.msk.bf16.gmra.mrb[148].mxu0 %vm3333_vm7, %v3557_v44  ;;  %v4106_v11 = vsel %vm3333_vm7, %v4091_v2, 0  ;;  %v4085_v43 = vpop.permute.xlu0 %4084 }
0x12ac   :  { %5910 = vmatpush3.bf16.xpose.msra.mxu0 %v3847_v55  ;;  %5885 = vmatprep.mubr.msk.bf16.mxu0 %vm6275_vm1, %v9042_v52 }
0x12ad   :  { %5911 = vmatprep.subr.bf16.mxu0 %v9042_v52 }
0x12ae   :  { %v4093_v42 = vpop.permute.xlu1 %4092 }
0x12af   :  { %v4109_v62 = vsel %vm3333_vm7, %v4093_v42, 0  ;;  %v4089_v57 = vpop.permute.xlu0 %4088 }
0x12b2   :  { %v4095_v35 = vpop.permute.xlu1 %4094 }
0x12b3   :  { %5886 = vmatmul.mubr.msk.bf16.gmra.mrb[152].mxu0 %vm3333_vm7, %v3559_v1  ;;  %v4112_v61 = vsel %vm3333_vm7, %v4095_v35, 0  ;;  %v8434_v25 = vpop.permute.xlu0 %3716 }
0x12b4   :  { %5912 = vmatpush3.bf16.xpose.msra.mxu0 %v3850_v0  ;;  %5913 = vmatprep.mubr.msk.bf16.mxu0 %vm6275_vm1, %v9042_v52 }
0x12b5   :  { %5943 = vmatprep.subr.bf16.mxu0 %v9042_v52 }
0x12b6   :  { %v4087_v60 = vpop.permute.xlu1 %4086 }
0x12bb   :  { %5914 = vmatmul.mubr.msk.bf16.vlgmr.msra.gmra.mrb[156].mxu0 %vm3333_vm7, %v3823_v26 }
0x12bc   :  { %5944 = vmatpush3.bf16.xpose.msra.mxu0 %v4106_v11  ;;  %5917 = vmatprep.mubr.msk.bf16.mxu0 %vm6275_vm1, %v9042_v52 }
0x12bd   :  { %5945 = vmatprep.subr.bf16.mxu0 %v9042_v52 }
0x12c3   :  { %5918 = vmatmul.mubr.msk.bf16.gmra.mrb[160].mxu0 %vm3333_vm7, %v3825_v19 }
0x12c4   :  { %5946 = vmatpush3.bf16.xpose.msra.mxu0 %v4109_v62  ;;  %5921 = vmatprep.mubr.msk.bf16.mxu0 %vm6275_vm1, %v9042_v52 }
0x12c5   :  { %5947 = vmatprep.subr.bf16.mxu0 %v9042_v52 }
0x12cb   :  { %5922 = vmatmul.mubr.msk.bf16.gmra.mrb[164].mxu0 %vm3333_vm7, %v3827_v14 }
0x12cc   :  { %5948 = vmatpush3.bf16.xpose.msra.mxu0 %v4112_v61  ;;  %5949 = vmatprep.mubr.msk.bf16.mxu0 %vm6275_vm1, %v9042_v52 }
0x12cd   :  { %5979 = vmatprep.subr.bf16.mxu0 %v9042_v52 }
0x12d3   :  { %5950 = vmatmul.mubr.msk.bf16.vlgmr.msra.gmra.mrb[168].mxu0 %vm3333_vm7, %v4085_v43 }
0x12d4   :  { %5953 = vmatprep.mubr.msk.bf16.mxu0 %vm6275_vm1, %v9042_v52 }
0x12db   :  { %5954 = vmatmul.mubr.msk.bf16.gmra.mrb[172].mxu0 %vm3333_vm7, %v4087_v60  ;;  %v8430_v60 = vpop.permute.xlu1 %3718 }
0x12dc   :  { %5957 = vmatprep.mubr.msk.bf16.mxu0 %vm6275_vm1, %v9042_v52 }
0x12e3   :  { %5958 = vmatmul.mubr.msk.bf16.gmra.mrb[176].mxu0 %vm3333_vm7, %v4089_v57 }
0x12e4   :  { %5995 = vmatprep.mubr.msk.bf16.mxu0 %vm6275_vm1, %v9042_v52 }
0x1303   :  { %v3386_v36 = vpop.f32.mrb[124].mxu1 }
0x1304   :  { %v8373_v21 = vadd.f32 %v3386_v36, %v8370_v31  ;;  %v5843_v47 = vpop.f32.mrb[125].mxu1 }
0x1305   :  { %v3389_v22 = vpop.f32.mrb[126].mxu1 }
0x1306   :  { %v8376_v49 = vadd.f32 %v3389_v22, %v8370_v31  ;;  %v5844_v6 = vpop.f32.mrb[127].mxu1  ;;  %v3410_v59 = vsel %vm3409_vm10, %v8373_v21, -inf }
0x1307   :  { %3411 = vmax.xlane.f32.xlu1 %v3410_v59  ;;  %v8439_v6 = vpop.permute.xlu1 %3978 }
0x1308   :  { %v3413_v41 = vsel %vm3409_vm10, %v8376_v49, -inf }
0x1309   :  { %3414 = vmax.xlane.f32.xlu0 %v3413_v41 }
0x130b   :  { %v3394_v63 = vpop.f32.mrb[128].mxu1 }
0x130c   :  { %v8383_v40 = vadd.f32 %v3394_v63, %v8370_v31  ;;  %v5847_v3 = vpop.f32.mrb[129].mxu1 }
0x130d   :  { %v3397_v58 = vpop.f32.mrb[130].mxu1 }
0x130e   :  { %v8386_v17 = vadd.f32 %v3397_v58, %v8370_v31  ;;  %v5848_v29 = vpop.f32.mrb[131].mxu1  ;;  %v3416_v27 = vsel %vm3409_vm10, %v8383_v40, -inf  ;;  %v8446_v58 = vpop.permute.xlu0 %3720 }
0x130f   :  { %3417 = vmax.xlane.f32.xlu0 %v3416_v27 }
0x1310   :  { %v3419_v53 = vsel %vm3409_vm10, %v8386_v17, -inf }
0x1311   :  { %3420 = vmax.xlane.f32.xlu1 %v3419_v53 }
0x1313   :  { %v3402_v9 = vpop.f32.mrb[132].mxu1 }
0x1314   :  { %v8393_v13 = vadd.f32 %v3402_v9, %v8370_v31  ;;  %v5851_v16 = vpop.f32.mrb[133].mxu1 }
0x1315   :  { %v3405_v46 = vpop.f32.mrb[134].mxu1 }
0x1316   :  { %v8396_v15 = vadd.f32 %v3405_v46, %v8370_v31  ;;  %v5852_v39 = vpop.f32.mrb[135].mxu1  ;;  %v3422_v50 = vsel %vm3409_vm10, %v8393_v13, -inf }
0x1317   :  { %3423 = vmax.xlane.f32.xlu0 %v3422_v50 }
0x1318   :  { %v3425_v56 = vsel %vm3409_vm10, %v8396_v15, -inf }
0x1319   :  { %3426 = vmax.xlane.f32.xlu1 %v3425_v56 }
0x1376   :  { %v3621_v30 = vpop.f32.mrb[144].mxu0 }
0x1377   :  { %v8403_v10 = vadd.f32 %v3621_v30, %v8370_v31  ;;  %v5879_v45 = vpop.f32.mrb[145].mxu0 }
0x1378   :  { %v3624_v7 = vpop.f32.mrb[146].mxu0 }
0x1379   :  { %v8406_v38 = vadd.f32 %v3624_v7, %v8370_v31  ;;  %v5880_v12 = vpop.f32.mrb[147].mxu0  ;;  %v3644_v28 = vsel %vm3409_vm10, %v8403_v10, -inf }
0x137a   :  { %3645 = vmax.xlane.f32.xlu0 %v3644_v28 }
0x137b   :  { %v3647_v51 = vsel %vm3409_vm10, %v8406_v38, -inf }
0x137c   :  { %3648 = vmax.xlane.f32.xlu1 %v3647_v51 }
0x137e   :  { %v3629_v44 = vpop.f32.mrb[148].mxu0 }
0x137f   :  { %v8413_v55 = vadd.f32 %v3629_v44, %v8370_v31  ;;  %v5883_v5 = vpop.f32.mrb[149].mxu0 }
0x1380   :  { %v3632_v1 = vpop.f32.mrb[150].mxu0 }
0x1381   :  { %v8416_v0 = vadd.f32 %v3632_v1, %v8370_v31  ;;  %v5884_v2 = vpop.f32.mrb[151].mxu0  ;;  %v3650_v26 = vsel %vm3409_vm10, %v8413_v55, -inf }
0x1382   :  { %3651 = vmax.xlane.f32.xlu0 %v3650_v26 }
0x1383   :  { %v3653_v11 = vsel %vm3409_vm10, %v8416_v0, -inf }
0x1384   :  { %3654 = vmax.xlane.f32.xlu1 %v3653_v11 }
0x1386   :  { %v3637_v42 = vpop.f32.mrb[152].mxu0 }
0x1387   :  { %v8423_v19 = vadd.f32 %v3637_v42, %v8370_v31  ;;  %v5887_v62 = vpop.f32.mrb[153].mxu0 }
0x1388   :  { %v3640_v35 = vpop.f32.mrb[154].mxu0 }
0x1389   :  { %v8426_v14 = vadd.f32 %v3640_v35, %v8370_v31  ;;  %v5888_v61 = vpop.f32.mrb[155].mxu0  ;;  %v3656_v43 = vsel %vm3409_vm10, %v8423_v19, -inf }
0x138a   :  { %3657 = vmax.xlane.f32.xlu0 %v3656_v43 }
0x138b   :  { %v3659_v57 = vsel %vm3409_vm10, %v8426_v14, -inf }
0x138c   :  { %3660 = vmax.xlane.f32.xlu1 %v3659_v57 }
0x138e   :  { %v3886_v36 = vpop.f32.mrb[156].mxu0 }
0x138f   :  { %v8437_v47 = vadd.f32 %v3886_v36, %v8370_v31  ;;  %v5915_v22 = vpop.f32.mrb[157].mxu0 }
0x1390   :  { %v3889_v59 = vpop.f32.mrb[158].mxu0 }
0x1391   :  { %v8442_v41 = vadd.f32 %v3889_v59, %v8370_v31  ;;  %v5916_v63 = vpop.f32.mrb[159].mxu0  ;;  %v3909_v3 = vsel %vm3409_vm10, %v8437_v47, -inf }
0x1392   :  { %3910 = vmax.xlane.f32.xlu0 %v3909_v3 }
0x1393   :  { %v3912_v29 = vsel %vm3409_vm10, %v8442_v41, -inf }
0x1394   :  { %v3412_v27 = vpop.xlane.xlu1 %3411  ;;  %3913 = vmax.xlane.f32.xlu1 %v3912_v29 }
0x1395   :  { %v3428_v53 = vsub.f32 %v8373_v21, %v3412_v27 }
0x1396   :  { %v3894_v9 = vpop.f32.mrb[160].mxu0  ;;  %v3415_v16 = vpop.xlane.xlu0 %3414 }
0x1397   :  { %v3434_v46 = vmul.f32 1.442695, %v3428_v53  ;;  %v8452_v39 = vadd.f32 %v3894_v9, %v8370_v31  ;;  %v3429_v50 = vsub.f32 %v8376_v49, %v3415_v16  ;;  %v5919_v56 = vpop.f32.mrb[161].mxu0 }
0x1398   :  { %v3897_v30 = vpop.f32.mrb[162].mxu0 }
0x1399   :  { %6138 = vpow2.f32 %v3434_v46  ;;  %v3436_v45 = vmul.f32 1.442695, %v3429_v50  ;;  %v8456_v7 = vadd.f32 %v3897_v30, %v8370_v31  ;;  %v5920_v12 = vpop.f32.mrb[163].mxu0  ;;  %v3915_v28 = vsel %vm3409_vm10, %v8452_v39, -inf }
0x139a   :  { %3916 = vmax.xlane.f32.xlu0 %v3915_v28 }
0x139b   :  { %6140 = vpow2.f32 %v3436_v45  ;;  %v3918_v21 = vsel %vm3409_vm10, %v8456_v7, -inf }
0x139c   :  { %v3418_v51 = vpop.xlane.xlu0 %3417  ;;  %3919 = vmax.xlane.f32.xlu1 %v3918_v21 }
0x139d   :  { %v3430_v49 = vsub.f32 %v8383_v40, %v3418_v51 }
0x139e   :  { %v3421_v44 = vpop.xlane.xlu1 %3420  ;;  %v3902_v5 = vpop.f32.mrb[164].mxu0 }
0x139f   :  { %v3438_v1 = vmul.f32 1.442695, %v3430_v49  ;;  %v3431_v2 = vsub.f32 %v8386_v17, %v3421_v44  ;;  %v8465_v26 = vadd.f32 %v3902_v5, %v8370_v31  ;;  %v5923_v11 = vpop.f32.mrb[165].mxu0 }
0x13a0   :  { %v3905_v42 = vpop.f32.mrb[166].mxu0 }
0x13a1   :  { %6142 = vpow2.f32 %v3438_v1  ;;  %v3440_v62 = vmul.f32 1.442695, %v3431_v2  ;;  %v8468_v35 = vadd.f32 %v3905_v42, %v8370_v31  ;;  %v5924_v61 = vpop.f32.mrb[167].mxu0  ;;  %v3921_v43 = vsel %vm3409_vm10, %v8465_v26, -inf }
0x13a2   :  { %3922 = vmax.xlane.f32.xlu0 %v3921_v43 }
0x13a3   :  { %v8472_v40 = vpop.eup %6138  ;;  %6144 = vpow2.f32 %v3440_v62  ;;  %v3924_v17 = vsel %vm3409_vm10, %v8468_v35, -inf }
0x13a4   :  { %v3424_v57 = vpop.xlane.xlu0 %3423  ;;  %3925 = vmax.xlane.f32.xlu1 %v3924_v17  ;;  %v3446_v36 = vsel %vm3409_vm10, %v8472_v40, 0.0 }
0x13a5   :  { %v8478_v22 = vpop.eup %6140  ;;  %v3432_v59 = vsub.f32 %v8393_v13, %v3424_v57 }
0x13a6   :  { %v4148_v63 = vpop.f32.mrb[168].mxu0  ;;  %3447 = vadd.xlane.f32.xlu0 %v3446_v36  ;;  %v3427_v3 = vpop.xlane.xlu1 %3426  ;;  %v3449_v29 = vsel %vm3409_vm10, %v8478_v22, 0.0 }
0x13a7   :  { %v3442_v27 = vmul.f32 1.442695, %v3432_v59  ;;  %v8484_v53 = vadd.f32 %v4148_v63, %v8370_v31  ;;  %v3433_v9 = vsub.f32 %v8396_v15, %v3427_v3  ;;  %v5951_v16 = vpop.f32.mrb[169].mxu0 }
0x13a8   :  { %v4151_v46 = vpop.f32.mrb[170].mxu0  ;;  %3450 = vadd.xlane.f32.xlu1 %v3449_v29 }
0x13a9   :  { %6146 = vpow2.f32 %v3442_v27  ;;  %v3444_v50 = vmul.f32 1.442695, %v3433_v9  ;;  %v8488_v56 = vadd.f32 %v4151_v46, %v8370_v31  ;;  %v5952_v13 = vpop.f32.mrb[171].mxu0  ;;  %v4171_v30 = vsel %vm3409_vm10, %v8484_v53, -inf }
0x13aa   :  { %4172 = vmax.xlane.f32.xlu0 %v4171_v30 }
0x13ab   :  { %v8492_v45 = vpop.eup %6142  ;;  %6148 = vpow2.f32 %v3444_v50  ;;  %v4174_v12 = vsel %vm3409_vm10, %v8488_v56, -inf }
0x13ac   :  { %4175 = vmax.xlane.f32.xlu1 %v4174_v12  ;;  %v3452_v15 = vsel %vm3409_vm10, %v8492_v45, 0.0 }
0x13ad   :  { %v8498_v28 = vpop.eup %6144 }
0x13ae   :  { %v4156_v21 = vpop.f32.mrb[172].mxu0  ;;  %3453 = vadd.xlane.f32.xlu0 %v3452_v15  ;;  %v3455_v51 = vsel %vm3409_vm10, %v8498_v28, 0.0 }
0x13af   :  { %v8503_v49 = vadd.f32 %v4156_v21, %v8370_v31  ;;  %v5955_v44 = vpop.f32.mrb[173].mxu0 }
0x13b0   :  { %v4159_v5 = vpop.f32.mrb[174].mxu0  ;;  %3456 = vadd.xlane.f32.xlu1 %v3455_v51 }
0x13b1   :  { %v8506_v1 = vadd.f32 %v4159_v5, %v8370_v31  ;;  %v5956_v2 = vpop.f32.mrb[175].mxu0  ;;  %v4177_v11 = vsel %vm3409_vm10, %v8503_v49, -inf }
0x13b2   :  { %4178 = vmax.xlane.f32.xlu0 %v4177_v11 }
0x13b3   :  { %v8510_v42 = vpop.eup %6146  ;;  %v4180_v62 = vsel %vm3409_vm10, %v8506_v1, -inf }
0x13b4   :  { %4181 = vmax.xlane.f32.xlu1 %v4180_v62  ;;  %v3458_v61 = vsel %vm3409_vm10, %v8510_v42, 0.0 }
0x13b5   :  { %v8516_v43 = vpop.eup %6148 }
0x13b6   :  { %v4164_v17 = vpop.f32.mrb[176].mxu0  ;;  %3459 = vadd.xlane.f32.xlu0 %v3458_v61  ;;  %v3461_v57 = vsel %vm3409_vm10, %v8516_v43, 0.0 }
0x13b7   :  { %v8521_v36 = vadd.f32 %v4164_v17, %v8370_v31  ;;  %v5959_v59 = vpop.f32.mrb[177].mxu0 }
0x13b8   :  { %v4167_v63 = vpop.f32.mrb[178].mxu0  ;;  %3462 = vadd.xlane.f32.xlu1 %v3461_v57 }
0x13b9   :  { %v8524_v3 = vadd.f32 %v4167_v63, %v8370_v31  ;;  %v5960_v29 = vpop.f32.mrb[179].mxu0  ;;  %v4183_v27 = vsel %vm3409_vm10, %v8521_v36, -inf }
0x13ba   :  { %4184 = vmax.xlane.f32.xlu0 %v4183_v27 }
0x13bb   :  { %v4186_v9 = vsel %vm3409_vm10, %v8524_v3, -inf }
0x13bc   :  { %4187 = vmax.xlane.f32.xlu1 %v4186_v9 }
0x13d0   :  { %3980 = vrot.lane.b32.xlu0 %v8272_v4, %s6278_s26 }
0x1407   :  { %v3646_v16 = vpop.xlane.xlu0 %3645 }
0x1408   :  { %v3662_v46 = vsub.f32 %v8403_v10, %v3646_v16 }
0x1409   :  { %v3649_v50 = vpop.xlane.xlu1 %3648 }
0x140a   :  { %v3668_v13 = vmul.f32 1.442695, %v3662_v46  ;;  %v3663_v31 = vsub.f32 %v8406_v38, %v3649_v50 }
0x140c   :  { %6150 = vpow2.f32 %v3668_v13  ;;  %v3670_v30 = vmul.f32 1.442695, %v3663_v31 }
0x140e   :  { %6152 = vpow2.f32 %v3670_v30 }
0x140f   :  { %v3652_v12 = vpop.xlane.xlu0 %3651 }
0x1410   :  { %v3664_v15 = vsub.f32 %v8413_v55, %v3652_v12 }
0x1411   :  { %v3655_v21 = vpop.xlane.xlu1 %3654 }
0x1412   :  { %v3672_v51 = vmul.f32 1.442695, %v3664_v15  ;;  %v3665_v44 = vsub.f32 %v8416_v0, %v3655_v21 }
0x1414   :  { %6154 = vpow2.f32 %v3672_v51  ;;  %v3674_v5 = vmul.f32 1.442695, %v3665_v44 }
0x1416   :  { %v8536_v2 = vpop.eup %6150  ;;  %6156 = vpow2.f32 %v3674_v5 }
0x1417   :  { %v3658_v10 = vpop.xlane.xlu0 %3657  ;;  %v3680_v11 = vsel %vm3409_vm10, %v8536_v2, 0.0 }
0x1418   :  { %v8540_v38 = vpop.eup %6152  ;;  %v3666_v62 = vsub.f32 %v8423_v19, %v3658_v10  ;;  %3681 = vadd.xlane.f32.xlu0 %v3680_v11 }
0x1419   :  { %v3661_v61 = vpop.xlane.xlu1 %3660  ;;  %v3683_v55 = vsel %vm3409_vm10, %v8540_v38, 0.0 }
0x141a   :  { %v3676_v17 = vmul.f32 1.442695, %v3666_v62  ;;  %v3667_v0 = vsub.f32 %v8426_v14, %v3661_v61  ;;  %3684 = vadd.xlane.f32.xlu1 %v3683_v55 }
0x141c   :  { %6158 = vpow2.f32 %v3676_v17  ;;  %v3678_v57 = vmul.f32 1.442695, %v3667_v0 }
0x141e   :  { %v8546_v59 = vpop.eup %6154  ;;  %6160 = vpow2.f32 %v3678_v57 }
0x141f   :  { %v3911_v63 = vpop.xlane.xlu0 %3910  ;;  %v3686_v29 = vsel %vm3409_vm10, %v8546_v59, 0.0 }
0x1420   :  { %v8550_v27 = vpop.eup %6156  ;;  %v3927_v19 = vsub.f32 %v8437_v47, %v3911_v63  ;;  %3687 = vadd.xlane.f32.xlu0 %v3686_v29 }
0x1421   :  { %v3914_v9 = vpop.xlane.xlu1 %3913  ;;  %v3689_v16 = vsel %vm3409_vm10, %v8550_v27, 0.0 }
0x1422   :  { %v3933_v14 = vmul.f32 1.442695, %v3927_v19  ;;  %v3928_v46 = vsub.f32 %v8442_v41, %v3914_v9  ;;  %3690 = vadd.xlane.f32.xlu1 %v3689_v16 }
0x1424   :  { %6162 = vpow2.f32 %v3933_v14  ;;  %v3935_v50 = vmul.f32 1.442695, %v3928_v46 }
0x1426   :  { %v8556_v13 = vpop.eup %6158  ;;  %6164 = vpow2.f32 %v3935_v50 }
0x1427   :  { %v3917_v31 = vpop.xlane.xlu0 %3916  ;;  %v3692_v30 = vsel %vm3409_vm10, %v8556_v13, 0.0 }
0x1428   :  { %v8560_v12 = vpop.eup %6160  ;;  %v3929_v47 = vsub.f32 %v8452_v39, %v3917_v31  ;;  %3693 = vadd.xlane.f32.xlu0 %v3692_v30 }
0x1429   :  { %v3920_v15 = vpop.xlane.xlu1 %3919  ;;  %v3695_v21 = vsel %vm3409_vm10, %v8560_v12, 0.0 }
0x142a   :  { %v3937_v41 = vmul.f32 1.442695, %v3929_v47  ;;  %v3930_v51 = vsub.f32 %v8456_v7, %v3920_v15  ;;  %3696 = vadd.xlane.f32.xlu1 %v3695_v21 }
0x142c   :  { %6166 = vpow2.f32 %v3937_v41  ;;  %v3939_v44 = vmul.f32 1.442695, %v3930_v51 }
0x142e   :  { %v8566_v5 = vpop.eup %6162  ;;  %6168 = vpow2.f32 %v3939_v44 }
0x142f   :  { %v3923_v10 = vpop.xlane.xlu0 %3922  ;;  %v3945_v11 = vsel %vm3409_vm10, %v8566_v5, 0.0 }
0x1430   :  { %v8570_v62 = vpop.eup %6164  ;;  %v3931_v39 = vsub.f32 %v8465_v26, %v3923_v10  ;;  %3946 = vadd.xlane.f32.xlu1 %v3945_v11 }
0x1431   :  { %v3926_v61 = vpop.xlane.xlu1 %3925  ;;  %v3948_v55 = vsel %vm3409_vm10, %v8570_v62, 0.0 }
0x1432   :  { %v3941_v7 = vmul.f32 1.442695, %v3931_v39  ;;  %v3932_v17 = vsub.f32 %v8468_v35, %v3926_v61  ;;  %3949 = vadd.xlane.f32.xlu0 %v3948_v55 }
0x1433   :  { %v3448_v0 = vpop.xlane.xlu0 %3447 }
0x1434   :  { %6170 = vpow2.f32 %v3941_v7  ;;  %v3943_v57 = vmul.f32 1.442695, %v3932_v17 }
0x1435   :  { %6172 = vrcp.f32 %v3448_v0  ;;  %v3451_v63 = vpop.xlane.xlu1 %3450 }
0x1436   :  { %v8576_v29 = vpop.eup %6166  ;;  %6174 = vpow2.f32 %v3943_v57 }
0x1437   :  { %6176 = vrcp.f32 %v3451_v63  ;;  %v4173_v19 = vpop.xlane.xlu0 %4172  ;;  %v3951_v26 = vsel %vm3409_vm10, %v8576_v29, 0.0 }
0x1438   :  { %v8580_v9 = vpop.eup %6168  ;;  %v4189_v16 = vsub.f32 %v8484_v53, %v4173_v19  ;;  %3952 = vadd.xlane.f32.xlu1 %v3951_v26 }
0x1439   :  { %v4176_v35 = vpop.xlane.xlu1 %4175  ;;  %v3954_v31 = vsel %vm3409_vm10, %v8580_v9, 0.0 }
0x143a   :  { %v4195_v14 = vmul.f32 1.442695, %v4189_v16  ;;  %v4190_v46 = vsub.f32 %v8488_v56, %v4176_v35 }
0x143b   :  { %v3454_v50 = vpop.xlane.xlu0 %3453 }
0x143c   :  { %6178 = vpow2.f32 %v4195_v14  ;;  %v4197_v30 = vmul.f32 1.442695, %v4190_v46  ;;  %3955 = vadd.xlane.f32.xlu1 %v3954_v31 }
0x143d   :  { %6180 = vrcp.f32 %v3454_v50  ;;  %v3457_v47 = vpop.xlane.xlu1 %3456 }
0x143e   :  { %v8586_v15 = vpop.eup %6170  ;;  %6182 = vpow2.f32 %v4197_v30 }
0x143f   :  { %v6173_v21 = vpop.eup %6172  ;;  %6184 = vrcp.f32 %v3457_v47  ;;  %v4179_v53 = vpop.xlane.xlu0 %4178  ;;  %v3957_v41 = vsel %vm3409_vm10, %v8586_v15, 0.0 }
0x1440   :  { %v8590_v51 = vpop.eup %6174  ;;  %v4191_v56 = vsub.f32 %v8503_v49, %v4179_v53  ;;  %3958 = vadd.xlane.f32.xlu1 %v3957_v41  ;;  %v3470_v11 = vmul.f32 %v6173_v21, %v8472_v40 }
0x1441   :  { %v6177_v44 = vpop.eup %6176  ;;  %v4182_v10 = vpop.xlane.xlu1 %4181  ;;  %v3960_v17 = vsel %vm3409_vm10, %v8590_v51, 0.0 }
0x1442   :  { %v3471_v39 = vmul.f32 %v6177_v44, %v8478_v22  ;;  %v4199_v61 = vmul.f32 1.442695, %v4191_v56  ;;  %v4192_v55 = vsub.f32 %v8506_v1, %v4182_v10 }
0x1443   :  { %v3460_v7 = vpop.xlane.xlu0 %3459 }
0x1444   :  { %v3476_v0 = vpack.c.bf16 %v3471_v39, %v3470_v11  ;;  %6186 = vpow2.f32 %v4199_v61  ;;  %v4201_v57 = vmul.f32 1.442695, %v4192_v55  ;;  %3961 = vadd.xlane.f32.xlu1 %v3960_v17 }
0x1445   :  { %6188 = vrcp.f32 %v3460_v7  ;;  %v3463_v49 = vpop.xlane.xlu1 %3462 }
0x1446   :  { %v8598_v63 = vpop.eup %6178  ;;  %6190 = vpow2.f32 %v4201_v57  ;;  %5860 = vmatmul.mubr.msk.bf16.vlgmr.msra.gmra.mrb[136].mxu1 %vm3409_vm10, %v3476_v0 }
0x1447   :  { %v6181_v40 = vpop.eup %6180  ;;  %5890 = vmatpush3.bf16.msra.mxu1 %v8434_v25  ;;  %6192 = vrcp.f32 %v3463_v49  ;;  %v4207_v22 = vsel %vm3409_vm10, %v8598_v63, 0.0  ;;  %5863 = vmatprep.mubr.msk.bf16.mxu1 %vm6275_vm1, %v9042_v52  ;;  %v4185_v47 = vpop.xlane.xlu0 %4184 }
0x1448   :  { %v8606_v1 = vpop.eup %6182  ;;  %4208 = vadd.xlane.f32.xlu0 %v4207_v22  ;;  %5891 = vmatprep.subr.bf16.mxu1 %v9042_v52  ;;  %v3472_v16 = vmul.f32 %v6181_v40, %v8492_v45 }
0x1449   :  { %v6185_v19 = vpop.eup %6184  ;;  %v4210_v26 = vsel %vm3409_vm10, %v8606_v1, 0.0  ;;  %v4188_v21 = vpop.xlane.xlu1 %4187 }
0x144a   :  { %4211 = vadd.xlane.f32.xlu1 %v4210_v26  ;;  %v3473_v25 = vmul.f32 %v6185_v19, %v8498_v28  ;;  %v4194_v53 = vsub.f32 %v8524_v3, %v4188_v21 }
0x144b   :  { %5892 = vmatpush3.bf16.msra.mxu1 %v8430_v60 }
0x144c   :  { %5893 = vmatprep.subr.bf16.mxu1 %v9042_v52  ;;  %v3477_v35 = vpack.c.bf16 %v3473_v25, %v3472_v16  ;;  %v4205_v56 = vmul.f32 1.442695, %v4194_v53 }
0x144e   :  { %v8615_v14 = vpop.eup %6186  ;;  %5864 = vmatmul.mubr.msk.bf16.gmra.mrb[140].mxu1 %vm3409_vm10, %v3477_v35 }
0x144f   :  { %v6189_v46 = vpop.eup %6188  ;;  %5894 = vmatpush3.bf16.msra.mxu1 %v8446_v58  ;;  %v4213_v50 = vsel %vm3409_vm10, %v8615_v14, 0.0  ;;  %5867 = vmatprep.mubr.msk.bf16.mxu1 %vm6275_vm1, %v9042_v52 }
0x1450   :  { %v8623_v45 = vpop.eup %6190  ;;  %4214 = vadd.xlane.f32.xlu1 %v4213_v50  ;;  %5925 = vmatprep.subr.bf16.mxu1 %v9042_v52  ;;  %v3474_v28 = vmul.f32 %v6189_v46, %v8510_v42  ;;  %v4193_v42 = vsub.f32 %v8521_v36, %v4185_v47 }
0x1451   :  { %v6193_v60 = vpop.eup %6192  ;;  %v4216_v30 = vsel %vm3409_vm10, %v8623_v45, 0.0 }
0x1452   :  { %v3475_v31 = vmul.f32 %v6193_v60, %v8516_v43  ;;  %v4203_v43 = vmul.f32 1.442695, %v4193_v42 }
0x1454   :  { %4217 = vadd.xlane.f32.xlu1 %v4216_v30  ;;  %v3478_v58 = vpack.c.bf16 %v3475_v31, %v3474_v28  ;;  %6194 = vpow2.f32 %v4203_v43 }
0x1455   :  { %6196 = vpow2.f32 %v4205_v56 }
0x1456   :  { %5868 = vmatmul.mubr.msk.bf16.gmra.mrb[144].mxu1 %vm3409_vm10, %v3478_v58 }
0x1457   :  { %5895 = vmatprep.mubr.msk.bf16.mxu1 %vm6275_vm1, %v9042_v52 }
0x145e   :  { %3982 = vrot.lane.b32.xlu0 %v8278_v37, %s6278_s26  ;;  %v8641_v41 = vpop.eup %6194 }
0x145f   :  { %v4219_v44 = vsel %vm3409_vm10, %v8641_v41, 0.0  ;;  %v8645_v10 = vpop.eup %6196 }
0x1465   :  { %4240 = vrot.lane.b32.xlu1 %v8259_v33, %s6279_s27  ;;  %v4222_v33 = vsel %vm3409_vm10, %v8645_v10, 0.0 }
0x1469   :  { %4242 = vrot.lane.b32.xlu1 %v8272_v4, %s6279_s27  ;;  %v3981_v4 = vpop.permute.xlu0 %3980 }
0x147d   :  { %4220 = vadd.xlane.f32.xlu0 %v4219_v44 }
0x148d   :  { %4223 = vadd.xlane.f32.xlu1 %v4222_v33 }
0x149e   :  { %4244 = vrot.lane.b32.xlu1 %v8278_v37, %s6279_s27 }
0x14a5   :  { %v3682_v36 = vpop.xlane.xlu0 %3681 }
0x14a6   :  { %6198 = vrcp.f32 %v3682_v36 }
0x14a7   :  { %v3685_v3 = vpop.xlane.xlu1 %3684 }
0x14a8   :  { %6200 = vrcp.f32 %v3685_v3 }
0x14ad   :  { %v3688_v11 = vpop.xlane.xlu0 %3687 }
0x14ae   :  { %6202 = vrcp.f32 %v3688_v11 }
0x14af   :  { %v3691_v39 = vpop.xlane.xlu1 %3690 }
0x14b0   :  { %v6199_v61 = vpop.eup %6198  ;;  %6204 = vrcp.f32 %v3691_v39 }
0x14b1   :  { %v3704_v7 = vmul.f32 %v6199_v61, %v8536_v2 }
0x14b2   :  { %v6201_v55 = vpop.eup %6200 }
0x14b3   :  { %v3705_v17 = vmul.f32 %v6201_v55, %v8540_v38 }
0x14b5   :  { %v3710_v0 = vpack.c.bf16 %v3705_v17, %v3704_v7  ;;  %v3694_v57 = vpop.xlane.xlu0 %3693 }
0x14b6   :  { %6206 = vrcp.f32 %v3694_v57 }
0x14b7   :  { %5896 = vmatmul.mubr.msk.bf16.vlgmr.msra.gmra.mrb[148].mxu1 %vm3409_vm10, %v3710_v0  ;;  %v3697_v37 = vpop.xlane.xlu1 %3696 }
0x14b8   :  { %v6203_v49 = vpop.eup %6202  ;;  %5926 = vmatpush3.bf16.msra.mxu1 %v8439_v6  ;;  %6208 = vrcp.f32 %v3697_v37  ;;  %5899 = vmatprep.mubr.msk.bf16.mxu1 %vm6275_vm1, %v9042_v52 }
0x14b9   :  { %5927 = vmatprep.subr.bf16.mxu1 %v9042_v52  ;;  %v3706_v2 = vmul.f32 %v6203_v49, %v8546_v59 }
0x14ba   :  { %v6205_v40 = vpop.eup %6204 }
0x14bb   :  { %v3707_v38 = vmul.f32 %v6205_v40, %v8550_v27 }
0x14bc   :  { %5928 = vmatpush3.bf16.msra.mxu1 %v3981_v4 }
0x14bd   :  { %v3711_v22 = vpack.c.bf16 %v3707_v38, %v3706_v2  ;;  %5929 = vmatprep.subr.bf16.mxu1 %v9042_v52  ;;  %v3947_v6 = vpop.xlane.xlu1 %3946 }
0x14bf   :  { %5900 = vmatmul.mubr.msk.bf16.gmra.mrb[152].mxu1 %vm3409_vm10, %v3711_v22  ;;  %v3950_v46 = vpop.xlane.xlu0 %3949 }
0x14c0   :  { %v6207_v19 = vpop.eup %6206  ;;  %5903 = vmatprep.mubr.msk.bf16.mxu1 %vm6275_vm1, %v9042_v52  ;;  %6210 = vrcp.f32 %v3950_v46 }
0x14c1   :  { %v3708_v16 = vmul.f32 %v6207_v19, %v8556_v13  ;;  %6212 = vrcp.f32 %v3947_v6 }
0x14c2   :  { %v6209_v26 = vpop.eup %6208 }
0x14c3   :  { %v3709_v25 = vmul.f32 %v6209_v26, %v8560_v12 }
0x14c5   :  { %v3953_v35 = vpop.xlane.xlu1 %3952  ;;  %v3712_v59 = vpack.c.bf16 %v3709_v25, %v3708_v16 }
0x14c7   :  { %5904 = vmatmul.mubr.msk.bf16.gmra.mrb[156].mxu1 %vm3409_vm10, %v3712_v59 }
0x14c8   :  { %5931 = vmatprep.mubr.msk.bf16.mxu1 %vm6275_vm1, %v9042_v52 }
0x14c9   :  { %v3956_v27 = vpop.xlane.xlu1 %3955 }
0x14ca   :  { %6214 = vrcp.f32 %v3956_v27  ;;  %v6211_v60 = vpop.eup %6210 }
0x14cb   :  { %6216 = vrcp.f32 %v3953_v35  ;;  %v6213_v13 = vpop.eup %6212  ;;  %v3970_v12 = vmul.f32 %v6211_v60, %v8570_v62 }
0x14cc   :  { %v3969_v30 = vmul.f32 %v6213_v13, %v8566_v5 }
0x14cd   :  { %v3959_v50 = vpop.xlane.xlu1 %3958 }
0x14ce   :  { %v3975_v42 = vpack.c.bf16 %v3970_v12, %v3969_v30 }
0x14d1   :  { %v3962_v28 = vpop.xlane.xlu1 %3961 }
0x14d2   :  { %6218 = vrcp.f32 %v3962_v28 }
0x14d3   :  { %6220 = vrcp.f32 %v3959_v50 }
0x14d4   :  { %v6215_v43 = vpop.eup %6214 }
0x14d5   :  { %v4209_v31 = vpop.xlane.xlu0 %4208  ;;  %v6217_v53 = vpop.eup %6216  ;;  %v3972_v62 = vmul.f32 %v6215_v43, %v8580_v9 }
0x14d6   :  { %v3971_v5 = vmul.f32 %v6217_v53, %v8576_v29 }
0x14d7   :  { %v4212_v58 = vpop.xlane.xlu1 %4211 }
0x14d8   :  { %v3976_v44 = vpack.c.bf16 %v3972_v62, %v3971_v5  ;;  %6222 = vrcp.f32 %v4212_v58  ;;  %v6090_v5 = vld [vmem:[%s8981_s5 + $0x90] sm:$0xff]  }
0x14d9   :  { %v3983_v47 = vpop.permute.xlu0 %3982  ;;  %6224 = vrcp.f32 %v4209_v31  ;;  %5980 = vmatpush3.bf16.msra.mxu0 %v6090_v5 }
0x14da   :  { %5930 = vmatpush3.bf16.msra.mxu1 %v3983_v47  ;;  %5981 = vmatprep.subr.bf16.mxu0 %v9042_v52 }
0x14db   :  { %5961 = vmatprep.subr.bf16.mxu1 %v9042_v52 }
0x14dc   :  { %v6219_v33 = vpop.eup %6218 }
0x14dd   :  { %5932 = vmatmul.mubr.msk.bf16.vlgmr.msra.gmra.mrb[160].mxu1 %vm3409_vm10, %v3975_v42  ;;  %v4215_v21 = vpop.xlane.xlu1 %4214  ;;  %v6221_v36 = vpop.eup %6220  ;;  %v3974_v3 = vmul.f32 %v6219_v33, %v8590_v51  ;;  %v6091_v33 = vld [vmem:[%s8981_s5 + $0x98] sm:$0xff]  }
0x14de   :  { %5935 = vmatprep.mubr.msk.bf16.mxu1 %vm6275_vm1, %v9042_v52  ;;  %v3973_v9 = vmul.f32 %v6221_v36, %v8586_v15  ;;  %5982 = vmatpush3.bf16.msra.mxu0 %v6091_v33  ;;  %v6092_v36 = vld [vmem:[%s8981_s5 + $0xa0] sm:$0xff]  }
0x14df   :  { %5983 = vmatprep.subr.bf16.mxu0 %v9042_v52  ;;  %v36_v33 = vld [vmem:[%s8984_s7 + $0x4] ss:$0 sm:$0xff] }
0x14e0   :  { %v3977_v39 = vpack.c.bf16 %v3974_v3, %v3973_v9 }
0x14e1   :  { %v4218_v56 = vpop.xlane.xlu1 %4217 }
0x14e2   :  { %6226 = vrcp.f32 %v4218_v56  ;;  %v6223_v29 = vpop.eup %6222  ;;  %5984 = vmatpush3.bf16.msra.mxu0 %v6092_v36 }
0x14e3   :  { %6228 = vrcp.f32 %v4215_v21  ;;  %v6225_v15 = vpop.eup %6224  ;;  %v4232_v17 = vmul.f32 %v6223_v29, %v8606_v1  ;;  %5985 = vmatprep.subr.bf16.mxu0 %v9042_v52 }
0x14e4   :  { %v4231_v57 = vmul.f32 %v6225_v15, %v8598_v63 }
0x14e5   :  { %5936 = vmatmul.mubr.msk.bf16.gmra.mrb[164].mxu1 %vm3409_vm10, %v3976_v44  ;;  %v4241_v4 = vpop.permute.xlu1 %4240 }
0x14e6   :  { %5962 = vmatpush3.bf16.msra.mxu1 %v4241_v4  ;;  %5939 = vmatprep.mubr.msk.bf16.mxu1 %vm6275_vm1, %v9042_v52  ;;  %v4237_v40 = vpack.c.bf16 %v4232_v17, %v4231_v57  ;;  %v6096_v17 = vld [vmem:[%s8981_s5 + $0xc0] sm:$0xff]  }
0x14e7   :  { %5963 = vmatprep.subr.bf16.mxu1 %v9042_v52 }
0x14e9   :  { %v4243_v11 = vpop.permute.xlu1 %4242 }
0x14ea   :  { %5964 = vmatpush3.bf16.msra.mxu1 %v4243_v11 }
0x14eb   :  { %5965 = vmatprep.subr.bf16.mxu1 %v9042_v52 }
0x14ec   :  { %v6227_v2 = vpop.eup %6226 }
0x14ed   :  { %5940 = vmatmul.mubr.msk.bf16.gmra.mrb[168].mxu1 %vm3409_vm10, %v3977_v39  ;;  %v6229_v19 = vpop.eup %6228  ;;  %v4234_v6 = vmul.f32 %v6227_v2, %v8623_v45  ;;  %v6093_v39 = vld [vmem:[%s8981_s5 + $0xa8] sm:$0xff]  }
0x14ee   :  { %5967 = vmatprep.mubr.msk.bf16.mxu1 %vm6275_vm1, %v9042_v52  ;;  %v4233_v26 = vmul.f32 %v6229_v19, %v8615_v14  ;;  %5986 = vmatpush3.bf16.msra.mxu0 %v6093_v39 }
0x14ef   :  { %5987 = vmatprep.subr.bf16.mxu0 %v9042_v52 }
0x14f0   :  { %v4238_v16 = vpack.c.bf16 %v4234_v6, %v4233_v26 }
0x150a   :  { %v4221_v37 = vpop.xlane.xlu0 %4220 }
0x1519   :  { %v3522_v61 = vpop.f32.mrb[136].mxu1 }
0x151a   :  { %3545 = vst.msk [vmem:[#allocation2] sm:$0xff] %vm3333_vm7, %v3522_v61  ;;  %v5861_v51 = vpop.f32.mrb[137].mxu1  ;;  %v4224_v55 = vpop.xlane.xlu1 %4223  ;;  %v6094_v61 = vld [vmem:[%s8981_s5 + $0xb0] sm:$0xff]  }
0x151b   :  { %v3525_v7 = vpop.f32.mrb[138].mxu1  ;;  %6230 = vrcp.f32 %v4224_v55  ;;  %5988 = vmatpush3.bf16.msra.mxu0 %v6094_v61 }
0x151c   :  { %3546 = vst.msk [vmem:[#allocation2 + $0x8] sm:$0xff] %vm3333_vm7, %v3525_v7  ;;  %v5862_v0 = vpop.f32.mrb[139].mxu1  ;;  %6232 = vrcp.f32 %v4221_v37  ;;  %5989 = vmatprep.subr.bf16.mxu0 %v9042_v52  ;;  %v6095_v7 = vld [vmem:[%s8981_s5 + $0xb8] sm:$0xff]  }
0x151d   :  { %v6097_v0 = vld [vmem:[%s8981_s5 + $0xc8] sm:$0xff]  }
0x151e   :  { %v4245_v49 = vpop.permute.xlu1 %4244 }
0x151f   :  { %5966 = vmatpush3.bf16.msra.mxu1 %v4245_v49  ;;  %5990 = vmatpush3.bf16.msra.mxu0 %v6095_v7 }
0x1520   :  { %5991 = vmatprep.subr.bf16.mxu0 %v9042_v52 }
0x1521   :  { %v3530_v38 = vpop.f32.mrb[140].mxu1 }
0x1522   :  { %3547 = vst.msk [vmem:[#allocation2 + $0x10] sm:$0xff] %vm3333_vm7, %v3530_v38  ;;  %v5865_v22 = vpop.f32.mrb[141].mxu1  ;;  %5968 = vmatmul.mubr.msk.bf16.vlgmr.msra.gmra.mrb[172].mxu1 %vm3409_vm10, %v4237_v40 }
0x1523   :  { %v3533_v1 = vpop.f32.mrb[142].mxu1  ;;  %5971 = vmatprep.mubr.msk.bf16.mxu1 %vm6275_vm1, %v9042_v52  ;;  %5992 = vmatpush3.bf16.msra.mxu0 %v6096_v17 }
0x1524   :  { %3548 = vst.msk [vmem:[#allocation2 + $0x18] sm:$0xff] %vm3333_vm7, %v3533_v1  ;;  %v5866_v63 = vpop.f32.mrb[143].mxu1  ;;  %5993 = vmatprep.subr.bf16.mxu0 %v9042_v52 }
0x1525   :  { %v6231_v25 = vpop.eup %6230 }
0x1526   :  { %v6233_v46 = vpop.eup %6232  ;;  %v4236_v45 = vmul.f32 %v6231_v25, %v8645_v10 }
0x1527   :  { %v4235_v14 = vmul.f32 %v6233_v46, %v8641_v41  ;;  %5994 = vmatpush3.bf16.msra.mxu0 %v6097_v0 }
0x1529   :  { %v3538_v35 = vpop.f32.mrb[144].mxu1  ;;  %v4239_v60 = vpack.c.bf16 %v4236_v45, %v4235_v14 }
0x152a   :  { %3549 = vst.msk [vmem:[#allocation2 + $0x20] sm:$0xff] %vm3333_vm7, %v3538_v35  ;;  %v5869_v59 = vpop.f32.mrb[145].mxu1  ;;  %5972 = vmatmul.mubr.msk.bf16.gmra.mrb[176].mxu1 %vm3409_vm10, %v4238_v16 }
0x152b   :  { %v3541_v27 = vpop.f32.mrb[146].mxu1  ;;  %5975 = vmatprep.mubr.msk.bf16.mxu1 %vm6275_vm1, %v9042_v52 }
0x152c   :  { %3550 = vst.msk [vmem:[#allocation2 + $0x28] sm:$0xff] %vm3333_vm7, %v3541_v27  ;;  %v5870_v50 = vpop.f32.mrb[147].mxu1 }
0x1532   :  { %5976 = vmatmul.mubr.msk.bf16.gmra.mrb[180].mxu1 %vm3409_vm10, %v4239_v60 }
0x1533   :  { %4703 = vmatprep.mubr.bf16.mxu1 %v9040_v23 }
0x158a   :  { %v3768_v28 = vpop.f32.mrb[148].mxu1 }
0x158b   :  { %3797 = vrot.lane.b32.xlu1 %v3768_v28, %s6279_s27  ;;  %v5897_v31 = vpop.f32.mrb[149].mxu1 }
0x158c   :  { %v3771_v13 = vpop.f32.mrb[150].mxu1 }
0x158d   :  { %3799 = vrot.lane.b32.xlu0 %v3771_v13, %s6279_s27  ;;  %v5898_v12 = vpop.f32.mrb[151].mxu1 }
0x1592   :  { %v3776_v30 = vpop.f32.mrb[152].mxu1 }
0x1593   :  { %3801 = vrot.lane.b32.xlu1 %v3776_v30, %s6279_s27  ;;  %v5901_v58 = vpop.f32.mrb[153].mxu1 }
0x1594   :  { %v3779_v10 = vpop.f32.mrb[154].mxu1 }
0x1595   :  { %3803 = vrot.lane.b32.xlu0 %v3779_v10, %s6279_s27  ;;  %v5902_v41 = vpop.f32.mrb[155].mxu1 }
0x159a   :  { %v3784_v47 = vpop.f32.mrb[156].mxu1 }
0x159b   :  { %v5905_v42 = vpop.f32.mrb[157].mxu1 }
0x159c   :  { %v3787_v43 = vpop.f32.mrb[158].mxu1 }
0x159d   :  { %v5906_v21 = vpop.f32.mrb[159].mxu1 }
0x15b0   :  { %v4030_v53 = vpop.f32.mrb[160].mxu1 }
0x15b1   :  { %4059 = vrot.lane.b32.xlu1 %v4030_v53, %s6278_s26  ;;  %v5933_v62 = vpop.f32.mrb[161].mxu1 }
0x15b2   :  { %v4033_v56 = vpop.f32.mrb[162].mxu1 }
0x15b3   :  { %v5934_v44 = vpop.f32.mrb[163].mxu1 }
0x15b5   :  { %4061 = vrot.lane.b32.xlu1 %v4033_v56, %s6278_s26 }
0x15b8   :  { %v4038_v4 = vpop.f32.mrb[164].mxu1 }
0x15b9   :  { %4063 = vrot.lane.b32.xlu1 %v4038_v4, %s6278_s26  ;;  %v5937_v3 = vpop.f32.mrb[165].mxu1 }
0x15ba   :  { %v4041_v11 = vpop.f32.mrb[166].mxu1 }
0x15bb   :  { %4065 = vrot.lane.b32.xlu0 %v4041_v11, %s6278_s26  ;;  %v5938_v9 = vpop.f32.mrb[167].mxu1 }
0x15bf   :  { %3807 = vrot.lane.b32.xlu0 %v3787_v43, %s6279_s27 }
0x15c0   :  { %v4046_v29 = vpop.f32.mrb[168].mxu1 }
0x15c1   :  { %v5941_v51 = vpop.f32.mrb[169].mxu1 }
0x15c2   :  { %v4049_v55 = vpop.f32.mrb[170].mxu1 }
0x15c3   :  { %v5942_v15 = vpop.f32.mrb[171].mxu1 }
0x15f5   :  { %v4292_v57 = vpop.f32.mrb[172].mxu1 }
0x15f6   :  { %4321 = vrot.lane.b32.xlu1 %v4292_v57, %s6277_s25  ;;  %v5969_v37 = vpop.f32.mrb[173].mxu1 }
0x15f7   :  { %v4295_v49 = vpop.f32.mrb[174].mxu1 }
0x15f8   :  { %v5970_v40 = vpop.f32.mrb[175].mxu1 }
0x15fa   :  { %4323 = vrot.lane.b32.xlu1 %v4295_v49, %s6277_s25 }
0x15fd   :  { %v3798_v2 = vpop.permute.xlu1 %3797  ;;  %v4300_v38 = vpop.f32.mrb[176].mxu1 }
0x15fe   :  { %3816 = vst.msk [vmem:[#allocation2] sm:$0xff] %vm3815_vm11, %v3798_v2  ;;  %3805 = vrot.lane.b32.xlu1 %v3784_v47, %s6279_s27  ;;  %v5973_v22 = vpop.f32.mrb[177].mxu1 }
0x15ff   :  { %v3800_v19 = vpop.permute.xlu0 %3799  ;;  %v4303_v1 = vpop.f32.mrb[178].mxu1 }
0x1600   :  { %3817 = vst.msk [vmem:[#allocation2 + $0x8] sm:$0xff] %vm3815_vm11, %v3800_v19  ;;  %4327 = vrot.lane.b32.xlu0 %v4303_v1, %s6277_s25  ;;  %v5974_v63 = vpop.f32.mrb[179].mxu1  ;;  %v6103_v19 = vld [vmem:[%s8983_s6 + $0x7c] ss:$12 sps:$4 sm:$0xff]  }
0x1602   :  { %4325 = vrot.lane.b32.xlu1 %v4300_v38, %s6277_s25 }
0x1604   :  { %4069 = vrot.lane.b32.xlu0 %v4049_v55, %s6278_s26 }
0x1605   :  { %v3802_v6 = vpop.permute.xlu1 %3801  ;;  %v4308_v26 = vpop.f32.mrb[180].mxu1 }
0x1606   :  { %3818 = vst.msk [vmem:[#allocation2 + $0x10] sm:$0xff] %vm3815_vm11, %v3802_v6  ;;  %4067 = vrot.lane.b32.xlu1 %v4046_v29, %s6278_s26  ;;  %v5977_v16 = vpop.f32.mrb[181].mxu1 }
0x1607   :  { %v3804_v25 = vpop.permute.xlu0 %3803  ;;  %v4311_v35 = vpop.f32.mrb[182].mxu1 }
0x1608   :  { %3819 = vst.msk [vmem:[#allocation2 + $0x18] sm:$0xff] %vm3815_vm11, %v3804_v25  ;;  %4331 = vrot.lane.b32.xlu0 %v4311_v35, %s6277_s25  ;;  %v5978_v59 = vpop.f32.mrb[183].mxu1 }
0x160a   :  { %4329 = vrot.lane.b32.xlu1 %v4308_v26, %s6277_s25 }
0x1623   :  { %v4060_v46 = vpop.permute.xlu1 %4059 }
0x1624   :  { %4078 = vst.msk [vmem:[#allocation2] sm:$0xff] %vm4077_vm12, %v4060_v46 }
0x1627   :  { %v4062_v27 = vpop.permute.xlu1 %4061 }
0x1628   :  { %4079 = vst.msk [vmem:[#allocation2 + $0x8] sm:$0xff] %vm4077_vm12, %v4062_v27 }
0x162b   :  { %v4064_v50 = vpop.permute.xlu1 %4063 }
0x162c   :  { %4080 = vst.msk [vmem:[#allocation2 + $0x10] sm:$0xff] %vm4077_vm12, %v4064_v50 }
0x162d   :  { %v4066_v45 = vpop.permute.xlu0 %4065 }
0x162e   :  { %4081 = vst.msk [vmem:[#allocation2 + $0x18] sm:$0xff] %vm4077_vm12, %v4066_v45 }
0x1631   :  { %v3808_v14 = vpop.permute.xlu0 %3807 }
0x1632   :  { %3821 = vst.msk [vmem:[#allocation2 + $0x28] sm:$0xff] %vm3815_vm11, %v3808_v14 }
0x1668   :  { %v4322_v60 = vpop.permute.xlu1 %4321 }
0x1669   :  { %4340 = vst.msk [vmem:[#allocation2] sm:$0xff] %vm4339_vm13, %v4322_v60 }
0x166c   :  { %v4324_v28 = vpop.permute.xlu1 %4323 }
0x166d   :  { %4341 = vst.msk [vmem:[#allocation2 + $0x8] sm:$0xff] %vm4339_vm13, %v4324_v28 }
0x1670   :  { %v3806_v31 = vpop.permute.xlu1 %3805  ;;  %v4346_v30 = vld [vmem:[#allocation2] sm:$0xff] }
0x1671   :  { %3820 = vst.msk [vmem:[#allocation2 + $0x20] sm:$0xff] %vm3815_vm11, %v3806_v31 }
0x1672   :  { %v4328_v13 = vpop.permute.xlu0 %4327 }
0x1673   :  { %4343 = vst.msk [vmem:[#allocation2 + $0x18] sm:$0xff] %vm4339_vm13, %v4328_v13 }
0x1674   :  { %v4326_v12 = vpop.permute.xlu1 %4325  ;;  %v4347_v58 = vld [vmem:[#allocation2 + $0x8] sm:$0xff] }
0x1675   :  { %4342 = vst.msk [vmem:[#allocation2 + $0x10] sm:$0xff] %vm4339_vm13, %v4326_v12  ;;  %v4352_v10 = vpack.c.bf16 %v4347_v58, %v4346_v30 }
0x1676   :  { %v4070_v41 = vpop.permute.xlu0 %4069 }
0x1677   :  { %4083 = vst.msk [vmem:[#allocation2 + $0x28] sm:$0xff] %vm4077_vm12, %v4070_v41  ;;  %5996 = vmatmul.mubr.bf16.vlgmr.msra.gmra.mrb[180].mxu0 %v4352_v10 }
0x1678   :  { %v4068_v47 = vpop.permute.xlu1 %4067  ;;  %5999 = vmatprep.mubr.msk.bf16.mxu0 %vm6275_vm1, %v9042_v52 }
0x1679   :  { %4082 = vst.msk [vmem:[#allocation2 + $0x20] sm:$0xff] %vm4077_vm12, %v4068_v47  ;;  %v6106_v47 = vld [vmem:[%s8983_s6 + $0x94] ss:$12 sps:$4 sm:$0xff]  }
0x167a   :  { %v4332_v42 = vpop.permute.xlu0 %4331  ;;  %v4349_v53 = vld [vmem:[#allocation2 + $0x18] sm:$0xff] }
0x167b   :  { %4345 = vst.msk [vmem:[#allocation2 + $0x28] sm:$0xff] %vm4339_vm13, %v4332_v42 }
0x167c   :  { %v4330_v43 = vpop.permute.xlu1 %4329  ;;  %v4348_v21 = vld [vmem:[#allocation2 + $0x10] sm:$0xff] }
0x167d   :  { %4344 = vst.msk [vmem:[#allocation2 + $0x20] sm:$0xff] %vm4339_vm13, %v4330_v43  ;;  %v4353_v62 = vpack.c.bf16 %v4349_v53, %v4348_v21  ;;  %v6104_v43 = vld [vmem:[%s8983_s6 + $0x90] ss:$12 sps:$4 sm:$0xff]   ;;  %v6109_v21 = vld [vmem:[%s8983_s6 + $0xac] ss:$12 sps:$4 sm:$0xff]  }
0x167e   :  { %v6107_v53 = vld [vmem:[%s8983_s6 + $0xa8] ss:$12 sps:$4 sm:$0xff]  }
0x167f   :  { %6000 = vmatmul.mubr.bf16.gmra.mrb[184].mxu0 %v4353_v62  ;;  %v6112_v62 = vld [vmem:[%s8983_s6 + $0xc4] ss:$12 sps:$4 sm:$0xff]  }
0x1680   :  { %6003 = vmatprep.mubr.msk.bf16.mxu0 %vm6275_vm1, %v9042_v52 }
0x1682   :  { %v4351_v5 = vld [vmem:[#allocation2 + $0x28] sm:$0xff] }
0x1684   :  { %v4350_v56 = vld [vmem:[#allocation2 + $0x20] sm:$0xff] }
0x1685   :  { %v4354_v44 = vpack.c.bf16 %v4351_v5, %v4350_v56  ;;  %v6110_v56 = vld [vmem:[%s8983_s6 + $0xc0] ss:$12 sps:$4 sm:$0xff]   ;;  %v6115_v5 = vld [vmem:[%s8983_s6 + $0xdc] ss:$12 sps:$4 sm:$0xff]  }
0x1687   :  { %6004 = vmatmul.mubr.bf16.gmra.mrb[188].mxu0 %v4354_v44  ;;  %v6113_v44 = vld [vmem:[%s8983_s6 + $0xd8] ss:$12 sps:$4 sm:$0xff]  }
0x174a   :  { %v4453_v4 = vpop.f32.mrb[180].mxu0 }
0x174b   :  { %v4454_v36 = vadd.f32 %v4453_v4, %v36_v33  ;;  %v5997_v3 = vpop.f32.mrb[181].mxu0  ;;  %v6116_v4 = vld [vmem:[%s8983_s6 + $0xf0] ss:$12 sps:$4 sm:$0xff]  }
0x174c   :  { %v4456_v11 = vpop.f32.mrb[182].mxu0  ;;  %v6119_v3 = vld [vmem:[%s8983_s6 + $0x108] ss:$12 sps:$4 sm:$0xff]  }
0x174d   :  { %v4476_v9 = vadd.f32 %v4454_v36, %v8225_v54  ;;  %v4457_v39 = vadd.f32 %v4456_v11, %v36_v33  ;;  %v5998_v29 = vpop.f32.mrb[183].mxu0  ;;  %v6121_v36 = vld [vmem:[%s8983_s6 + $0x10c] ss:$12 sps:$4 sm:$0xff]   ;;  %v6122_v11 = vld [vmem:[%s8981_s5 + $0x110] sm:$0xff]  }
0x174e   :  { %5501 = vmatprep.subr.bf16.mxu0 %v6122_v11  ;;  %v6125_v29 = vld [vmem:[%s8981_s5 + $0xd8] sm:$0xff]   ;;  %v6137_v11 = vld [vmem:[%s8981_s5 + $0x108] sm:$0xff]  }
0x174f   :  { %v4477_v61 = vadd.f32 %v4457_v39, %v8227_v48  ;;  %4482 = vadd.xlane.f32.xlu1 %v4476_v9  ;;  %v6124_v39 = vld [vmem:[%s8981_s5 + $0x118] sm:$0xff]  }
0x1751   :  { %4484 = vadd.xlane.f32.xlu0 %v4477_v61 }
0x1752   :  { %v4461_v52 = vpop.f32.mrb[184].mxu0 }
0x1753   :  { %v4462_v51 = vadd.f32 %v4461_v52, %v36_v33  ;;  %v6001_v55 = vpop.f32.mrb[185].mxu0  ;;  %v6127_v52 = vld [vmem:[%s8981_s5 + $0xe0] sm:$0xff]  }
0x1754   :  { %v4464_v15 = vpop.f32.mrb[186].mxu0  ;;  %v6129_v55 = vld [vmem:[%s8981_s5 + $0xe8] sm:$0xff]  }
0x1755   :  { %v4478_v7 = vadd.f32 %v4462_v51, %v8234_v32  ;;  %v4465_v17 = vadd.f32 %v4464_v15, %v36_v33  ;;  %v6002_v0 = vpop.f32.mrb[187].mxu0  ;;  %v6098_v32 = vld [vmem:[%s8983_s6 + $0x60] ss:$12 sps:$4 sm:$0xff]   ;;  %v6130_v15 = vld [vmem:[%s8981_s5 + $0x130] sm:$0xff]  }
0x1756   :  { %v6128_v51 = vld [vmem:[%s8981_s5 + $0x128] sm:$0xff]  }
0x1757   :  { %v4479_v57 = vadd.f32 %v4465_v17, %v8236_v24  ;;  %4486 = vadd.xlane.f32.xlu0 %v4478_v7  ;;  %v6100_v24 = vld [vmem:[%s8983_s6 + $0x64] ss:$12 sps:$4 sm:$0xff]   ;;  %v6132_v17 = vld [vmem:[%s8981_s5 + $0x138] sm:$0xff]  }
0x1758   :  { %4671 = vmatprep.subr.bf16.mxu1 %v6100_v24 }
0x1759   :  { %4488 = vadd.xlane.f32.xlu1 %v4479_v57  ;;  %4672 = vmatpush1.bf16.msra.mxu1 %v6098_v32 }
0x175a   :  { %v4469_v37 = vpop.f32.mrb[188].mxu0  ;;  %4673 = vmatprep.subr.bf16.mxu1 %v6103_v19 }
0x175b   :  { %v4470_v54 = vadd.f32 %v4469_v37, %v36_v33  ;;  %v6005_v49 = vpop.f32.mrb[189].mxu0 }
0x175c   :  { %v4472_v40 = vpop.f32.mrb[190].mxu0 }
0x175d   :  { %v4480_v48 = vadd.f32 %v4470_v54, %v8243_v20  ;;  %v4473_v2 = vadd.f32 %v4472_v40, %v36_v33  ;;  %v6006_v38 = vpop.f32.mrb[191].mxu0  ;;  %v6101_v20 = vld [vmem:[%s8983_s6 + $0x78] ss:$12 sps:$4 sm:$0xff]   ;;  %v6118_v33 = vld [vmem:[%s8983_s6 + $0xf4] ss:$12 sps:$4 sm:$0xff]  }
0x175e   :  { %4674 = vmatpush1.bf16.msra.mxu1 %v6101_v20  ;;  %v37_v20 = vld [vmem:[%s8984_s7 + $0x5] ss:$0 sm:$0xff] }
0x175f   :  { %v4481_v22 = vadd.f32 %v4473_v2, %v8245_v18  ;;  %4490 = vadd.xlane.f32.xlu0 %v4480_v48  ;;  %4675 = vmatprep.subr.bf16.mxu1 %v6106_v47 }
0x1761   :  { %4492 = vadd.xlane.f32.xlu1 %v4481_v22 }
0x1762   :  { %4676 = vmatpush1.bf16.msra.mxu1 %v6104_v43 }
0x1763   :  { %4677 = vmatprep.subr.bf16.mxu1 %v6109_v21 }
0x1766   :  { %4678 = vmatpush1.bf16.msra.mxu1 %v6107_v53 }
0x1767   :  { %4679 = vmatprep.subr.bf16.mxu1 %v6112_v62 }
0x176a   :  { %4680 = vmatpush1.bf16.msra.mxu1 %v6110_v56 }
0x176b   :  { %4681 = vmatprep.subr.bf16.mxu1 %v6115_v5 }
0x176e   :  { %4682 = vmatpush1.bf16.msra.mxu1 %v6113_v44 }
0x176f   :  { %4683 = vmatprep.subr.bf16.mxu1 %v6118_v33 }
0x1772   :  { %4684 = vmatpush1.bf16.msra.mxu1 %v6116_v4 }
0x1773   :  { %4685 = vmatprep.subr.bf16.mxu1 %v6121_v36 }
0x1776   :  { %4686 = vmatpush1.bf16.msra.mxu1 %v6119_v3  ;;  %v6136_v3 = vld [vmem:[%s8981_s5 + $0x148] sm:$0xff]  }
0x17dc   :  { %v4483_v18 = vpop.xlane.xlu1 %4482 }
0x17dd   :  { %v4495_v1 = vmul.f32 0.0078125, %v4483_v18 }
0x17de   :  { %v4485_v63 = vpop.xlane.xlu0 %4484 }
0x17df   :  { %v8799_v6 = vsub.f32 %v4476_v9, %v4495_v1  ;;  %v4496_v26 = vmul.f32 0.0078125, %v4485_v63  ;;  %v6123_v9 = vld [vmem:[%s8981_s5 + $0xd0] sm:$0xff]  }
0x17e0   :  { %5502 = vmatpush3.bf16.msra.mxu0 %v6123_v9  ;;  %v5033_v9 = vld [vmem:[%s8984_s7 + $0x7] ss:$8 sm:$0x3] }
0x17e1   :  { %v8801_v16 = vsub.f32 %v4477_v61, %v4496_v26  ;;  %v4507_v25 = vmul.f32 %v8799_v6, %v8799_v6  ;;  %5503 = vmatprep.subr.bf16.mxu0 %v6124_v39  ;;  %v6126_v61 = vld [vmem:[%s8981_s5 + $0x120] sm:$0xff]   ;;  %v4584_v39 = vrot.slane %v5033_v9, %v8153_v34 }
0x17e3   :  { %4513 = vadd.xlane.f32.xlu0 %v4507_v25  ;;  %v4508_v35 = vmul.f32 %v8801_v16, %v8801_v16 }
0x17e4   :  { %v4487_v59 = vpop.xlane.xlu0 %4486  ;;  %5504 = vmatpush3.bf16.msra.mxu0 %v6125_v29  ;;  %v4588_v29 = vrot.slane %v5033_v9, %v8159_v8 }
0x17e5   :  { %v4497_v46 = vmul.f32 0.0078125, %v4487_v59  ;;  %4515 = vadd.xlane.f32.xlu1 %v4508_v35  ;;  %5505 = vmatprep.subr.bf16.mxu0 %v6126_v61 }
0x17e6   :  { %v4489_v27 = vpop.xlane.xlu1 %4488 }
0x17e7   :  { %v8807_v50 = vsub.f32 %v4478_v7, %v4497_v46  ;;  %v4498_v45 = vmul.f32 0.0078125, %v4489_v27  ;;  %v6131_v7 = vld [vmem:[%s8981_s5 + $0xf0] sm:$0xff]  }
0x17e8   :  { %5506 = vmatpush3.bf16.msra.mxu0 %v6127_v52 }
0x17e9   :  { %v8809_v14 = vsub.f32 %v4479_v57, %v4498_v45  ;;  %v4509_v60 = vmul.f32 %v8807_v50, %v8807_v50  ;;  %5507 = vmatprep.subr.bf16.mxu0 %v6128_v51  ;;  %v38_v45 = vld [vmem:[%s8984_s7 + $0x6] ss:$0 sm:$0xff] }
0x17eb   :  { %4517 = vadd.xlane.f32.xlu0 %v4509_v60  ;;  %v4510_v28 = vmul.f32 %v8809_v14, %v8809_v14 }
0x17ec   :  { %v4491_v31 = vpop.xlane.xlu0 %4490  ;;  %5508 = vmatpush3.bf16.msra.mxu0 %v6129_v55 }
0x17ed   :  { %v4499_v13 = vmul.f32 0.0078125, %v4491_v31  ;;  %4519 = vadd.xlane.f32.xlu1 %v4510_v28  ;;  %5509 = vmatprep.subr.bf16.mxu0 %v6130_v15 }
0x17ee   :  { %v4493_v12 = vpop.xlane.xlu1 %4492 }
0x17ef   :  { %v8815_v30 = vsub.f32 %v4480_v48, %v4499_v13  ;;  %v4500_v58 = vmul.f32 0.0078125, %v4493_v12 }
0x17f0   :  { %5510 = vmatpush3.bf16.msra.mxu0 %v6131_v7 }
0x17f1   :  { %v8817_v10 = vsub.f32 %v4481_v22, %v4500_v58  ;;  %v4511_v41 = vmul.f32 %v8815_v30, %v8815_v30  ;;  %5511 = vmatprep.subr.bf16.mxu0 %v6132_v17 }
0x17f3   :  { %4521 = vadd.xlane.f32.xlu0 %v4511_v41  ;;  %v4512_v42 = vmul.f32 %v8817_v10, %v8817_v10 }
0x17f5   :  { %4523 = vadd.xlane.f32.xlu1 %v4512_v42 }
0x1870   :  { %v4514_v0 = vpop.xlane.xlu0 %4513 }
0x1871   :  { %v4525_v57 = vmul.f32 0.0078125, %v4514_v0 }
0x1872   :  { %v4516_v37 = vpop.xlane.xlu1 %4515 }
0x1873   :  { %v4531_v54 = vadd.f32 1e-05, %v4525_v57  ;;  %v4526_v49 = vmul.f32 0.0078125, %v4516_v37 }
0x1875   :  { %6234 = vrsqrt.f32 %v4531_v54  ;;  %v4532_v40 = vadd.f32 1e-05, %v4526_v49 }
0x1877   :  { %6236 = vrsqrt.f32 %v4532_v40 }
0x1878   :  { %v4518_v48 = vpop.xlane.xlu0 %4517 }
0x1879   :  { %v4527_v2 = vmul.f32 0.0078125, %v4518_v48 }
0x187a   :  { %v4520_v38 = vpop.xlane.xlu1 %4519 }
0x187b   :  { %v4533_v22 = vadd.f32 1e-05, %v4527_v2  ;;  %v4528_v32 = vmul.f32 0.0078125, %v4520_v38 }
0x187d   :  { %6238 = vrsqrt.f32 %v4533_v22  ;;  %v4534_v24 = vadd.f32 1e-05, %v4528_v32 }
0x187f   :  { %v6235_v19 = vpop.eup %6234  ;;  %6240 = vrsqrt.f32 %v4534_v24 }
0x1880   :  { %v4543_v18 = vmul.f32 %v6235_v19, %v8799_v6  ;;  %v4522_v1 = vpop.xlane.xlu0 %4521 }
0x1881   :  { %v6237_v63 = vpop.eup %6236  ;;  %v4529_v26 = vmul.f32 0.0078125, %v4522_v1 }
0x1882   :  { %v4549_v25 = vmul.f32 %v4543_v18, %v37_v20  ;;  %v4544_v35 = vmul.f32 %v6237_v63, %v8801_v16  ;;  %v4524_v59 = vpop.xlane.xlu1 %4523 }
0x1883   :  { %v4535_v46 = vadd.f32 1e-05, %v4529_v26  ;;  %v4530_v27 = vmul.f32 0.0078125, %v4524_v59 }
0x1884   :  { %v4550_v60 = vmul.f32 %v4544_v35, %v37_v20  ;;  %v8900_v31 = vadd.f32 %v4549_v25, %v38_v45 }
0x1885   :  { %6242 = vrsqrt.f32 %v4535_v46  ;;  %v4536_v28 = vadd.f32 1e-05, %v4530_v27 }
0x1886   :  { %v8902_v13 = vadd.f32 %v4550_v60, %v38_v45 }
0x1887   :  { %v6239_v6 = vpop.eup %6238  ;;  %6244 = vrsqrt.f32 %v4536_v28 }
0x1888   :  { %v4561_v12 = vpack.c.bf16 %v8902_v13, %v8900_v31  ;;  %v4545_v16 = vmul.f32 %v6239_v6, %v8807_v50 }
0x1889   :  { %v6241_v58 = vpop.eup %6240 }
0x188a   :  { %4704 = vmatmul.mubr.bf16.vlgmr.msra.gmra.mrb[184].mxu1 %v4561_v12  ;;  %v4546_v41 = vmul.f32 %v6241_v58, %v8809_v14  ;;  %v4551_v47 = vmul.f32 %v4545_v16, %v37_v20 }
0x188b   :  { %4713 = vmatprep.mubr.bf16.mxu1 %v9040_v23 }
0x188c   :  { %v4552_v42 = vmul.f32 %v4546_v41, %v37_v20  ;;  %v8909_v43 = vadd.f32 %v4551_v47, %v38_v45 }
0x188e   :  { %v8911_v21 = vadd.f32 %v4552_v42, %v38_v45 }
0x188f   :  { %v6243_v53 = vpop.eup %6242 }
0x1890   :  { %v4562_v62 = vpack.c.bf16 %v8911_v21, %v8909_v43  ;;  %v4547_v56 = vmul.f32 %v6243_v53, %v8815_v30  ;;  %v6133_v30 = vld [vmem:[%s8981_s5 + $0xf8] sm:$0xff]  }
0x1891   :  { %v6245_v5 = vpop.eup %6244  ;;  %5512 = vmatpush3.bf16.msra.mxu0 %v6133_v30 }
0x1892   :  { %4714 = vmatmul.mubr.bf16.gmra.mrb[188].mxu1 %v4562_v62  ;;  %v4548_v50 = vmul.f32 %v6245_v5, %v8817_v10  ;;  %v4553_v44 = vmul.f32 %v4547_v56, %v37_v20  ;;  %v6134_v10 = vld [vmem:[%s8981_s5 + $0x140] sm:$0xff]   ;;  %v41_v62 = vld [vmem:[%s8984_s7 + $0x18] ss:$0 sm:$0xff] }
0x1893   :  { %4723 = vmatprep.mubr.bf16.mxu1 %v9040_v23  ;;  %v6135_v23 = vld [vmem:[%s8981_s5 + $0x100] sm:$0xff]   ;;  %5513 = vmatprep.subr.bf16.mxu0 %v6134_v10 }
0x1894   :  { %v4554_v14 = vmul.f32 %v4548_v50, %v37_v20  ;;  %v8918_v33 = vadd.f32 %v4553_v44, %v38_v45 }
0x1895   :  { %5514 = vmatpush3.bf16.msra.mxu0 %v6135_v23 }
0x1896   :  { %v8920_v4 = vadd.f32 %v4554_v14, %v38_v45  ;;  %5515 = vmatprep.subr.bf16.mxu0 %v6136_v3 }
0x1898   :  { %v4563_v36 = vpack.c.bf16 %v8920_v4, %v8918_v33 }
0x1899   :  { %5516 = vmatpush3.bf16.msra.mxu0 %v6137_v11 }
0x189a   :  { %4724 = vmatmul.mubr.bf16.gmra.mrb[192].mxu1 %v4563_v36 }
0x195d   :  { %v4705_v61 = vpop.f32.mrb[184].mxu1 }
0x195e   :  { %v4706_v52 = vadd.f32 %v4705_v61, %v4584_v39  ;;  %v4707_v51 = vpop.f32.mrb[185].mxu1 }
0x195f   :  { %v4708_v55 = vadd.f32 %v4707_v51, %v4588_v29  ;;  %v4709_v15 = vpop.f32.mrb[186].mxu1 }
0x1960   :  { %v4710_v7 = vadd.f32 %v4709_v15, %v4584_v39  ;;  %v4711_v17 = vpop.f32.mrb[187].mxu1  ;;  %v4734_v57 = vmax.f32 %v4706_v52, 0.0 }
0x1961   :  { %v4712_v0 = vadd.f32 %v4711_v17, %v4588_v29  ;;  %v4735_v54 = vmax.f32 %v4708_v55, 0.0 }
0x1962   :  { %v4736_v37 = vmax.f32 %v4710_v7, 0.0 }
0x1963   :  { %v4737_v49 = vmax.f32 %v4712_v0, 0.0 }
0x1964   :  { %v4746_v40 = vpack.c.bf16 %v4736_v37, %v4734_v57 }
0x1965   :  { %v4747_v48 = vpack.c.bf16 %v4737_v49, %v4735_v54  ;;  %v4715_v2 = vpop.f32.mrb[188].mxu1 }
0x1966   :  { %v4716_v38 = vadd.f32 %v4715_v2, %v4584_v39  ;;  %v4717_v22 = vpop.f32.mrb[189].mxu1 }
0x1967   :  { %v4718_v34 = vadd.f32 %v4717_v22, %v4588_v29  ;;  %v4719_v32 = vpop.f32.mrb[190].mxu1  ;;  %4912 = vmatprep.mubr.bf16.mxu0 %v4747_v48 }
0x1968   :  { %v4720_v8 = vadd.f32 %v4719_v32, %v4584_v39  ;;  %v4721_v24 = vpop.f32.mrb[191].mxu1  ;;  %4913 = vmatmul.mubr.bf16.vlgmr.msra.gmra.mrb[192].mxu0 %v4746_v40  ;;  %v4738_v20 = vmax.f32 %v4716_v38, 0.0 }
0x1969   :  { %v4722_v19 = vadd.f32 %v4721_v24, %v4588_v29  ;;  %v4739_v1 = vmax.f32 %v4718_v34, 0.0 }
0x196a   :  { %v4740_v18 = vmax.f32 %v4720_v8, 0.0 }
0x196b   :  { %v4741_v63 = vmax.f32 %v4722_v19, 0.0 }
0x196c   :  { %v4748_v26 = vpack.c.bf16 %v4740_v18, %v4738_v20 }
0x196d   :  { %v4749_v25 = vpack.c.bf16 %v4741_v63, %v4739_v1  ;;  %v4725_v35 = vpop.f32.mrb[192].mxu1 }
0x196e   :  { %v4726_v59 = vadd.f32 %v4725_v35, %v4584_v39  ;;  %v4727_v46 = vpop.f32.mrb[193].mxu1 }
0x196f   :  { %v4728_v27 = vadd.f32 %v4727_v46, %v4588_v29  ;;  %v4729_v45 = vpop.f32.mrb[194].mxu1  ;;  %4920 = vmatprep.mubr.bf16.mxu0 %v4749_v25 }
0x1970   :  { %v4730_v60 = vadd.f32 %v4729_v45, %v4584_v39  ;;  %v4731_v28 = vpop.f32.mrb[195].mxu1  ;;  %4921 = vmatmul.mubr.bf16.gmra.mrb[196].mxu0 %v4748_v26  ;;  %v4742_v12 = vmax.f32 %v4726_v59, 0.0 }
0x1971   :  { %v4732_v6 = vadd.f32 %v4731_v28, %v4588_v29  ;;  %v4743_v58 = vmax.f32 %v4728_v27, 0.0 }
0x1972   :  { %v4744_v16 = vmax.f32 %v4730_v60, 0.0 }
0x1973   :  { %v4745_v41 = vmax.f32 %v4732_v6, 0.0 }
0x1974   :  { %v4750_v47 = vpack.c.bf16 %v4744_v16, %v4742_v12 }
0x1975   :  { %v4751_v42 = vpack.c.bf16 %v4745_v41, %v4743_v58 }
0x1977   :  { %4928 = vmatprep.mubr.bf16.mxu0 %v4751_v42 }
0x1978   :  { %4929 = vmatmul.mubr.bf16.gmra.mrb[200].mxu0 %v4750_v47 }
0x1a3b   :  { %v5517_v53 = vpop.f32.mrb[192].mxu0 }
0x1a3c   :  { %v5518_v56 = vpop.f32.mrb[193].mxu0 }
0x1a3d   :  { %v5519_v5 = vadd.f32 %v5518_v56, %v5517_v53  ;;  %v5520_v50 = vpop.f32.mrb[194].mxu0 }
0x1a3e   :  { %v5521_v44 = vpop.f32.mrb[195].mxu0 }
0x1a3f   :  { %v4915_v14 = vadd.f32 %v5519_v5, %v41_v62  ;;  %v5522_v36 = vadd.f32 %v5521_v44, %v5520_v50  ;;  %v42_v50 = vld [vmem:[%s8984_s7 + $0x19] ss:$0 sm:$0xff] }
0x1a41   :  { %v4918_v30 = vadd.f32 %v5522_v36, %v41_v62  ;;  %v4937_v10 = vadd.f32 %v4915_v14, %v8900_v31 }
0x1a43   :  { %v5523_v23 = vpop.f32.mrb[196].mxu0  ;;  %4943 = vadd.xlane.f32.xlu0 %v4937_v10  ;;  %v4938_v3 = vadd.f32 %v4918_v30, %v8902_v13  ;;  %v43_v30 = vld [vmem:[%s8984_s7 + $0x1a] ss:$0 sm:$0xff] }
0x1a44   :  { %v5524_v11 = vpop.f32.mrb[197].mxu0 }
0x1a45   :  { %v5525_v9 = vadd.f32 %v5524_v11, %v5523_v23  ;;  %v5526_v39 = vpop.f32.mrb[198].mxu0  ;;  %4945 = vadd.xlane.f32.xlu1 %v4938_v3 }
0x1a46   :  { %v5527_v29 = vpop.f32.mrb[199].mxu0 }
0x1a47   :  { %v4923_v61 = vadd.f32 %v5525_v9, %v41_v62  ;;  %v5528_v52 = vadd.f32 %v5527_v29, %v5526_v39 }
0x1a49   :  { %v4926_v51 = vadd.f32 %v5528_v52, %v41_v62  ;;  %v4939_v55 = vadd.f32 %v4923_v61, %v8909_v43 }
0x1a4b   :  { %v5529_v15 = vpop.f32.mrb[200].mxu0  ;;  %4947 = vadd.xlane.f32.xlu0 %v4939_v55  ;;  %v4940_v7 = vadd.f32 %v4926_v51, %v8911_v21 }
0x1a4c   :  { %v5530_v17 = vpop.f32.mrb[201].mxu0 }
0x1a4d   :  { %v5531_v31 = vadd.f32 %v5530_v17, %v5529_v15  ;;  %v5532_v0 = vpop.f32.mrb[202].mxu0  ;;  %4949 = vadd.xlane.f32.xlu1 %v4940_v7 }
0x1a4e   :  { %v5533_v57 = vpop.f32.mrb[203].mxu0 }
0x1a4f   :  { %v4931_v13 = vadd.f32 %v5531_v31, %v41_v62  ;;  %v5534_v37 = vadd.f32 %v5533_v57, %v5532_v0 }
0x1a51   :  { %v4934_v54 = vadd.f32 %v5534_v37, %v41_v62  ;;  %v4941_v49 = vadd.f32 %v4931_v13, %v8918_v33 }
0x1a53   :  { %4951 = vadd.xlane.f32.xlu0 %v4941_v49  ;;  %v4942_v40 = vadd.f32 %v4934_v54, %v8920_v4 }
0x1a55   :  { %4953 = vadd.xlane.f32.xlu1 %v4942_v40 }
0x1ad0   :  { %v4944_v48 = vpop.xlane.xlu0 %4943 }
0x1ad1   :  { %v4955_v43 = vmul.f32 0.0078125, %v4944_v48 }
0x1ad2   :  { %v4946_v2 = vpop.xlane.xlu1 %4945 }
0x1ad3   :  { %v4961_v38 = vsub.f32 %v4937_v10, %v4955_v43  ;;  %v4956_v22 = vmul.f32 0.0078125, %v4946_v2 }
0x1ad5   :  { %v4962_v21 = vsub.f32 %v4938_v3, %v4956_v22  ;;  %v4967_v34 = vmul.f32 %v4961_v38, %v4961_v38 }
0x1ad7   :  { %4973 = vadd.xlane.f32.xlu0 %v4967_v34  ;;  %v4968_v32 = vmul.f32 %v4962_v21, %v4962_v21 }
0x1ad8   :  { %v4948_v8 = vpop.xlane.xlu0 %4947 }
0x1ad9   :  { %v4957_v24 = vmul.f32 0.0078125, %v4948_v8  ;;  %4975 = vadd.xlane.f32.xlu1 %v4968_v32 }
0x1ada   :  { %v4950_v19 = vpop.xlane.xlu1 %4949 }
0x1adb   :  { %v4963_v20 = vsub.f32 %v4939_v55, %v4957_v24  ;;  %v4958_v18 = vmul.f32 0.0078125, %v4950_v19 }
0x1add   :  { %v4964_v33 = vsub.f32 %v4940_v7, %v4958_v18  ;;  %v4969_v1 = vmul.f32 %v4963_v20, %v4963_v20 }
0x1adf   :  { %4977 = vadd.xlane.f32.xlu0 %v4969_v1  ;;  %v4970_v4 = vmul.f32 %v4964_v33, %v4964_v33 }
0x1ae0   :  { %v4952_v63 = vpop.xlane.xlu0 %4951 }
0x1ae1   :  { %v4959_v26 = vmul.f32 0.0078125, %v4952_v63  ;;  %4979 = vadd.xlane.f32.xlu1 %v4970_v4 }
0x1ae2   :  { %v4954_v25 = vpop.xlane.xlu1 %4953 }
0x1ae3   :  { %v4965_v35 = vsub.f32 %v4941_v49, %v4959_v26  ;;  %v4960_v59 = vmul.f32 0.0078125, %v4954_v25 }
0x1ae5   :  { %v4966_v46 = vsub.f32 %v4942_v40, %v4960_v59  ;;  %v4971_v27 = vmul.f32 %v4965_v35, %v4965_v35 }
0x1ae7   :  { %4981 = vadd.xlane.f32.xlu0 %v4971_v27  ;;  %v4972_v45 = vmul.f32 %v4966_v46, %v4966_v46 }
0x1ae9   :  { %4983 = vadd.xlane.f32.xlu1 %v4972_v45 }
0x1b64   :  { %v4974_v60 = vpop.xlane.xlu0 %4973 }
0x1b65   :  { %v4985_v28 = vmul.f32 0.0078125, %v4974_v60 }
0x1b66   :  { %v4976_v6 = vpop.xlane.xlu1 %4975 }
0x1b67   :  { %v4991_v12 = vadd.f32 1e-05, %v4985_v28  ;;  %v4986_v16 = vmul.f32 0.0078125, %v4976_v6 }
0x1b69   :  { %6246 = vrsqrt.f32 %v4991_v12  ;;  %v4992_v58 = vadd.f32 1e-05, %v4986_v16 }
0x1b6b   :  { %6248 = vrsqrt.f32 %v4992_v58 }
0x1b6c   :  { %v4978_v41 = vpop.xlane.xlu0 %4977 }
0x1b6d   :  { %v4987_v47 = vmul.f32 0.0078125, %v4978_v41 }
0x1b6e   :  { %v4980_v42 = vpop.xlane.xlu1 %4979 }
0x1b6f   :  { %v4993_v53 = vadd.f32 1e-05, %v4987_v47  ;;  %v4988_v62 = vmul.f32 0.0078125, %v4980_v42 }
0x1b71   :  { %6250 = vrsqrt.f32 %v4993_v53  ;;  %v4994_v56 = vadd.f32 1e-05, %v4988_v62 }
0x1b73   :  { %v6247_v5 = vpop.eup %6246  ;;  %6252 = vrsqrt.f32 %v4994_v56 }
0x1b74   :  { %v5003_v44 = vmul.f32 %v6247_v5, %v4961_v38  ;;  %v4982_v14 = vpop.xlane.xlu0 %4981 }
0x1b75   :  { %v6249_v36 = vpop.eup %6248  ;;  %v4989_v10 = vmul.f32 0.0078125, %v4982_v14 }
0x1b76   :  { %v5009_v23 = vmul.f32 %v5003_v44, %v42_v50  ;;  %v5004_v3 = vmul.f32 %v6249_v36, %v4962_v21  ;;  %v4984_v11 = vpop.xlane.xlu1 %4983 }
0x1b77   :  { %v4995_v9 = vadd.f32 1e-05, %v4989_v10  ;;  %v4990_v39 = vmul.f32 0.0078125, %v4984_v11 }
0x1b78   :  { %v5015_v29 = vadd.f32 %v5009_v23, %v43_v30  ;;  %v5010_v61 = vmul.f32 %v5004_v3, %v42_v50 }
0x1b79   :  { %6254 = vrsqrt.f32 %v4995_v9  ;;  %v4996_v52 = vadd.f32 1e-05, %v4990_v39 }
0x1b7a   :  { %5021 = vst [vmem:[%s8985_s8] sm:$0xff] %v5015_v29  ;;  %v5016_v51 = vadd.f32 %v5010_v61, %v43_v30 }
0x1b7b   :  { %v6251_v55 = vpop.eup %6250  ;;  %6256 = vrsqrt.f32 %v4996_v52 }
0x1b7c   :  { %5022 = vst [vmem:[%s8985_s8 + $0x8] sm:$0xff] %v5016_v51  ;;  %v5005_v15 = vmul.f32 %v6251_v55, %v4963_v20 }
0x1b7d   :  { %v6253_v7 = vpop.eup %6252 }
0x1b7e   :  { %v5011_v17 = vmul.f32 %v5005_v15, %v42_v50  ;;  %v5006_v31 = vmul.f32 %v6253_v7, %v4964_v33 }
0x1b80   :  { %v5017_v0 = vadd.f32 %v5011_v17, %v43_v30  ;;  %v5012_v57 = vmul.f32 %v5006_v31, %v42_v50 }
0x1b82   :  { %5023 = vst [vmem:[%s8985_s8 + $0x10] sm:$0xff] %v5017_v0  ;;  %v5018_v13 = vadd.f32 %v5012_v57, %v43_v30 }
0x1b83   :  { %v6255_v37 = vpop.eup %6254 }
0x1b84   :  { %5024 = vst [vmem:[%s8985_s8 + $0x18] sm:$0xff] %v5018_v13  ;;  %v5007_v54 = vmul.f32 %v6255_v37, %v4965_v35 }
0x1b85   :  { %v6257_v49 = vpop.eup %6256 }
0x1b86   :  { %v5013_v40 = vmul.f32 %v5007_v54, %v42_v50  ;;  %v5008_v48 = vmul.f32 %v6257_v49, %v4966_v46 }
0x1b88   :  { %v5019_v43 = vadd.f32 %v5013_v40, %v43_v30  ;;  %v5014_v2 = vmul.f32 %v5008_v48, %v42_v50 }
0x1b8a   :  { %5025 = vst [vmem:[%s8985_s8 + $0x20] sm:$0xff] %v5019_v43  ;;  %v5020_v38 = vadd.f32 %v5014_v2, %v43_v30 }
0x1b8c   :  { %5026 = vst [vmem:[%s8985_s8 + $0x28] sm:$0xff] %v5020_v38 }

</bundles_post_ra>
